<compile_context>
chip_gen: v7x
topology: tpu7x:2x2x1
jax: 0.10.0
libtpu: 0.0.40
codegen_flags: <defaults>
</compile_context>

<pallas_src>
import math
import jax
import jax.numpy as jnp
from jax import lax
from jax.experimental import pallas as pl
from jax.experimental.pallas import tpu as pltpu

# ---- small synthetic DistilBERT config --------------------------------------
B, S     = 2, 8        # batch, sequence length
BS       = B * S
VOCAB    = 100         # vocab size
MAX_POS  = 32          # max position embeddings
H        = 32          # hidden size
NH       = 4           # attention heads
DH       = H // NH     # head dim
FFN      = 64          # feed-forward dim
NLAYERS  = 2           # transformer blocks
NCLS     = 3           # classifier classes
NCLS_PAD = 128         # lane-dense classifier output slab (sliced to NCLS outside)
LN_EPS   = 1e-12

_INV_SQRT_DH = 1.0 / math.sqrt(DH)
_INV_SQRT2   = 1.0 / math.sqrt(2.0)
_QKV_STRIDE  = 3 * DH      # head-major [q_h | k_h | v_h] lane stride


# ---------------------------- helpers -----------------------------------------
def _ln(x, g, b):
    mu = jnp.mean(x, axis=-1, keepdims=True)
    xc = x - mu
    var = jnp.mean(xc * xc, axis=-1, keepdims=True)
    return xc * lax.rsqrt(var + LN_EPS) * g + b


def _mm(a, w):
    # MXU matmul: bf16 operands (cast only if not already bf16), f32 accumulation.
    if a.dtype != jnp.bfloat16:
        a = a.astype(jnp.bfloat16)
    if w.dtype != jnp.bfloat16:
        w = w.astype(jnp.bfloat16)
    return jnp.dot(a, w, preferred_element_type=jnp.float32)


# ---------------------------- fused kernel -----------------------------------
def _bert_kernel(we_ref, pe_ref, mask_ref, emb_g_ref, emb_b_ref,
                 wqkv_ref, bqkv_ref, wo_ref, bo_ref, ln1g_ref, ln1b_ref,
                 w1_ref, b1_ref, w2_ref, b2_ref, ln2g_ref, ln2b_ref,
                 clsw_ref, clsb_ref, o_ref):
    # ---- embeddings: word + position add (folded in), then LayerNorm ----
    pe = pe_ref[0:S, :]                                        # (S, H) f32
    x = we_ref[...] + jnp.concatenate([pe] * B, axis=0)        # (BS, H) f32
    x = _ln(x, emb_g_ref[...], emb_b_ref[...])

    # ---- additive attention-mask bias, computed in-kernel ----
    bias = (1.0 - mask_ref[...].astype(jnp.float32)) * -1e9    # (B, S) f32

    for l in range(NLAYERS):                                   # fully unrolled
        wqkv_l = wqkv_ref[l]; bqkv_l = bqkv_ref[l]
        wo_l   = wo_ref[l];   bo_l   = bo_ref[l]

        # -- fused QKV projection: one MXU pass, bf16 cast hoisted --
        qkv = _mm(x, wqkv_l) + bqkv_l                          # (BS, 3H) f32
        qkv_bf = qkv.astype(jnp.bfloat16)

        # -- scores for every (batch, head), stacked along sublanes (S == 8) --
        score_tiles = []
        for b in range(B):
            r0 = b * S
            bias_b = bias[b:b + 1, :]                          # (1, S)
            for h in range(NH):
                c0 = h * _QKV_STRIDE                           # head-major layout
                q_h = qkv_bf[r0:r0 + S, c0:c0 + DH]            # (S, DH)
                k_h = qkv_bf[r0:r0 + S, c0 + DH:c0 + 2 * DH]   # (S, DH)
                # q @ k^T without an explicit transpose (contract last dims)
                s = lax.dot_general(q_h, k_h, (((1,), (1,)), ((), ())),
                                    preferred_element_type=jnp.float32)
                score_tiles.append(s * _INV_SQRT_DH + bias_b)  # (S, S)
        scores = jnp.concatenate(score_tiles, axis=0)          # (B*NH*S, S)

        # -- single batched softmax over all heads/batches --
        m = jnp.max(scores, axis=-1, keepdims=True)
        p = jnp.exp(scores - m)
        p = p * pl.reciprocal(jnp.sum(p, axis=-1, keepdims=True), approx=True)
        p_bf = p.astype(jnp.bfloat16)

        # -- context: accumulate head_ctx @ Wo row-slices (no concat, no ctx@Wo) --
        ctx_parts = []
        for b in range(B):
            r0 = b * S
            acc = bo_l                                         # (1, H), broadcasts
            for h in range(NH):
                c0 = h * _QKV_STRIDE
                v_h = qkv_bf[r0:r0 + S, c0 + 2 * DH:c0 + 3 * DH]   # (S, DH)
                pr = (b * NH + h) * S
                head_ctx = _mm(p_bf[pr:pr + S, :], v_h)        # (S, DH) f32
                acc = acc + _mm(head_ctx, wo_l[h * DH:(h + 1) * DH, :])  # (S, H)
            ctx_parts.append(acc)
        ctx = jnp.concatenate(ctx_parts, axis=0)               # (BS, H)
        x = _ln(ctx + x, ln1g_ref[l], ln1b_ref[l])             # sa_layer_norm

        # -- feed-forward sublayer --
        h1 = _mm(x, w1_ref[l]) + b1_ref[l]                     # (BS, FFN)
        h1 = 0.5 * h1 * (1.0 + lax.erf(h1 * _INV_SQRT2))       # exact GELU
        y = _mm(h1, w2_ref[l]) + b2_ref[l] + x                 # residual
        x = _ln(y, ln2g_ref[l], ln2b_ref[l])                   # output_layer_norm

    # ---- CLS pooling + classifier head (dropout(0.3): identity / eval) ----
    clsw = clsw_ref[...]                                       # (H, NCLS_PAD) bf16
    clsb = clsb_ref[...]                                       # (1, NCLS_PAD) f32
    for b in range(B):
        row = x[b * S:b * S + 1, :]                            # CLS token row (1, H)
        o_ref[b:b + 1, :] = _mm(row, clsw) + clsb              # lane-dense (1, 128)


# ------------------------------ model glue -----------------------------------
def bert_classifier_forward(prep, input_ids, attention_mask):
    b_, s_ = input_ids.shape
    assert (b_, s_) == (B, S)
    # only the embedding gather stays in plain JAX
    we = jnp.take(prep['word_emb'], input_ids.reshape(-1), axis=0)   # (BS, H) f32

    operands = (we, prep['pos_emb'], attention_mask,
                prep['emb_ln_g'], prep['emb_ln_b'],
                prep['wqkv'], prep['bqkv'], prep['wo'], prep['bo'],
                prep['ln1_g'], prep['ln1_b'],
                prep['w1'], prep['b1'], prep['w2'], prep['b2'],
                prep['ln2_g'], prep['ln2_b'],
                prep['cls_w'], prep['cls_b'])

    vmem_spec = pl.BlockSpec(memory_space=pltpu.MemorySpace.VMEM)
    logits_pad = pl.pallas_call(
        _bert_kernel,
        out_shape=jax.ShapeDtypeStruct((b_, NCLS_PAD), jnp.float32),
        in_specs=[vmem_spec] * len(operands),
        out_specs=vmem_spec,
    )(*operands)
    return logits_pad[:, :NCLS]


def init_params(key):
    keys = list(jax.random.split(key, 8 + NLAYERS * 8))
    ki = iter(keys)

    def w(shape):
        return jax.random.normal(next(ki), shape, jnp.float32) * 0.02

    params = dict(
        word_emb=w((VOCAB, H)),
        pos_emb=w((MAX_POS, H)),
        emb_ln_g=jnp.ones((1, H), jnp.float32),
        emb_ln_b=jnp.zeros((1, H), jnp.float32),
        cls_w=w((H, NCLS)),
        cls_b=jnp.zeros((NCLS,), jnp.float32),
        layers=[],
    )
    for _ in range(NLAYERS):
        params['layers'].append(dict(
            wq=w((H, H)), bq=jnp.zeros((H,), jnp.float32),
            wk=w((H, H)), bk=jnp.zeros((H,), jnp.float32),
            wv=w((H, H)), bv=jnp.zeros((H,), jnp.float32),
            wo=w((H, H)), bo=jnp.zeros((H,), jnp.float32),
            ln1_g=jnp.ones((1, H), jnp.float32), ln1_b=jnp.zeros((1, H), jnp.float32),
            w1=w((H, FFN)), b1=jnp.zeros((FFN,), jnp.float32),
            w2=w((FFN, H)), b2=jnp.zeros((H,), jnp.float32),
            ln2_g=jnp.ones((1, H), jnp.float32), ln2_b=jnp.zeros((1, H), jnp.float32),
        ))
    return params


def prepare_params(p):
    """Stack per-layer weights, interleave Q|K|V HEAD-MAJOR ([q_h|k_h|v_h] per
    head), pad classifier to 128 lanes, pre-cast matmul weights to bf16 (once,
    outside jit)."""
    L = p['layers']

    def _interleave_qkv(q, k, v):
        parts = []
        for h in range(NH):
            sl = slice(h * DH, (h + 1) * DH)
            parts += [q[..., sl], k[..., sl], v[..., sl]]
        return jnp.concatenate(parts, axis=-1)

    def stack(fn):
        return jnp.stack([fn(l) for l in L])

    wqkv = stack(lambda l: _interleave_qkv(l['wq'], l['wk'], l['wv']))          # (L, H, 3H)
    bqkv = stack(lambda l: _interleave_qkv(l['bq'], l['bk'], l['bv'])[None, :]) # (L, 1, 3H)
    wo   = stack(lambda l: l['wo'])
    bo   = stack(lambda l: l['bo'][None, :])
    ln1g = stack(lambda l: l['ln1_g']); ln1b = stack(lambda l: l['ln1_b'])
    w1   = stack(lambda l: l['w1']);    b1   = stack(lambda l: l['b1'][None, :])
    w2   = stack(lambda l: l['w2']);    b2   = stack(lambda l: l['b2'][None, :])
    ln2g = stack(lambda l: l['ln2_g']); ln2b = stack(lambda l: l['ln2_b'])

    cls_w = jnp.zeros((H, NCLS_PAD), jnp.float32).at[:, :NCLS].set(p['cls_w'])
    cls_b = jnp.zeros((1, NCLS_PAD), jnp.float32).at[0, :NCLS].set(p['cls_b'])

    bf16 = lambda a: a.astype(jnp.bfloat16)
    return dict(
        word_emb=p['word_emb'], pos_emb=p['pos_emb'],
        emb_ln_g=p['emb_ln_g'], emb_ln_b=p['emb_ln_b'],
        wqkv=bf16(wqkv), bqkv=bqkv, wo=bf16(wo), bo=bo,
        ln1_g=ln1g, ln1_b=ln1b,
        w1=bf16(w1), b1=b1, w2=bf16(w2), b2=b2,
        ln2_g=ln2g, ln2_b=ln2b,
        cls_w=bf16(cls_w), cls_b=cls_b,
    )


if __name__ == "__main__":
    key = jax.random.PRNGKey(0)
    pkey, ikey = jax.random.split(key)
    params = init_params(pkey)
    prep = prepare_params(params)

    input_ids = jax.random.randint(ikey, (B, S), 0, VOCAB, dtype=jnp.int32)
    attention_mask = jnp.ones((B, S), dtype=jnp.int32)

    logits = jax.jit(bert_classifier_forward)(prep, input_ids, attention_mask)
    jax.block_until_ready(logits)
    assert logits.shape == (B, NCLS) and logits.dtype == jnp.float32
    print("KERNEL_OK")
</pallas_src>

<mosaic_0001>
module attributes {stable_mosaic.version = 11 : i64} {
  func.func @_bert_kernel(%arg0: memref<16x32xf32, #tpu.memory_space<vmem>>, %arg1: memref<32x32xf32, #tpu.memory_space<vmem>>, %arg2: memref<2x8xi32, #tpu.memory_space<vmem>>, %arg3: memref<1x32xf32, #tpu.memory_space<vmem>>, %arg4: memref<1x32xf32, #tpu.memory_space<vmem>>, %arg5: memref<2x32x96xbf16, #tpu.memory_space<vmem>>, %arg6: memref<2x1x96xf32, #tpu.memory_space<vmem>>, %arg7: memref<2x32x32xbf16, #tpu.memory_space<vmem>>, %arg8: memref<2x1x32xf32, #tpu.memory_space<vmem>>, %arg9: memref<2x1x32xf32, #tpu.memory_space<vmem>>, %arg10: memref<2x1x32xf32, #tpu.memory_space<vmem>>, %arg11: memref<2x32x64xbf16, #tpu.memory_space<vmem>>, %arg12: memref<2x1x64xf32, #tpu.memory_space<vmem>>, %arg13: memref<2x64x32xbf16, #tpu.memory_space<vmem>>, %arg14: memref<2x1x32xf32, #tpu.memory_space<vmem>>, %arg15: memref<2x1x32xf32, #tpu.memory_space<vmem>>, %arg16: memref<2x1x32xf32, #tpu.memory_space<vmem>>, %arg17: memref<32x128xbf16, #tpu.memory_space<vmem>>, %arg18: memref<1x128xf32, #tpu.memory_space<vmem>>, %arg19: memref<2x128xf32, #tpu.memory_space<vmem>>) attributes {dimension_semantics = [], scalar_prefetch = 0 : i64, scratch_operands = 0 : i64, tpu.core_type = #tpu.core_type<tc>} {
    %c0 = arith.constant 0 : index
    %c0_0 = arith.constant 0 : index
    %0 = vector.load %arg1[%c0, %c0_0] : memref<32x32xf32, #tpu.memory_space<vmem>>, vector<8x32xf32>
    %c0_1 = arith.constant 0 : index
    %c0_2 = arith.constant 0 : index
    %1 = vector.load %arg0[%c0_1, %c0_2] : memref<16x32xf32, #tpu.memory_space<vmem>>, vector<16x32xf32>
    %2 = tpu.concatenate %0, %0 in 0 : vector<8x32xf32>, vector<8x32xf32> -> vector<16x32xf32>
    %3 = arith.addf %1, %2 : vector<16x32xf32>
    %c0_3 = arith.constant 0 : index
    %c0_4 = arith.constant 0 : index
    %4 = vector.load %arg3[%c0_3, %c0_4] : memref<1x32xf32, #tpu.memory_space<vmem>>, vector<1x32xf32>
    %c0_5 = arith.constant 0 : index
    %c0_6 = arith.constant 0 : index
    %5 = vector.load %arg4[%c0_5, %c0_6] : memref<1x32xf32, #tpu.memory_space<vmem>>, vector<1x32xf32>
    %cst = arith.constant dense<0.000000e+00> : vector<16xf32>
    %6 = vector.multi_reduction <add>, %3, %cst [1] : vector<16x32xf32> to vector<16xf32>
    %7 = vector.shape_cast %6 : vector<16xf32> to vector<16x1xf32>
    %cst_7 = arith.constant 3.200000e+01 : f32
    %8 = vector.broadcast %cst_7 : f32 to vector<16x1xf32>
    %9 = arith.divf %7, %8 : vector<16x1xf32>
    %10 = vector.broadcast %9 : vector<16x1xf32> to vector<16x32xf32>
    %11 = arith.subf %3, %10 : vector<16x32xf32>
    %12 = arith.mulf %11, %11 : vector<16x32xf32>
    %cst_8 = arith.constant dense<0.000000e+00> : vector<16xf32>
    %13 = vector.multi_reduction <add>, %12, %cst_8 [1] : vector<16x32xf32> to vector<16xf32>
    %14 = vector.shape_cast %13 : vector<16xf32> to vector<16x1xf32>
    %cst_9 = arith.constant 3.200000e+01 : f32
    %15 = vector.broadcast %cst_9 : f32 to vector<16x1xf32>
    %16 = arith.divf %14, %15 : vector<16x1xf32>
    %cst_10 = arith.constant 9.99999996E-13 : f32
    %17 = vector.broadcast %cst_10 : f32 to vector<16x1xf32>
    %18 = arith.addf %16, %17 : vector<16x1xf32>
    %19 = math.rsqrt %18 : vector<16x1xf32>
    %20 = vector.broadcast %19 : vector<16x1xf32> to vector<16x32xf32>
    %21 = arith.mulf %11, %20 : vector<16x32xf32>
    %22 = vector.broadcast %4 : vector<1x32xf32> to vector<16x32xf32>
    %23 = arith.mulf %21, %22 : vector<16x32xf32>
    %24 = vector.broadcast %5 : vector<1x32xf32> to vector<16x32xf32>
    %25 = arith.addf %23, %24 : vector<16x32xf32>
    %c0_11 = arith.constant 0 : index
    %c0_12 = arith.constant 0 : index
    %26 = vector.load %arg2[%c0_11, %c0_12] : memref<2x8xi32, #tpu.memory_space<vmem>>, vector<2x8xi32>
    %27 = arith.sitofp %26 : vector<2x8xi32> to vector<2x8xf32>
    %cst_13 = arith.constant 1.000000e+00 : f32
    %28 = vector.broadcast %cst_13 : f32 to vector<2x8xf32>
    %29 = arith.subf %28, %27 : vector<2x8xf32>
    %cst_14 = arith.constant -1.000000e+09 : f32
    %30 = vector.broadcast %cst_14 : f32 to vector<2x8xf32>
    %31 = arith.mulf %29, %30 : vector<2x8xf32>
    %c0_15 = arith.constant 0 : index
    %c0_16 = arith.constant 0 : index
    %c0_17 = arith.constant 0 : index
    %32 = vector.load %arg5[%c0_15, %c0_16, %c0_17] : memref<2x32x96xbf16, #tpu.memory_space<vmem>>, vector<1x32x96xbf16>
    %33 = vector.shape_cast %32 : vector<1x32x96xbf16> to vector<32x96xbf16>
    %c0_18 = arith.constant 0 : index
    %c0_19 = arith.constant 0 : index
    %c0_20 = arith.constant 0 : index
    %34 = vector.load %arg6[%c0_18, %c0_19, %c0_20] : memref<2x1x96xf32, #tpu.memory_space<vmem>>, vector<1x1x96xf32>
    %35 = vector.shape_cast %34 : vector<1x1x96xf32> to vector<1x96xf32>
    %c0_21 = arith.constant 0 : index
    %c0_22 = arith.constant 0 : index
    %c0_23 = arith.constant 0 : index
    %36 = vector.load %arg7[%c0_21, %c0_22, %c0_23] : memref<2x32x32xbf16, #tpu.memory_space<vmem>>, vector<1x32x32xbf16>
    %37 = vector.shape_cast %36 : vector<1x32x32xbf16> to vector<32x32xbf16>
    %c0_24 = arith.constant 0 : index
    %c0_25 = arith.constant 0 : index
    %c0_26 = arith.constant 0 : index
    %38 = vector.load %arg8[%c0_24, %c0_25, %c0_26] : memref<2x1x32xf32, #tpu.memory_space<vmem>>, vector<1x1x32xf32>
    %39 = vector.shape_cast %38 : vector<1x1x32xf32> to vector<1x32xf32>
    %40 = arith.truncf %25 : vector<16x32xf32> to vector<16x32xbf16>
    %cst_27 = arith.constant dense<0.000000e+00> : vector<16x96xf32>
    %41 = tpu.matmul %40, %33, %cst_27 {dimension_numbers = #tpu.dot_dimension_numbers<[1], [0], [0], [1], [0, 0, 1, 1], [], []>} : vector<16x32xbf16>, vector<32x96xbf16>, vector<16x96xf32> -> vector<16x96xf32>
    %42 = vector.broadcast %35 : vector<1x96xf32> to vector<16x96xf32>
    %43 = arith.addf %41, %42 : vector<16x96xf32>
    %44 = arith.truncf %43 : vector<16x96xf32> to vector<16x96xbf16>
    %45 = vector.extract_strided_slice %31 {offsets = [0, 0], sizes = [1, 8], strides = [1, 1]} : vector<2x8xf32> to vector<1x8xf32>
    %46 = vector.extract_strided_slice %44 {offsets = [0, 0], sizes = [8, 8], strides = [1, 1]} : vector<16x96xbf16> to vector<8x8xbf16>
    %47 = vector.extract_strided_slice %44 {offsets = [0, 8], sizes = [8, 8], strides = [1, 1]} : vector<16x96xbf16> to vector<8x8xbf16>
    %cst_28 = arith.constant dense<0.000000e+00> : vector<8x8xf32>
    %48 = tpu.matmul %46, %47, %cst_28 {dimension_numbers = #tpu.dot_dimension_numbers<[1], [1], [0], [0], [0, 0, 1, 0], [], []>} : vector<8x8xbf16>, vector<8x8xbf16>, vector<8x8xf32> -> vector<8x8xf32>
    %cst_29 = arith.constant 0.353553385 : f32
    %49 = vector.broadcast %cst_29 : f32 to vector<8x8xf32>
    %50 = arith.mulf %48, %49 : vector<8x8xf32>
    %51 = vector.broadcast %45 : vector<1x8xf32> to vector<8x8xf32>
    %52 = arith.addf %50, %51 : vector<8x8xf32>
    %53 = vector.extract_strided_slice %44 {offsets = [0, 24], sizes = [8, 8], strides = [1, 1]} : vector<16x96xbf16> to vector<8x8xbf16>
    %54 = vector.extract_strided_slice %44 {offsets = [0, 32], sizes = [8, 8], strides = [1, 1]} : vector<16x96xbf16> to vector<8x8xbf16>
    %cst_30 = arith.constant dense<0.000000e+00> : vector<8x8xf32>
    %55 = tpu.matmul %53, %54, %cst_30 {dimension_numbers = #tpu.dot_dimension_numbers<[1], [1], [0], [0], [0, 0, 1, 0], [], []>} : vector<8x8xbf16>, vector<8x8xbf16>, vector<8x8xf32> -> vector<8x8xf32>
    %cst_31 = arith.constant 0.353553385 : f32
    %56 = vector.broadcast %cst_31 : f32 to vector<8x8xf32>
    %57 = arith.mulf %55, %56 : vector<8x8xf32>
    %58 = vector.broadcast %45 : vector<1x8xf32> to vector<8x8xf32>
    %59 = arith.addf %57, %58 : vector<8x8xf32>
    %60 = vector.extract_strided_slice %44 {offsets = [0, 48], sizes = [8, 8], strides = [1, 1]} : vector<16x96xbf16> to vector<8x8xbf16>
    %61 = vector.extract_strided_slice %44 {offsets = [0, 56], sizes = [8, 8], strides = [1, 1]} : vector<16x96xbf16> to vector<8x8xbf16>
    %cst_32 = arith.constant dense<0.000000e+00> : vector<8x8xf32>
    %62 = tpu.matmul %60, %61, %cst_32 {dimension_numbers = #tpu.dot_dimension_numbers<[1], [1], [0], [0], [0, 0, 1, 0], [], []>} : vector<8x8xbf16>, vector<8x8xbf16>, vector<8x8xf32> -> vector<8x8xf32>
    %cst_33 = arith.constant 0.353553385 : f32
    %63 = vector.broadcast %cst_33 : f32 to vector<8x8xf32>
    %64 = arith.mulf %62, %63 : vector<8x8xf32>
    %65 = vector.broadcast %45 : vector<1x8xf32> to vector<8x8xf32>
    %66 = arith.addf %64, %65 : vector<8x8xf32>
    %67 = vector.extract_strided_slice %44 {offsets = [0, 72], sizes = [8, 8], strides = [1, 1]} : vector<16x96xbf16> to vector<8x8xbf16>
    %68 = vector.extract_strided_slice %44 {offsets = [0, 80], sizes = [8, 8], strides = [1, 1]} : vector<16x96xbf16> to vector<8x8xbf16>
    %cst_34 = arith.constant dense<0.000000e+00> : vector<8x8xf32>
    %69 = tpu.matmul %67, %68, %cst_34 {dimension_numbers = #tpu.dot_dimension_numbers<[1], [1], [0], [0], [0, 0, 1, 0], [], []>} : vector<8x8xbf16>, vector<8x8xbf16>, vector<8x8xf32> -> vector<8x8xf32>
    %cst_35 = arith.constant 0.353553385 : f32
    %70 = vector.broadcast %cst_35 : f32 to vector<8x8xf32>
    %71 = arith.mulf %69, %70 : vector<8x8xf32>
    %72 = vector.broadcast %45 : vector<1x8xf32> to vector<8x8xf32>
    %73 = arith.addf %71, %72 : vector<8x8xf32>
    %74 = vector.extract_strided_slice %31 {offsets = [1, 0], sizes = [1, 8], strides = [1, 1]} : vector<2x8xf32> to vector<1x8xf32>
    %75 = vector.extract_strided_slice %44 {offsets = [8, 0], sizes = [8, 8], strides = [1, 1]} : vector<16x96xbf16> to vector<8x8xbf16>
    %76 = vector.extract_strided_slice %44 {offsets = [8, 8], sizes = [8, 8], strides = [1, 1]} : vector<16x96xbf16> to vector<8x8xbf16>
    %cst_36 = arith.constant dense<0.000000e+00> : vector<8x8xf32>
    %77 = tpu.matmul %75, %76, %cst_36 {dimension_numbers = #tpu.dot_dimension_numbers<[1], [1], [0], [0], [0, 0, 1, 0], [], []>} : vector<8x8xbf16>, vector<8x8xbf16>, vector<8x8xf32> -> vector<8x8xf32>
    %cst_37 = arith.constant 0.353553385 : f32
    %78 = vector.broadcast %cst_37 : f32 to vector<8x8xf32>
    %79 = arith.mulf %77, %78 : vector<8x8xf32>
    %80 = vector.broadcast %74 : vector<1x8xf32> to vector<8x8xf32>
    %81 = arith.addf %79, %80 : vector<8x8xf32>
    %82 = vector.extract_strided_slice %44 {offsets = [8, 24], sizes = [8, 8], strides = [1, 1]} : vector<16x96xbf16> to vector<8x8xbf16>
    %83 = vector.extract_strided_slice %44 {offsets = [8, 32], sizes = [8, 8], strides = [1, 1]} : vector<16x96xbf16> to vector<8x8xbf16>
    %cst_38 = arith.constant dense<0.000000e+00> : vector<8x8xf32>
    %84 = tpu.matmul %82, %83, %cst_38 {dimension_numbers = #tpu.dot_dimension_numbers<[1], [1], [0], [0], [0, 0, 1, 0], [], []>} : vector<8x8xbf16>, vector<8x8xbf16>, vector<8x8xf32> -> vector<8x8xf32>
    %cst_39 = arith.constant 0.353553385 : f32
    %85 = vector.broadcast %cst_39 : f32 to vector<8x8xf32>
    %86 = arith.mulf %84, %85 : vector<8x8xf32>
    %87 = vector.broadcast %74 : vector<1x8xf32> to vector<8x8xf32>
    %88 = arith.addf %86, %87 : vector<8x8xf32>
    %89 = vector.extract_strided_slice %44 {offsets = [8, 48], sizes = [8, 8], strides = [1, 1]} : vector<16x96xbf16> to vector<8x8xbf16>
    %90 = vector.extract_strided_slice %44 {offsets = [8, 56], sizes = [8, 8], strides = [1, 1]} : vector<16x96xbf16> to vector<8x8xbf16>
    %cst_40 = arith.constant dense<0.000000e+00> : vector<8x8xf32>
    %91 = tpu.matmul %89, %90, %cst_40 {dimension_numbers = #tpu.dot_dimension_numbers<[1], [1], [0], [0], [0, 0, 1, 0], [], []>} : vector<8x8xbf16>, vector<8x8xbf16>, vector<8x8xf32> -> vector<8x8xf32>
    %cst_41 = arith.constant 0.353553385 : f32
    %92 = vector.broadcast %cst_41 : f32 to vector<8x8xf32>
    %93 = arith.mulf %91, %92 : vector<8x8xf32>
    %94 = vector.broadcast %74 : vector<1x8xf32> to vector<8x8xf32>
    %95 = arith.addf %93, %94 : vector<8x8xf32>
    %96 = vector.extract_strided_slice %44 {offsets = [8, 72], sizes = [8, 8], strides = [1, 1]} : vector<16x96xbf16> to vector<8x8xbf16>
    %97 = vector.extract_strided_slice %44 {offsets = [8, 80], sizes = [8, 8], strides = [1, 1]} : vector<16x96xbf16> to vector<8x8xbf16>
    %cst_42 = arith.constant dense<0.000000e+00> : vector<8x8xf32>
    %98 = tpu.matmul %96, %97, %cst_42 {dimension_numbers = #tpu.dot_dimension_numbers<[1], [1], [0], [0], [0, 0, 1, 0], [], []>} : vector<8x8xbf16>, vector<8x8xbf16>, vector<8x8xf32> -> vector<8x8xf32>
    %cst_43 = arith.constant 0.353553385 : f32
    %99 = vector.broadcast %cst_43 : f32 to vector<8x8xf32>
    %100 = arith.mulf %98, %99 : vector<8x8xf32>
    %101 = vector.broadcast %74 : vector<1x8xf32> to vector<8x8xf32>
    %102 = arith.addf %100, %101 : vector<8x8xf32>
    %103 = tpu.concatenate %52, %59, %66, %73, %81, %88, %95, %102 in 0 : vector<8x8xf32>, vector<8x8xf32>, vector<8x8xf32>, vector<8x8xf32>, vector<8x8xf32>, vector<8x8xf32>, vector<8x8xf32>, vector<8x8xf32> -> vector<64x8xf32>
    %cst_44 = arith.constant dense<0xFF800000> : vector<64xf32>
    %104 = vector.multi_reduction <maximumf>, %103, %cst_44 [1] : vector<64x8xf32> to vector<64xf32>
    %105 = vector.shape_cast %104 : vector<64xf32> to vector<64x1xf32>
    %106 = vector.broadcast %105 : vector<64x1xf32> to vector<64x8xf32>
    %107 = arith.subf %103, %106 : vector<64x8xf32>
    %108 = math.exp %107 : vector<64x8xf32>
    %cst_45 = arith.constant dense<0.000000e+00> : vector<64xf32>
    %109 = vector.multi_reduction <add>, %108, %cst_45 [1] : vector<64x8xf32> to vector<64xf32>
    %110 = vector.shape_cast %109 : vector<64xf32> to vector<64x1xf32>
    %111 = tpu.reciprocal %110 {approx = true} : vector<64x1xf32> -> vector<64x1xf32>
    %112 = vector.broadcast %111 : vector<64x1xf32> to vector<64x8xf32>
    %113 = arith.mulf %108, %112 : vector<64x8xf32>
    %114 = arith.truncf %113 : vector<64x8xf32> to vector<64x8xbf16>
    %115 = vector.extract_strided_slice %44 {offsets = [0, 16], sizes = [8, 8], strides = [1, 1]} : vector<16x96xbf16> to vector<8x8xbf16>
    %116 = vector.extract_strided_slice %114 {offsets = [0, 0], sizes = [8, 8], strides = [1, 1]} : vector<64x8xbf16> to vector<8x8xbf16>
    %cst_46 = arith.constant dense<0.000000e+00> : vector<8x8xf32>
    %117 = tpu.matmul %116, %115, %cst_46 {dimension_numbers = #tpu.dot_dimension_numbers<[1], [0], [0], [1], [0, 0, 1, 1], [], []>} : vector<8x8xbf16>, vector<8x8xbf16>, vector<8x8xf32> -> vector<8x8xf32>
    %118 = vector.extract_strided_slice %37 {offsets = [0, 0], sizes = [8, 32], strides = [1, 1]} : vector<32x32xbf16> to vector<8x32xbf16>
    %119 = arith.truncf %117 : vector<8x8xf32> to vector<8x8xbf16>
    %cst_47 = arith.constant dense<0.000000e+00> : vector<8x32xf32>
    %120 = tpu.matmul %119, %118, %cst_47 {dimension_numbers = #tpu.dot_dimension_numbers<[1], [0], [0], [1], [0, 0, 1, 1], [], []>} : vector<8x8xbf16>, vector<8x32xbf16>, vector<8x32xf32> -> vector<8x32xf32>
    %121 = vector.broadcast %39 : vector<1x32xf32> to vector<8x32xf32>
    %122 = arith.addf %121, %120 : vector<8x32xf32>
    %123 = vector.extract_strided_slice %44 {offsets = [0, 40], sizes = [8, 8], strides = [1, 1]} : vector<16x96xbf16> to vector<8x8xbf16>
    %124 = vector.extract_strided_slice %114 {offsets = [8, 0], sizes = [8, 8], strides = [1, 1]} : vector<64x8xbf16> to vector<8x8xbf16>
    %cst_48 = arith.constant dense<0.000000e+00> : vector<8x8xf32>
    %125 = tpu.matmul %124, %123, %cst_48 {dimension_numbers = #tpu.dot_dimension_numbers<[1], [0], [0], [1], [0, 0, 1, 1], [], []>} : vector<8x8xbf16>, vector<8x8xbf16>, vector<8x8xf32> -> vector<8x8xf32>
    %126 = vector.extract_strided_slice %37 {offsets = [8, 0], sizes = [8, 32], strides = [1, 1]} : vector<32x32xbf16> to vector<8x32xbf16>
    %127 = arith.truncf %125 : vector<8x8xf32> to vector<8x8xbf16>
    %cst_49 = arith.constant dense<0.000000e+00> : vector<8x32xf32>
    %128 = tpu.matmul %127, %126, %cst_49 {dimension_numbers = #tpu.dot_dimension_numbers<[1], [0], [0], [1], [0, 0, 1, 1], [], []>} : vector<8x8xbf16>, vector<8x32xbf16>, vector<8x32xf32> -> vector<8x32xf32>
    %129 = arith.addf %122, %128 : vector<8x32xf32>
    %130 = vector.extract_strided_slice %44 {offsets = [0, 64], sizes = [8, 8], strides = [1, 1]} : vector<16x96xbf16> to vector<8x8xbf16>
    %131 = vector.extract_strided_slice %114 {offsets = [16, 0], sizes = [8, 8], strides = [1, 1]} : vector<64x8xbf16> to vector<8x8xbf16>
    %cst_50 = arith.constant dense<0.000000e+00> : vector<8x8xf32>
    %132 = tpu.matmul %131, %130, %cst_50 {dimension_numbers = #tpu.dot_dimension_numbers<[1], [0], [0], [1], [0, 0, 1, 1], [], []>} : vector<8x8xbf16>, vector<8x8xbf16>, vector<8x8xf32> -> vector<8x8xf32>
    %133 = vector.extract_strided_slice %37 {offsets = [16, 0], sizes = [8, 32], strides = [1, 1]} : vector<32x32xbf16> to vector<8x32xbf16>
    %134 = arith.truncf %132 : vector<8x8xf32> to vector<8x8xbf16>
    %cst_51 = arith.constant dense<0.000000e+00> : vector<8x32xf32>
    %135 = tpu.matmul %134, %133, %cst_51 {dimension_numbers = #tpu.dot_dimension_numbers<[1], [0], [0], [1], [0, 0, 1, 1], [], []>} : vector<8x8xbf16>, vector<8x32xbf16>, vector<8x32xf32> -> vector<8x32xf32>
    %136 = arith.addf %129, %135 : vector<8x32xf32>
    %137 = vector.extract_strided_slice %44 {offsets = [0, 88], sizes = [8, 8], strides = [1, 1]} : vector<16x96xbf16> to vector<8x8xbf16>
    %138 = vector.extract_strided_slice %114 {offsets = [24, 0], sizes = [8, 8], strides = [1, 1]} : vector<64x8xbf16> to vector<8x8xbf16>
    %cst_52 = arith.constant dense<0.000000e+00> : vector<8x8xf32>
    %139 = tpu.matmul %138, %137, %cst_52 {dimension_numbers = #tpu.dot_dimension_numbers<[1], [0], [0], [1], [0, 0, 1, 1], [], []>} : vector<8x8xbf16>, vector<8x8xbf16>, vector<8x8xf32> -> vector<8x8xf32>
    %140 = vector.extract_strided_slice %37 {offsets = [24, 0], sizes = [8, 32], strides = [1, 1]} : vector<32x32xbf16> to vector<8x32xbf16>
    %141 = arith.truncf %139 : vector<8x8xf32> to vector<8x8xbf16>
    %cst_53 = arith.constant dense<0.000000e+00> : vector<8x32xf32>
    %142 = tpu.matmul %141, %140, %cst_53 {dimension_numbers = #tpu.dot_dimension_numbers<[1], [0], [0], [1], [0, 0, 1, 1], [], []>} : vector<8x8xbf16>, vector<8x32xbf16>, vector<8x32xf32> -> vector<8x32xf32>
    %143 = arith.addf %136, %142 : vector<8x32xf32>
    %144 = vector.extract_strided_slice %44 {offsets = [8, 16], sizes = [8, 8], strides = [1, 1]} : vector<16x96xbf16> to vector<8x8xbf16>
    %145 = vector.extract_strided_slice %114 {offsets = [32, 0], sizes = [8, 8], strides = [1, 1]} : vector<64x8xbf16> to vector<8x8xbf16>
    %cst_54 = arith.constant dense<0.000000e+00> : vector<8x8xf32>
    %146 = tpu.matmul %145, %144, %cst_54 {dimension_numbers = #tpu.dot_dimension_numbers<[1], [0], [0], [1], [0, 0, 1, 1], [], []>} : vector<8x8xbf16>, vector<8x8xbf16>, vector<8x8xf32> -> vector<8x8xf32>
    %147 = vector.extract_strided_slice %37 {offsets = [0, 0], sizes = [8, 32], strides = [1, 1]} : vector<32x32xbf16> to vector<8x32xbf16>
    %148 = arith.truncf %146 : vector<8x8xf32> to vector<8x8xbf16>
    %cst_55 = arith.constant dense<0.000000e+00> : vector<8x32xf32>
    %149 = tpu.matmul %148, %147, %cst_55 {dimension_numbers = #tpu.dot_dimension_numbers<[1], [0], [0], [1], [0, 0, 1, 1], [], []>} : vector<8x8xbf16>, vector<8x32xbf16>, vector<8x32xf32> -> vector<8x32xf32>
    %150 = vector.broadcast %39 : vector<1x32xf32> to vector<8x32xf32>
    %151 = arith.addf %150, %149 : vector<8x32xf32>
    %152 = vector.extract_strided_slice %44 {offsets = [8, 40], sizes = [8, 8], strides = [1, 1]} : vector<16x96xbf16> to vector<8x8xbf16>
    %153 = vector.extract_strided_slice %114 {offsets = [40, 0], sizes = [8, 8], strides = [1, 1]} : vector<64x8xbf16> to vector<8x8xbf16>
    %cst_56 = arith.constant dense<0.000000e+00> : vector<8x8xf32>
    %154 = tpu.matmul %153, %152, %cst_56 {dimension_numbers = #tpu.dot_dimension_numbers<[1], [0], [0], [1], [0, 0, 1, 1], [], []>} : vector<8x8xbf16>, vector<8x8xbf16>, vector<8x8xf32> -> vector<8x8xf32>
    %155 = vector.extract_strided_slice %37 {offsets = [8, 0], sizes = [8, 32], strides = [1, 1]} : vector<32x32xbf16> to vector<8x32xbf16>
    %156 = arith.truncf %154 : vector<8x8xf32> to vector<8x8xbf16>
    %cst_57 = arith.constant dense<0.000000e+00> : vector<8x32xf32>
    %157 = tpu.matmul %156, %155, %cst_57 {dimension_numbers = #tpu.dot_dimension_numbers<[1], [0], [0], [1], [0, 0, 1, 1], [], []>} : vector<8x8xbf16>, vector<8x32xbf16>, vector<8x32xf32> -> vector<8x32xf32>
    %158 = arith.addf %151, %157 : vector<8x32xf32>
    %159 = vector.extract_strided_slice %44 {offsets = [8, 64], sizes = [8, 8], strides = [1, 1]} : vector<16x96xbf16> to vector<8x8xbf16>
    %160 = vector.extract_strided_slice %114 {offsets = [48, 0], sizes = [8, 8], strides = [1, 1]} : vector<64x8xbf16> to vector<8x8xbf16>
    %cst_58 = arith.constant dense<0.000000e+00> : vector<8x8xf32>
    %161 = tpu.matmul %160, %159, %cst_58 {dimension_numbers = #tpu.dot_dimension_numbers<[1], [0], [0], [1], [0, 0, 1, 1], [], []>} : vector<8x8xbf16>, vector<8x8xbf16>, vector<8x8xf32> -> vector<8x8xf32>
    %162 = vector.extract_strided_slice %37 {offsets = [16, 0], sizes = [8, 32], strides = [1, 1]} : vector<32x32xbf16> to vector<8x32xbf16>
    %163 = arith.truncf %161 : vector<8x8xf32> to vector<8x8xbf16>
    %cst_59 = arith.constant dense<0.000000e+00> : vector<8x32xf32>
    %164 = tpu.matmul %163, %162, %cst_59 {dimension_numbers = #tpu.dot_dimension_numbers<[1], [0], [0], [1], [0, 0, 1, 1], [], []>} : vector<8x8xbf16>, vector<8x32xbf16>, vector<8x32xf32> -> vector<8x32xf32>
    %165 = arith.addf %158, %164 : vector<8x32xf32>
    %166 = vector.extract_strided_slice %44 {offsets = [8, 88], sizes = [8, 8], strides = [1, 1]} : vector<16x96xbf16> to vector<8x8xbf16>
    %167 = vector.extract_strided_slice %114 {offsets = [56, 0], sizes = [8, 8], strides = [1, 1]} : vector<64x8xbf16> to vector<8x8xbf16>
    %cst_60 = arith.constant dense<0.000000e+00> : vector<8x8xf32>
    %168 = tpu.matmul %167, %166, %cst_60 {dimension_numbers = #tpu.dot_dimension_numbers<[1], [0], [0], [1], [0, 0, 1, 1], [], []>} : vector<8x8xbf16>, vector<8x8xbf16>, vector<8x8xf32> -> vector<8x8xf32>
    %169 = vector.extract_strided_slice %37 {offsets = [24, 0], sizes = [8, 32], strides = [1, 1]} : vector<32x32xbf16> to vector<8x32xbf16>
    %170 = arith.truncf %168 : vector<8x8xf32> to vector<8x8xbf16>
    %cst_61 = arith.constant dense<0.000000e+00> : vector<8x32xf32>
    %171 = tpu.matmul %170, %169, %cst_61 {dimension_numbers = #tpu.dot_dimension_numbers<[1], [0], [0], [1], [0, 0, 1, 1], [], []>} : vector<8x8xbf16>, vector<8x32xbf16>, vector<8x32xf32> -> vector<8x32xf32>
    %172 = arith.addf %165, %171 : vector<8x32xf32>
    %173 = tpu.concatenate %143, %172 in 0 : vector<8x32xf32>, vector<8x32xf32> -> vector<16x32xf32>
    %174 = arith.addf %173, %25 : vector<16x32xf32>
    %c0_62 = arith.constant 0 : index
    %c0_63 = arith.constant 0 : index
    %c0_64 = arith.constant 0 : index
    %175 = vector.load %arg9[%c0_62, %c0_63, %c0_64] : memref<2x1x32xf32, #tpu.memory_space<vmem>>, vector<1x1x32xf32>
    %176 = vector.shape_cast %175 : vector<1x1x32xf32> to vector<1x32xf32>
    %c0_65 = arith.constant 0 : index
    %c0_66 = arith.constant 0 : index
    %c0_67 = arith.constant 0 : index
    %177 = vector.load %arg10[%c0_65, %c0_66, %c0_67] : memref<2x1x32xf32, #tpu.memory_space<vmem>>, vector<1x1x32xf32>
    %178 = vector.shape_cast %177 : vector<1x1x32xf32> to vector<1x32xf32>
    %cst_68 = arith.constant dense<0.000000e+00> : vector<16xf32>
    %179 = vector.multi_reduction <add>, %174, %cst_68 [1] : vector<16x32xf32> to vector<16xf32>
    %180 = vector.shape_cast %179 : vector<16xf32> to vector<16x1xf32>
    %cst_69 = arith.constant 3.200000e+01 : f32
    %181 = vector.broadcast %cst_69 : f32 to vector<16x1xf32>
    %182 = arith.divf %180, %181 : vector<16x1xf32>
    %183 = vector.broadcast %182 : vector<16x1xf32> to vector<16x32xf32>
    %184 = arith.subf %174, %183 : vector<16x32xf32>
    %185 = arith.mulf %184, %184 : vector<16x32xf32>
    %cst_70 = arith.constant dense<0.000000e+00> : vector<16xf32>
    %186 = vector.multi_reduction <add>, %185, %cst_70 [1] : vector<16x32xf32> to vector<16xf32>
    %187 = vector.shape_cast %186 : vector<16xf32> to vector<16x1xf32>
    %cst_71 = arith.constant 3.200000e+01 : f32
    %188 = vector.broadcast %cst_71 : f32 to vector<16x1xf32>
    %189 = arith.divf %187, %188 : vector<16x1xf32>
    %cst_72 = arith.constant 9.99999996E-13 : f32
    %190 = vector.broadcast %cst_72 : f32 to vector<16x1xf32>
    %191 = arith.addf %189, %190 : vector<16x1xf32>
    %192 = math.rsqrt %191 : vector<16x1xf32>
    %193 = vector.broadcast %192 : vector<16x1xf32> to vector<16x32xf32>
    %194 = arith.mulf %184, %193 : vector<16x32xf32>
    %195 = vector.broadcast %176 : vector<1x32xf32> to vector<16x32xf32>
    %196 = arith.mulf %194, %195 : vector<16x32xf32>
    %197 = vector.broadcast %178 : vector<1x32xf32> to vector<16x32xf32>
    %198 = arith.addf %196, %197 : vector<16x32xf32>
    %c0_73 = arith.constant 0 : index
    %c0_74 = arith.constant 0 : index
    %c0_75 = arith.constant 0 : index
    %199 = vector.load %arg11[%c0_73, %c0_74, %c0_75] : memref<2x32x64xbf16, #tpu.memory_space<vmem>>, vector<1x32x64xbf16>
    %200 = vector.shape_cast %199 : vector<1x32x64xbf16> to vector<32x64xbf16>
    %201 = arith.truncf %198 : vector<16x32xf32> to vector<16x32xbf16>
    %cst_76 = arith.constant dense<0.000000e+00> : vector<16x64xf32>
    %202 = tpu.matmul %201, %200, %cst_76 {dimension_numbers = #tpu.dot_dimension_numbers<[1], [0], [0], [1], [0, 0, 1, 1], [], []>} : vector<16x32xbf16>, vector<32x64xbf16>, vector<16x64xf32> -> vector<16x64xf32>
    %c0_77 = arith.constant 0 : index
    %c0_78 = arith.constant 0 : index
    %c0_79 = arith.constant 0 : index
    %203 = vector.load %arg12[%c0_77, %c0_78, %c0_79] : memref<2x1x64xf32, #tpu.memory_space<vmem>>, vector<1x1x64xf32>
    %204 = vector.shape_cast %203 : vector<1x1x64xf32> to vector<1x64xf32>
    %205 = vector.broadcast %204 : vector<1x64xf32> to vector<16x64xf32>
    %206 = arith.addf %202, %205 : vector<16x64xf32>
    %cst_80 = arith.constant 5.000000e-01 : f32
    %207 = vector.broadcast %cst_80 : f32 to vector<16x64xf32>
    %208 = arith.mulf %207, %206 : vector<16x64xf32>
    %cst_81 = arith.constant 0.707106769 : f32
    %209 = vector.broadcast %cst_81 : f32 to vector<16x64xf32>
    %210 = arith.mulf %206, %209 : vector<16x64xf32>
    %211 = math.erf %210 : vector<16x64xf32>
    %cst_82 = arith.constant 1.000000e+00 : f32
    %212 = vector.broadcast %cst_82 : f32 to vector<16x64xf32>
    %213 = arith.addf %212, %211 : vector<16x64xf32>
    %214 = arith.mulf %208, %213 : vector<16x64xf32>
    %c0_83 = arith.constant 0 : index
    %c0_84 = arith.constant 0 : index
    %c0_85 = arith.constant 0 : index
    %215 = vector.load %arg13[%c0_83, %c0_84, %c0_85] : memref<2x64x32xbf16, #tpu.memory_space<vmem>>, vector<1x64x32xbf16>
    %216 = vector.shape_cast %215 : vector<1x64x32xbf16> to vector<64x32xbf16>
    %217 = arith.truncf %214 : vector<16x64xf32> to vector<16x64xbf16>
    %cst_86 = arith.constant dense<0.000000e+00> : vector<16x32xf32>
    %218 = tpu.matmul %217, %216, %cst_86 {dimension_numbers = #tpu.dot_dimension_numbers<[1], [0], [0], [1], [0, 0, 1, 1], [], []>} : vector<16x64xbf16>, vector<64x32xbf16>, vector<16x32xf32> -> vector<16x32xf32>
    %c0_87 = arith.constant 0 : index
    %c0_88 = arith.constant 0 : index
    %c0_89 = arith.constant 0 : index
    %219 = vector.load %arg14[%c0_87, %c0_88, %c0_89] : memref<2x1x32xf32, #tpu.memory_space<vmem>>, vector<1x1x32xf32>
    %220 = vector.shape_cast %219 : vector<1x1x32xf32> to vector<1x32xf32>
    %221 = vector.broadcast %220 : vector<1x32xf32> to vector<16x32xf32>
    %222 = arith.addf %218, %221 : vector<16x32xf32>
    %223 = arith.addf %222, %198 : vector<16x32xf32>
    %c0_90 = arith.constant 0 : index
    %c0_91 = arith.constant 0 : index
    %c0_92 = arith.constant 0 : index
    %224 = vector.load %arg15[%c0_90, %c0_91, %c0_92] : memref<2x1x32xf32, #tpu.memory_space<vmem>>, vector<1x1x32xf32>
    %225 = vector.shape_cast %224 : vector<1x1x32xf32> to vector<1x32xf32>
    %c0_93 = arith.constant 0 : index
    %c0_94 = arith.constant 0 : index
    %c0_95 = arith.constant 0 : index
    %226 = vector.load %arg16[%c0_93, %c0_94, %c0_95] : memref<2x1x32xf32, #tpu.memory_space<vmem>>, vector<1x1x32xf32>
    %227 = vector.shape_cast %226 : vector<1x1x32xf32> to vector<1x32xf32>
    %cst_96 = arith.constant dense<0.000000e+00> : vector<16xf32>
    %228 = vector.multi_reduction <add>, %223, %cst_96 [1] : vector<16x32xf32> to vector<16xf32>
    %229 = vector.shape_cast %228 : vector<16xf32> to vector<16x1xf32>
    %cst_97 = arith.constant 3.200000e+01 : f32
    %230 = vector.broadcast %cst_97 : f32 to vector<16x1xf32>
    %231 = arith.divf %229, %230 : vector<16x1xf32>
    %232 = vector.broadcast %231 : vector<16x1xf32> to vector<16x32xf32>
    %233 = arith.subf %223, %232 : vector<16x32xf32>
    %234 = arith.mulf %233, %233 : vector<16x32xf32>
    %cst_98 = arith.constant dense<0.000000e+00> : vector<16xf32>
    %235 = vector.multi_reduction <add>, %234, %cst_98 [1] : vector<16x32xf32> to vector<16xf32>
    %236 = vector.shape_cast %235 : vector<16xf32> to vector<16x1xf32>
    %cst_99 = arith.constant 3.200000e+01 : f32
    %237 = vector.broadcast %cst_99 : f32 to vector<16x1xf32>
    %238 = arith.divf %236, %237 : vector<16x1xf32>
    %cst_100 = arith.constant 9.99999996E-13 : f32
    %239 = vector.broadcast %cst_100 : f32 to vector<16x1xf32>
    %240 = arith.addf %238, %239 : vector<16x1xf32>
    %241 = math.rsqrt %240 : vector<16x1xf32>
    %242 = vector.broadcast %241 : vector<16x1xf32> to vector<16x32xf32>
    %243 = arith.mulf %233, %242 : vector<16x32xf32>
    %244 = vector.broadcast %225 : vector<1x32xf32> to vector<16x32xf32>
    %245 = arith.mulf %243, %244 : vector<16x32xf32>
    %246 = vector.broadcast %227 : vector<1x32xf32> to vector<16x32xf32>
    %247 = arith.addf %245, %246 : vector<16x32xf32>
    %c1 = arith.constant 1 : index
    %c0_101 = arith.constant 0 : index
    %c0_102 = arith.constant 0 : index
    %248 = vector.load %arg5[%c1, %c0_101, %c0_102] : memref<2x32x96xbf16, #tpu.memory_space<vmem>>, vector<1x32x96xbf16>
    %249 = vector.shape_cast %248 : vector<1x32x96xbf16> to vector<32x96xbf16>
    %c1_103 = arith.constant 1 : index
    %c0_104 = arith.constant 0 : index
    %c0_105 = arith.constant 0 : index
    %250 = vector.load %arg6[%c1_103, %c0_104, %c0_105] : memref<2x1x96xf32, #tpu.memory_space<vmem>>, vector<1x1x96xf32>
    %251 = vector.shape_cast %250 : vector<1x1x96xf32> to vector<1x96xf32>
    %c1_106 = arith.constant 1 : index
    %c0_107 = arith.constant 0 : index
    %c0_108 = arith.constant 0 : index
    %252 = vector.load %arg7[%c1_106, %c0_107, %c0_108] : memref<2x32x32xbf16, #tpu.memory_space<vmem>>, vector<1x32x32xbf16>
    %253 = vector.shape_cast %252 : vector<1x32x32xbf16> to vector<32x32xbf16>
    %c1_109 = arith.constant 1 : index
    %c0_110 = arith.constant 0 : index
    %c0_111 = arith.constant 0 : index
    %254 = vector.load %arg8[%c1_109, %c0_110, %c0_111] : memref<2x1x32xf32, #tpu.memory_space<vmem>>, vector<1x1x32xf32>
    %255 = vector.shape_cast %254 : vector<1x1x32xf32> to vector<1x32xf32>
    %256 = arith.truncf %247 : vector<16x32xf32> to vector<16x32xbf16>
    %cst_112 = arith.constant dense<0.000000e+00> : vector<16x96xf32>
    %257 = tpu.matmul %256, %249, %cst_112 {dimension_numbers = #tpu.dot_dimension_numbers<[1], [0], [0], [1], [0, 0, 1, 1], [], []>} : vector<16x32xbf16>, vector<32x96xbf16>, vector<16x96xf32> -> vector<16x96xf32>
    %258 = vector.broadcast %251 : vector<1x96xf32> to vector<16x96xf32>
    %259 = arith.addf %257, %258 : vector<16x96xf32>
    %260 = arith.truncf %259 : vector<16x96xf32> to vector<16x96xbf16>
    %261 = vector.extract_strided_slice %31 {offsets = [0, 0], sizes = [1, 8], strides = [1, 1]} : vector<2x8xf32> to vector<1x8xf32>
    %262 = vector.extract_strided_slice %260 {offsets = [0, 0], sizes = [8, 8], strides = [1, 1]} : vector<16x96xbf16> to vector<8x8xbf16>
    %263 = vector.extract_strided_slice %260 {offsets = [0, 8], sizes = [8, 8], strides = [1, 1]} : vector<16x96xbf16> to vector<8x8xbf16>
    %cst_113 = arith.constant dense<0.000000e+00> : vector<8x8xf32>
    %264 = tpu.matmul %262, %263, %cst_113 {dimension_numbers = #tpu.dot_dimension_numbers<[1], [1], [0], [0], [0, 0, 1, 0], [], []>} : vector<8x8xbf16>, vector<8x8xbf16>, vector<8x8xf32> -> vector<8x8xf32>
    %cst_114 = arith.constant 0.353553385 : f32
    %265 = vector.broadcast %cst_114 : f32 to vector<8x8xf32>
    %266 = arith.mulf %264, %265 : vector<8x8xf32>
    %267 = vector.broadcast %261 : vector<1x8xf32> to vector<8x8xf32>
    %268 = arith.addf %266, %267 : vector<8x8xf32>
    %269 = vector.extract_strided_slice %260 {offsets = [0, 24], sizes = [8, 8], strides = [1, 1]} : vector<16x96xbf16> to vector<8x8xbf16>
    %270 = vector.extract_strided_slice %260 {offsets = [0, 32], sizes = [8, 8], strides = [1, 1]} : vector<16x96xbf16> to vector<8x8xbf16>
    %cst_115 = arith.constant dense<0.000000e+00> : vector<8x8xf32>
    %271 = tpu.matmul %269, %270, %cst_115 {dimension_numbers = #tpu.dot_dimension_numbers<[1], [1], [0], [0], [0, 0, 1, 0], [], []>} : vector<8x8xbf16>, vector<8x8xbf16>, vector<8x8xf32> -> vector<8x8xf32>
    %cst_116 = arith.constant 0.353553385 : f32
    %272 = vector.broadcast %cst_116 : f32 to vector<8x8xf32>
    %273 = arith.mulf %271, %272 : vector<8x8xf32>
    %274 = vector.broadcast %261 : vector<1x8xf32> to vector<8x8xf32>
    %275 = arith.addf %273, %274 : vector<8x8xf32>
    %276 = vector.extract_strided_slice %260 {offsets = [0, 48], sizes = [8, 8], strides = [1, 1]} : vector<16x96xbf16> to vector<8x8xbf16>
    %277 = vector.extract_strided_slice %260 {offsets = [0, 56], sizes = [8, 8], strides = [1, 1]} : vector<16x96xbf16> to vector<8x8xbf16>
    %cst_117 = arith.constant dense<0.000000e+00> : vector<8x8xf32>
    %278 = tpu.matmul %276, %277, %cst_117 {dimension_numbers = #tpu.dot_dimension_numbers<[1], [1], [0], [0], [0, 0, 1, 0], [], []>} : vector<8x8xbf16>, vector<8x8xbf16>, vector<8x8xf32> -> vector<8x8xf32>
    %cst_118 = arith.constant 0.353553385 : f32
    %279 = vector.broadcast %cst_118 : f32 to vector<8x8xf32>
    %280 = arith.mulf %278, %279 : vector<8x8xf32>
    %281 = vector.broadcast %261 : vector<1x8xf32> to vector<8x8xf32>
    %282 = arith.addf %280, %281 : vector<8x8xf32>
    %283 = vector.extract_strided_slice %260 {offsets = [0, 72], sizes = [8, 8], strides = [1, 1]} : vector<16x96xbf16> to vector<8x8xbf16>
    %284 = vector.extract_strided_slice %260 {offsets = [0, 80], sizes = [8, 8], strides = [1, 1]} : vector<16x96xbf16> to vector<8x8xbf16>
    %cst_119 = arith.constant dense<0.000000e+00> : vector<8x8xf32>
    %285 = tpu.matmul %283, %284, %cst_119 {dimension_numbers = #tpu.dot_dimension_numbers<[1], [1], [0], [0], [0, 0, 1, 0], [], []>} : vector<8x8xbf16>, vector<8x8xbf16>, vector<8x8xf32> -> vector<8x8xf32>
    %cst_120 = arith.constant 0.353553385 : f32
    %286 = vector.broadcast %cst_120 : f32 to vector<8x8xf32>
    %287 = arith.mulf %285, %286 : vector<8x8xf32>
    %288 = vector.broadcast %261 : vector<1x8xf32> to vector<8x8xf32>
    %289 = arith.addf %287, %288 : vector<8x8xf32>
    %290 = vector.extract_strided_slice %31 {offsets = [1, 0], sizes = [1, 8], strides = [1, 1]} : vector<2x8xf32> to vector<1x8xf32>
    %291 = vector.extract_strided_slice %260 {offsets = [8, 0], sizes = [8, 8], strides = [1, 1]} : vector<16x96xbf16> to vector<8x8xbf16>
    %292 = vector.extract_strided_slice %260 {offsets = [8, 8], sizes = [8, 8], strides = [1, 1]} : vector<16x96xbf16> to vector<8x8xbf16>
    %cst_121 = arith.constant dense<0.000000e+00> : vector<8x8xf32>
    %293 = tpu.matmul %291, %292, %cst_121 {dimension_numbers = #tpu.dot_dimension_numbers<[1], [1], [0], [0], [0, 0, 1, 0], [], []>} : vector<8x8xbf16>, vector<8x8xbf16>, vector<8x8xf32> -> vector<8x8xf32>
    %cst_122 = arith.constant 0.353553385 : f32
    %294 = vector.broadcast %cst_122 : f32 to vector<8x8xf32>
    %295 = arith.mulf %293, %294 : vector<8x8xf32>
    %296 = vector.broadcast %290 : vector<1x8xf32> to vector<8x8xf32>
    %297 = arith.addf %295, %296 : vector<8x8xf32>
    %298 = vector.extract_strided_slice %260 {offsets = [8, 24], sizes = [8, 8], strides = [1, 1]} : vector<16x96xbf16> to vector<8x8xbf16>
    %299 = vector.extract_strided_slice %260 {offsets = [8, 32], sizes = [8, 8], strides = [1, 1]} : vector<16x96xbf16> to vector<8x8xbf16>
    %cst_123 = arith.constant dense<0.000000e+00> : vector<8x8xf32>
    %300 = tpu.matmul %298, %299, %cst_123 {dimension_numbers = #tpu.dot_dimension_numbers<[1], [1], [0], [0], [0, 0, 1, 0], [], []>} : vector<8x8xbf16>, vector<8x8xbf16>, vector<8x8xf32> -> vector<8x8xf32>
    %cst_124 = arith.constant 0.353553385 : f32
    %301 = vector.broadcast %cst_124 : f32 to vector<8x8xf32>
    %302 = arith.mulf %300, %301 : vector<8x8xf32>
    %303 = vector.broadcast %290 : vector<1x8xf32> to vector<8x8xf32>
    %304 = arith.addf %302, %303 : vector<8x8xf32>
    %305 = vector.extract_strided_slice %260 {offsets = [8, 48], sizes = [8, 8], strides = [1, 1]} : vector<16x96xbf16> to vector<8x8xbf16>
    %306 = vector.extract_strided_slice %260 {offsets = [8, 56], sizes = [8, 8], strides = [1, 1]} : vector<16x96xbf16> to vector<8x8xbf16>
    %cst_125 = arith.constant dense<0.000000e+00> : vector<8x8xf32>
    %307 = tpu.matmul %305, %306, %cst_125 {dimension_numbers = #tpu.dot_dimension_numbers<[1], [1], [0], [0], [0, 0, 1, 0], [], []>} : vector<8x8xbf16>, vector<8x8xbf16>, vector<8x8xf32> -> vector<8x8xf32>
    %cst_126 = arith.constant 0.353553385 : f32
    %308 = vector.broadcast %cst_126 : f32 to vector<8x8xf32>
    %309 = arith.mulf %307, %308 : vector<8x8xf32>
    %310 = vector.broadcast %290 : vector<1x8xf32> to vector<8x8xf32>
    %311 = arith.addf %309, %310 : vector<8x8xf32>
    %312 = vector.extract_strided_slice %260 {offsets = [8, 72], sizes = [8, 8], strides = [1, 1]} : vector<16x96xbf16> to vector<8x8xbf16>
    %313 = vector.extract_strided_slice %260 {offsets = [8, 80], sizes = [8, 8], strides = [1, 1]} : vector<16x96xbf16> to vector<8x8xbf16>
    %cst_127 = arith.constant dense<0.000000e+00> : vector<8x8xf32>
    %314 = tpu.matmul %312, %313, %cst_127 {dimension_numbers = #tpu.dot_dimension_numbers<[1], [1], [0], [0], [0, 0, 1, 0], [], []>} : vector<8x8xbf16>, vector<8x8xbf16>, vector<8x8xf32> -> vector<8x8xf32>
    %cst_128 = arith.constant 0.353553385 : f32
    %315 = vector.broadcast %cst_128 : f32 to vector<8x8xf32>
    %316 = arith.mulf %314, %315 : vector<8x8xf32>
    %317 = vector.broadcast %290 : vector<1x8xf32> to vector<8x8xf32>
    %318 = arith.addf %316, %317 : vector<8x8xf32>
    %319 = tpu.concatenate %268, %275, %282, %289, %297, %304, %311, %318 in 0 : vector<8x8xf32>, vector<8x8xf32>, vector<8x8xf32>, vector<8x8xf32>, vector<8x8xf32>, vector<8x8xf32>, vector<8x8xf32>, vector<8x8xf32> -> vector<64x8xf32>
    %cst_129 = arith.constant dense<0xFF800000> : vector<64xf32>
    %320 = vector.multi_reduction <maximumf>, %319, %cst_129 [1] : vector<64x8xf32> to vector<64xf32>
    %321 = vector.shape_cast %320 : vector<64xf32> to vector<64x1xf32>
    %322 = vector.broadcast %321 : vector<64x1xf32> to vector<64x8xf32>
    %323 = arith.subf %319, %322 : vector<64x8xf32>
    %324 = math.exp %323 : vector<64x8xf32>
    %cst_130 = arith.constant dense<0.000000e+00> : vector<64xf32>
    %325 = vector.multi_reduction <add>, %324, %cst_130 [1] : vector<64x8xf32> to vector<64xf32>
    %326 = vector.shape_cast %325 : vector<64xf32> to vector<64x1xf32>
    %327 = tpu.reciprocal %326 {approx = true} : vector<64x1xf32> -> vector<64x1xf32>
    %328 = vector.broadcast %327 : vector<64x1xf32> to vector<64x8xf32>
    %329 = arith.mulf %324, %328 : vector<64x8xf32>
    %330 = arith.truncf %329 : vector<64x8xf32> to vector<64x8xbf16>
    %331 = vector.extract_strided_slice %260 {offsets = [0, 16], sizes = [8, 8], strides = [1, 1]} : vector<16x96xbf16> to vector<8x8xbf16>
    %332 = vector.extract_strided_slice %330 {offsets = [0, 0], sizes = [8, 8], strides = [1, 1]} : vector<64x8xbf16> to vector<8x8xbf16>
    %cst_131 = arith.constant dense<0.000000e+00> : vector<8x8xf32>
    %333 = tpu.matmul %332, %331, %cst_131 {dimension_numbers = #tpu.dot_dimension_numbers<[1], [0], [0], [1], [0, 0, 1, 1], [], []>} : vector<8x8xbf16>, vector<8x8xbf16>, vector<8x8xf32> -> vector<8x8xf32>
    %334 = vector.extract_strided_slice %253 {offsets = [0, 0], sizes = [8, 32], strides = [1, 1]} : vector<32x32xbf16> to vector<8x32xbf16>
    %335 = arith.truncf %333 : vector<8x8xf32> to vector<8x8xbf16>
    %cst_132 = arith.constant dense<0.000000e+00> : vector<8x32xf32>
    %336 = tpu.matmul %335, %334, %cst_132 {dimension_numbers = #tpu.dot_dimension_numbers<[1], [0], [0], [1], [0, 0, 1, 1], [], []>} : vector<8x8xbf16>, vector<8x32xbf16>, vector<8x32xf32> -> vector<8x32xf32>
    %337 = vector.broadcast %255 : vector<1x32xf32> to vector<8x32xf32>
    %338 = arith.addf %337, %336 : vector<8x32xf32>
    %339 = vector.extract_strided_slice %260 {offsets = [0, 40], sizes = [8, 8], strides = [1, 1]} : vector<16x96xbf16> to vector<8x8xbf16>
    %340 = vector.extract_strided_slice %330 {offsets = [8, 0], sizes = [8, 8], strides = [1, 1]} : vector<64x8xbf16> to vector<8x8xbf16>
    %cst_133 = arith.constant dense<0.000000e+00> : vector<8x8xf32>
    %341 = tpu.matmul %340, %339, %cst_133 {dimension_numbers = #tpu.dot_dimension_numbers<[1], [0], [0], [1], [0, 0, 1, 1], [], []>} : vector<8x8xbf16>, vector<8x8xbf16>, vector<8x8xf32> -> vector<8x8xf32>
    %342 = vector.extract_strided_slice %253 {offsets = [8, 0], sizes = [8, 32], strides = [1, 1]} : vector<32x32xbf16> to vector<8x32xbf16>
    %343 = arith.truncf %341 : vector<8x8xf32> to vector<8x8xbf16>
    %cst_134 = arith.constant dense<0.000000e+00> : vector<8x32xf32>
    %344 = tpu.matmul %343, %342, %cst_134 {dimension_numbers = #tpu.dot_dimension_numbers<[1], [0], [0], [1], [0, 0, 1, 1], [], []>} : vector<8x8xbf16>, vector<8x32xbf16>, vector<8x32xf32> -> vector<8x32xf32>
    %345 = arith.addf %338, %344 : vector<8x32xf32>
    %346 = vector.extract_strided_slice %260 {offsets = [0, 64], sizes = [8, 8], strides = [1, 1]} : vector<16x96xbf16> to vector<8x8xbf16>
    %347 = vector.extract_strided_slice %330 {offsets = [16, 0], sizes = [8, 8], strides = [1, 1]} : vector<64x8xbf16> to vector<8x8xbf16>
    %cst_135 = arith.constant dense<0.000000e+00> : vector<8x8xf32>
    %348 = tpu.matmul %347, %346, %cst_135 {dimension_numbers = #tpu.dot_dimension_numbers<[1], [0], [0], [1], [0, 0, 1, 1], [], []>} : vector<8x8xbf16>, vector<8x8xbf16>, vector<8x8xf32> -> vector<8x8xf32>
    %349 = vector.extract_strided_slice %253 {offsets = [16, 0], sizes = [8, 32], strides = [1, 1]} : vector<32x32xbf16> to vector<8x32xbf16>
    %350 = arith.truncf %348 : vector<8x8xf32> to vector<8x8xbf16>
    %cst_136 = arith.constant dense<0.000000e+00> : vector<8x32xf32>
    %351 = tpu.matmul %350, %349, %cst_136 {dimension_numbers = #tpu.dot_dimension_numbers<[1], [0], [0], [1], [0, 0, 1, 1], [], []>} : vector<8x8xbf16>, vector<8x32xbf16>, vector<8x32xf32> -> vector<8x32xf32>
    %352 = arith.addf %345, %351 : vector<8x32xf32>
    %353 = vector.extract_strided_slice %260 {offsets = [0, 88], sizes = [8, 8], strides = [1, 1]} : vector<16x96xbf16> to vector<8x8xbf16>
    %354 = vector.extract_strided_slice %330 {offsets = [24, 0], sizes = [8, 8], strides = [1, 1]} : vector<64x8xbf16> to vector<8x8xbf16>
    %cst_137 = arith.constant dense<0.000000e+00> : vector<8x8xf32>
    %355 = tpu.matmul %354, %353, %cst_137 {dimension_numbers = #tpu.dot_dimension_numbers<[1], [0], [0], [1], [0, 0, 1, 1], [], []>} : vector<8x8xbf16>, vector<8x8xbf16>, vector<8x8xf32> -> vector<8x8xf32>
    %356 = vector.extract_strided_slice %253 {offsets = [24, 0], sizes = [8, 32], strides = [1, 1]} : vector<32x32xbf16> to vector<8x32xbf16>
    %357 = arith.truncf %355 : vector<8x8xf32> to vector<8x8xbf16>
    %cst_138 = arith.constant dense<0.000000e+00> : vector<8x32xf32>
    %358 = tpu.matmul %357, %356, %cst_138 {dimension_numbers = #tpu.dot_dimension_numbers<[1], [0], [0], [1], [0, 0, 1, 1], [], []>} : vector<8x8xbf16>, vector<8x32xbf16>, vector<8x32xf32> -> vector<8x32xf32>
    %359 = arith.addf %352, %358 : vector<8x32xf32>
    %360 = vector.extract_strided_slice %260 {offsets = [8, 16], sizes = [8, 8], strides = [1, 1]} : vector<16x96xbf16> to vector<8x8xbf16>
    %361 = vector.extract_strided_slice %330 {offsets = [32, 0], sizes = [8, 8], strides = [1, 1]} : vector<64x8xbf16> to vector<8x8xbf16>
    %cst_139 = arith.constant dense<0.000000e+00> : vector<8x8xf32>
    %362 = tpu.matmul %361, %360, %cst_139 {dimension_numbers = #tpu.dot_dimension_numbers<[1], [0], [0], [1], [0, 0, 1, 1], [], []>} : vector<8x8xbf16>, vector<8x8xbf16>, vector<8x8xf32> -> vector<8x8xf32>
    %363 = vector.extract_strided_slice %253 {offsets = [0, 0], sizes = [8, 32], strides = [1, 1]} : vector<32x32xbf16> to vector<8x32xbf16>
    %364 = arith.truncf %362 : vector<8x8xf32> to vector<8x8xbf16>
    %cst_140 = arith.constant dense<0.000000e+00> : vector<8x32xf32>
    %365 = tpu.matmul %364, %363, %cst_140 {dimension_numbers = #tpu.dot_dimension_numbers<[1], [0], [0], [1], [0, 0, 1, 1], [], []>} : vector<8x8xbf16>, vector<8x32xbf16>, vector<8x32xf32> -> vector<8x32xf32>
    %366 = vector.broadcast %255 : vector<1x32xf32> to vector<8x32xf32>
    %367 = arith.addf %366, %365 : vector<8x32xf32>
    %368 = vector.extract_strided_slice %260 {offsets = [8, 40], sizes = [8, 8], strides = [1, 1]} : vector<16x96xbf16> to vector<8x8xbf16>
    %369 = vector.extract_strided_slice %330 {offsets = [40, 0], sizes = [8, 8], strides = [1, 1]} : vector<64x8xbf16> to vector<8x8xbf16>
    %cst_141 = arith.constant dense<0.000000e+00> : vector<8x8xf32>
    %370 = tpu.matmul %369, %368, %cst_141 {dimension_numbers = #tpu.dot_dimension_numbers<[1], [0], [0], [1], [0, 0, 1, 1], [], []>} : vector<8x8xbf16>, vector<8x8xbf16>, vector<8x8xf32> -> vector<8x8xf32>
    %371 = vector.extract_strided_slice %253 {offsets = [8, 0], sizes = [8, 32], strides = [1, 1]} : vector<32x32xbf16> to vector<8x32xbf16>
    %372 = arith.truncf %370 : vector<8x8xf32> to vector<8x8xbf16>
    %cst_142 = arith.constant dense<0.000000e+00> : vector<8x32xf32>
    %373 = tpu.matmul %372, %371, %cst_142 {dimension_numbers = #tpu.dot_dimension_numbers<[1], [0], [0], [1], [0, 0, 1, 1], [], []>} : vector<8x8xbf16>, vector<8x32xbf16>, vector<8x32xf32> -> vector<8x32xf32>
    %374 = arith.addf %367, %373 : vector<8x32xf32>
    %375 = vector.extract_strided_slice %260 {offsets = [8, 64], sizes = [8, 8], strides = [1, 1]} : vector<16x96xbf16> to vector<8x8xbf16>
    %376 = vector.extract_strided_slice %330 {offsets = [48, 0], sizes = [8, 8], strides = [1, 1]} : vector<64x8xbf16> to vector<8x8xbf16>
    %cst_143 = arith.constant dense<0.000000e+00> : vector<8x8xf32>
    %377 = tpu.matmul %376, %375, %cst_143 {dimension_numbers = #tpu.dot_dimension_numbers<[1], [0], [0], [1], [0, 0, 1, 1], [], []>} : vector<8x8xbf16>, vector<8x8xbf16>, vector<8x8xf32> -> vector<8x8xf32>
    %378 = vector.extract_strided_slice %253 {offsets = [16, 0], sizes = [8, 32], strides = [1, 1]} : vector<32x32xbf16> to vector<8x32xbf16>
    %379 = arith.truncf %377 : vector<8x8xf32> to vector<8x8xbf16>
    %cst_144 = arith.constant dense<0.000000e+00> : vector<8x32xf32>
    %380 = tpu.matmul %379, %378, %cst_144 {dimension_numbers = #tpu.dot_dimension_numbers<[1], [0], [0], [1], [0, 0, 1, 1], [], []>} : vector<8x8xbf16>, vector<8x32xbf16>, vector<8x32xf32> -> vector<8x32xf32>
    %381 = arith.addf %374, %380 : vector<8x32xf32>
    %382 = vector.extract_strided_slice %260 {offsets = [8, 88], sizes = [8, 8], strides = [1, 1]} : vector<16x96xbf16> to vector<8x8xbf16>
    %383 = vector.extract_strided_slice %330 {offsets = [56, 0], sizes = [8, 8], strides = [1, 1]} : vector<64x8xbf16> to vector<8x8xbf16>
    %cst_145 = arith.constant dense<0.000000e+00> : vector<8x8xf32>
    %384 = tpu.matmul %383, %382, %cst_145 {dimension_numbers = #tpu.dot_dimension_numbers<[1], [0], [0], [1], [0, 0, 1, 1], [], []>} : vector<8x8xbf16>, vector<8x8xbf16>, vector<8x8xf32> -> vector<8x8xf32>
    %385 = vector.extract_strided_slice %253 {offsets = [24, 0], sizes = [8, 32], strides = [1, 1]} : vector<32x32xbf16> to vector<8x32xbf16>
    %386 = arith.truncf %384 : vector<8x8xf32> to vector<8x8xbf16>
    %cst_146 = arith.constant dense<0.000000e+00> : vector<8x32xf32>
    %387 = tpu.matmul %386, %385, %cst_146 {dimension_numbers = #tpu.dot_dimension_numbers<[1], [0], [0], [1], [0, 0, 1, 1], [], []>} : vector<8x8xbf16>, vector<8x32xbf16>, vector<8x32xf32> -> vector<8x32xf32>
    %388 = arith.addf %381, %387 : vector<8x32xf32>
    %389 = tpu.concatenate %359, %388 in 0 : vector<8x32xf32>, vector<8x32xf32> -> vector<16x32xf32>
    %390 = arith.addf %389, %247 : vector<16x32xf32>
    %c1_147 = arith.constant 1 : index
    %c0_148 = arith.constant 0 : index
    %c0_149 = arith.constant 0 : index
    %391 = vector.load %arg9[%c1_147, %c0_148, %c0_149] : memref<2x1x32xf32, #tpu.memory_space<vmem>>, vector<1x1x32xf32>
    %392 = vector.shape_cast %391 : vector<1x1x32xf32> to vector<1x32xf32>
    %c1_150 = arith.constant 1 : index
    %c0_151 = arith.constant 0 : index
    %c0_152 = arith.constant 0 : index
    %393 = vector.load %arg10[%c1_150, %c0_151, %c0_152] : memref<2x1x32xf32, #tpu.memory_space<vmem>>, vector<1x1x32xf32>
    %394 = vector.shape_cast %393 : vector<1x1x32xf32> to vector<1x32xf32>
    %cst_153 = arith.constant dense<0.000000e+00> : vector<16xf32>
    %395 = vector.multi_reduction <add>, %390, %cst_153 [1] : vector<16x32xf32> to vector<16xf32>
    %396 = vector.shape_cast %395 : vector<16xf32> to vector<16x1xf32>
    %cst_154 = arith.constant 3.200000e+01 : f32
    %397 = vector.broadcast %cst_154 : f32 to vector<16x1xf32>
    %398 = arith.divf %396, %397 : vector<16x1xf32>
    %399 = vector.broadcast %398 : vector<16x1xf32> to vector<16x32xf32>
    %400 = arith.subf %390, %399 : vector<16x32xf32>
    %401 = arith.mulf %400, %400 : vector<16x32xf32>
    %cst_155 = arith.constant dense<0.000000e+00> : vector<16xf32>
    %402 = vector.multi_reduction <add>, %401, %cst_155 [1] : vector<16x32xf32> to vector<16xf32>
    %403 = vector.shape_cast %402 : vector<16xf32> to vector<16x1xf32>
    %cst_156 = arith.constant 3.200000e+01 : f32
    %404 = vector.broadcast %cst_156 : f32 to vector<16x1xf32>
    %405 = arith.divf %403, %404 : vector<16x1xf32>
    %cst_157 = arith.constant 9.99999996E-13 : f32
    %406 = vector.broadcast %cst_157 : f32 to vector<16x1xf32>
    %407 = arith.addf %405, %406 : vector<16x1xf32>
    %408 = math.rsqrt %407 : vector<16x1xf32>
    %409 = vector.broadcast %408 : vector<16x1xf32> to vector<16x32xf32>
    %410 = arith.mulf %400, %409 : vector<16x32xf32>
    %411 = vector.broadcast %392 : vector<1x32xf32> to vector<16x32xf32>
    %412 = arith.mulf %410, %411 : vector<16x32xf32>
    %413 = vector.broadcast %394 : vector<1x32xf32> to vector<16x32xf32>
    %414 = arith.addf %412, %413 : vector<16x32xf32>
    %c1_158 = arith.constant 1 : index
    %c0_159 = arith.constant 0 : index
    %c0_160 = arith.constant 0 : index
    %415 = vector.load %arg11[%c1_158, %c0_159, %c0_160] : memref<2x32x64xbf16, #tpu.memory_space<vmem>>, vector<1x32x64xbf16>
    %416 = vector.shape_cast %415 : vector<1x32x64xbf16> to vector<32x64xbf16>
    %417 = arith.truncf %414 : vector<16x32xf32> to vector<16x32xbf16>
    %cst_161 = arith.constant dense<0.000000e+00> : vector<16x64xf32>
    %418 = tpu.matmul %417, %416, %cst_161 {dimension_numbers = #tpu.dot_dimension_numbers<[1], [0], [0], [1], [0, 0, 1, 1], [], []>} : vector<16x32xbf16>, vector<32x64xbf16>, vector<16x64xf32> -> vector<16x64xf32>
    %c1_162 = arith.constant 1 : index
    %c0_163 = arith.constant 0 : index
    %c0_164 = arith.constant 0 : index
    %419 = vector.load %arg12[%c1_162, %c0_163, %c0_164] : memref<2x1x64xf32, #tpu.memory_space<vmem>>, vector<1x1x64xf32>
    %420 = vector.shape_cast %419 : vector<1x1x64xf32> to vector<1x64xf32>
    %421 = vector.broadcast %420 : vector<1x64xf32> to vector<16x64xf32>
    %422 = arith.addf %418, %421 : vector<16x64xf32>
    %cst_165 = arith.constant 5.000000e-01 : f32
    %423 = vector.broadcast %cst_165 : f32 to vector<16x64xf32>
    %424 = arith.mulf %423, %422 : vector<16x64xf32>
    %cst_166 = arith.constant 0.707106769 : f32
    %425 = vector.broadcast %cst_166 : f32 to vector<16x64xf32>
    %426 = arith.mulf %422, %425 : vector<16x64xf32>
    %427 = math.erf %426 : vector<16x64xf32>
    %cst_167 = arith.constant 1.000000e+00 : f32
    %428 = vector.broadcast %cst_167 : f32 to vector<16x64xf32>
    %429 = arith.addf %428, %427 : vector<16x64xf32>
    %430 = arith.mulf %424, %429 : vector<16x64xf32>
    %c1_168 = arith.constant 1 : index
    %c0_169 = arith.constant 0 : index
    %c0_170 = arith.constant 0 : index
    %431 = vector.load %arg13[%c1_168, %c0_169, %c0_170] : memref<2x64x32xbf16, #tpu.memory_space<vmem>>, vector<1x64x32xbf16>
    %432 = vector.shape_cast %431 : vector<1x64x32xbf16> to vector<64x32xbf16>
    %433 = arith.truncf %430 : vector<16x64xf32> to vector<16x64xbf16>
    %cst_171 = arith.constant dense<0.000000e+00> : vector<16x32xf32>
    %434 = tpu.matmul %433, %432, %cst_171 {dimension_numbers = #tpu.dot_dimension_numbers<[1], [0], [0], [1], [0, 0, 1, 1], [], []>} : vector<16x64xbf16>, vector<64x32xbf16>, vector<16x32xf32> -> vector<16x32xf32>
    %c1_172 = arith.constant 1 : index
    %c0_173 = arith.constant 0 : index
    %c0_174 = arith.constant 0 : index
    %435 = vector.load %arg14[%c1_172, %c0_173, %c0_174] : memref<2x1x32xf32, #tpu.memory_space<vmem>>, vector<1x1x32xf32>
    %436 = vector.shape_cast %435 : vector<1x1x32xf32> to vector<1x32xf32>
    %437 = vector.broadcast %436 : vector<1x32xf32> to vector<16x32xf32>
    %438 = arith.addf %434, %437 : vector<16x32xf32>
    %439 = arith.addf %438, %414 : vector<16x32xf32>
    %c1_175 = arith.constant 1 : index
    %c0_176 = arith.constant 0 : index
    %c0_177 = arith.constant 0 : index
    %440 = vector.load %arg15[%c1_175, %c0_176, %c0_177] : memref<2x1x32xf32, #tpu.memory_space<vmem>>, vector<1x1x32xf32>
    %441 = vector.shape_cast %440 : vector<1x1x32xf32> to vector<1x32xf32>
    %c1_178 = arith.constant 1 : index
    %c0_179 = arith.constant 0 : index
    %c0_180 = arith.constant 0 : index
    %442 = vector.load %arg16[%c1_178, %c0_179, %c0_180] : memref<2x1x32xf32, #tpu.memory_space<vmem>>, vector<1x1x32xf32>
    %443 = vector.shape_cast %442 : vector<1x1x32xf32> to vector<1x32xf32>
    %cst_181 = arith.constant dense<0.000000e+00> : vector<16xf32>
    %444 = vector.multi_reduction <add>, %439, %cst_181 [1] : vector<16x32xf32> to vector<16xf32>
    %445 = vector.shape_cast %444 : vector<16xf32> to vector<16x1xf32>
    %cst_182 = arith.constant 3.200000e+01 : f32
    %446 = vector.broadcast %cst_182 : f32 to vector<16x1xf32>
    %447 = arith.divf %445, %446 : vector<16x1xf32>
    %448 = vector.broadcast %447 : vector<16x1xf32> to vector<16x32xf32>
    %449 = arith.subf %439, %448 : vector<16x32xf32>
    %450 = arith.mulf %449, %449 : vector<16x32xf32>
    %cst_183 = arith.constant dense<0.000000e+00> : vector<16xf32>
    %451 = vector.multi_reduction <add>, %450, %cst_183 [1] : vector<16x32xf32> to vector<16xf32>
    %452 = vector.shape_cast %451 : vector<16xf32> to vector<16x1xf32>
    %cst_184 = arith.constant 3.200000e+01 : f32
    %453 = vector.broadcast %cst_184 : f32 to vector<16x1xf32>
    %454 = arith.divf %452, %453 : vector<16x1xf32>
    %cst_185 = arith.constant 9.99999996E-13 : f32
    %455 = vector.broadcast %cst_185 : f32 to vector<16x1xf32>
    %456 = arith.addf %454, %455 : vector<16x1xf32>
    %457 = math.rsqrt %456 : vector<16x1xf32>
    %458 = vector.broadcast %457 : vector<16x1xf32> to vector<16x32xf32>
    %459 = arith.mulf %449, %458 : vector<16x32xf32>
    %460 = vector.broadcast %441 : vector<1x32xf32> to vector<16x32xf32>
    %461 = arith.mulf %459, %460 : vector<16x32xf32>
    %462 = vector.broadcast %443 : vector<1x32xf32> to vector<16x32xf32>
    %463 = arith.addf %461, %462 : vector<16x32xf32>
    %c0_186 = arith.constant 0 : index
    %c0_187 = arith.constant 0 : index
    %464 = vector.load %arg17[%c0_186, %c0_187] : memref<32x128xbf16, #tpu.memory_space<vmem>>, vector<32x128xbf16>
    %c0_188 = arith.constant 0 : index
    %c0_189 = arith.constant 0 : index
    %465 = vector.load %arg18[%c0_188, %c0_189] : memref<1x128xf32, #tpu.memory_space<vmem>>, vector<1x128xf32>
    %466 = vector.extract_strided_slice %463 {offsets = [0, 0], sizes = [1, 32], strides = [1, 1]} : vector<16x32xf32> to vector<1x32xf32>
    %467 = arith.truncf %466 : vector<1x32xf32> to vector<1x32xbf16>
    %cst_190 = arith.constant dense<0.000000e+00> : vector<1x128xf32>
    %468 = tpu.matmul %467, %464, %cst_190 {dimension_numbers = #tpu.dot_dimension_numbers<[1], [0], [0], [1], [0, 0, 1, 1], [], []>} : vector<1x32xbf16>, vector<32x128xbf16>, vector<1x128xf32> -> vector<1x128xf32>
    %469 = arith.addf %468, %465 : vector<1x128xf32>
    %c0_191 = arith.constant 0 : index
    %c0_192 = arith.constant 0 : index
    %470 = vector.load %arg19[%c0_191, %c0_192] : memref<2x128xf32, #tpu.memory_space<vmem>>, vector<1x128xf32>
    tpu.vector_store %arg19[%c0_191, %c0_192], %469 {strides = array<i32>} : memref<2x128xf32, #tpu.memory_space<vmem>>, vector<1x128xf32>,
    %471 = vector.extract_strided_slice %463 {offsets = [8, 0], sizes = [1, 32], strides = [1, 1]} : vector<16x32xf32> to vector<1x32xf32>
    %472 = arith.truncf %471 : vector<1x32xf32> to vector<1x32xbf16>
    %cst_193 = arith.constant dense<0.000000e+00> : vector<1x128xf32>
    %473 = tpu.matmul %472, %464, %cst_193 {dimension_numbers = #tpu.dot_dimension_numbers<[1], [0], [0], [1], [0, 0, 1, 1], [], []>} : vector<1x32xbf16>, vector<32x128xbf16>, vector<1x128xf32> -> vector<1x128xf32>
    %474 = arith.addf %473, %465 : vector<1x128xf32>
    %c1_194 = arith.constant 1 : index
    %c0_195 = arith.constant 0 : index
    %475 = vector.load %arg19[%c1_194, %c0_195] : memref<2x128xf32, #tpu.memory_space<vmem>>, vector<1x128xf32>
    tpu.vector_store %arg19[%c1_194, %c0_195], %474 {strides = array<i32>} : memref<2x128xf32, #tpu.memory_space<vmem>>, vector<1x128xf32>,
    return
  }
}

</mosaic_0001>

<bundles_post_ra>
// kernel: bert_classifier_forward.1
= control target key start
LH: loop header
LB: loop body
LE: loop exit
PB: predicated region body
PF: predicated region fallthrough
CT: control target
= control target key end

     0   :  { %s5022_s0 = inlined_call_operand.vmem [shape: f32[16,32], index: 0, kind: input, shape index: {}]   ;;  %s5023_s1 = inlined_call_operand.vmem [shape: f32[32,32], index: 1, kind: input, shape index: {}]   ;;  %s5024_s2 = inlined_call_operand.vmem [shape: s32[2,8], index: 2, kind: input, shape index: {}]   ;;  %s5025_s3 = inlined_call_operand.vmem [shape: f32[1,32], index: 3, kind: input, shape index: {}]   ;;  %s5026_s4 = inlined_call_operand.vmem [shape: f32[1,32], index: 4, kind: input, shape index: {}]   ;;  %s5027_s5 = inlined_call_operand.vmem [shape: bf16[2,32,96], index: 5, kind: input, shape index: {}]   ;;  %s5028_s6 = inlined_call_operand.vmem [shape: f32[2,1,96], index: 6, kind: input, shape index: {}]   ;;  %s5029_s7 = inlined_call_operand.vmem [shape: bf16[2,32,32], index: 7, kind: input, shape index: {}]   ;;  %s5030_s8 = inlined_call_operand.vmem [shape: f32[2,1,32], index: 8, kind: input, shape index: {}]   ;;  %s5031_s9 = inlined_call_operand.vmem [shape: f32[2,1,32], index: 9, kind: input, shape index: {}]   ;;  %s5032_s10 = inlined_call_operand.vmem [shape: f32[2,1,32], index: 10, kind: input, shape index: {}]   ;;  %s5033_s11 = inlined_call_operand.vmem [shape: bf16[2,32,64], index: 11, kind: input, shape index: {}]   ;;  %s5034_s12 = inlined_call_operand.vmem [shape: f32[2,1,64], index: 12, kind: input, shape index: {}]   ;;  %s5035_s13 = inlined_call_operand.vmem [shape: bf16[2,64,32], index: 13, kind: input, shape index: {}]   ;;  %s5036_s14 = inlined_call_operand.vmem [shape: f32[2,1,32], index: 14, kind: input, shape index: {}]   ;;  %s5037_s15 = inlined_call_operand.vmem [shape: f32[2,1,32], index: 15, kind: input, shape index: {}]   ;;  %s5038_s16 = inlined_call_operand.vmem [shape: f32[2,1,32], index: 16, kind: input, shape index: {}]   ;;  %s5039_s17 = inlined_call_operand.vmem [shape: bf16[32,128], index: 17, kind: input, shape index: {}]   ;;  %s5040_s18 = inlined_call_operand.vmem [shape: f32[1,128], index: 18, kind: input, shape index: {}]   ;;  %s5041_s19 = inlined_call_operand.hbm [shape: f32[2,128], index: 19, kind: output, shape index: {}]  }
   0x1   :  { %5046 = sst [smem:[#allocation5_spill]] %s5022_s0 }
   0x2   :  { %5047 = sst [smem:[#allocation6_spill]] %s5023_s1 }
   0x3   :  { %5048 = sst [smem:[#allocation7_spill]] %s5024_s2 }
   0x4   :  { %5049 = sst [smem:[#allocation8_spill]] %s5025_s3 }
   0x5   :  { %5050 = sst [smem:[#allocation9_spill]] %s5036_s14 }
   0x6   :  { %s5051_s20 = sld [smem:[#allocation6_spill]]  ;;  %s5052_s14 = sld [smem:[#allocation5_spill]]  ;;  %vm71_vm0 = vcmask 261120  }
   0xc   :  { %v64_v0 = vld [vmem:[%s5051_s20] sm:$0xff]  ;;  %v66_v2 = vld [vmem:[%s5052_s14 + $0x8] sm:$0xff] }
   0xd   :  { %v65_v1 = vld [vmem:[%s5052_s14] sm:$0xff]  ;;  %v68_v4 = vadd.f32 %v66_v2, %v64_v0 }
   0xe   :  { %v67_v3 = vadd.f32 %v65_v1, %v64_v0 }
   0xf   :  { %v75_v6 = vsel %vm71_vm0, %v68_v4, 0.0 }
  0x10   :  { %v72_v5 = vsel %vm71_vm0, %v67_v3, 0.0 }
  0x11   :  { %73 = vadd.xlane.f32.xlu0 %v72_v5 }
  0x15   :  { %76 = vadd.xlane.f32.xlu0 %v75_v6 }
  0x16   :  { %24 = vsyncpa [#allocation3], 0  ;;  %v4089_v17 = vld [vmem:[%s5027_s5] sm:$0xff]   ;;  %v4223_v18 = vmov 0.0   ;;  %v4090_v19 = vld [vmem:[%s5027_s5 + $0x8] sm:$0xff]   ;;  %vm4224_vm1 = vmmov 0   ;;  %v244_v6 = vlaneseq }
  0x17   :  { %3715 = vmatprep.subr.bf16.mxu0 %v4223_v18  ;;  %3723 = vmatprep.subr.bf16.mxu1 %v4223_v18  ;;  %s5053_s27 = sld [smem:[#allocation8_spill]]  ;;  %v3472_v32 = vld [vmem:[%s5026_s4] ss:$0 sm:$0xff]  ;;  %s4225_s4 = smov 96   ;;  %vm196_vm2 = vcmask 64512   ;;  %vm713_vm3 = vcmask 1043456  }
  0x18   :  { %3716 = vmatpush3.bf16.msra.mxu0 %v4089_v17  ;;  %3719 = vmatprep.mubr.msk.bf16.mxu0 %vm4224_vm1, %v4223_v18  ;;  %v3473_v37 = vld [vmem:[%s5028_s6] ss:$0 sm:$0xff]  ;;  %s4226_s20 = smov 120   ;;  %s4227_s21 = smov 104   ;;  %vm1643_vm4 = vcmask 523264  }
  0x19   :  { %3717 = vmatprep.subr.bf16.mxu0 %v4223_v18  ;;  %3725 = vmatprep.mubr.msk.bf16.mxu1 %vm4224_vm1, %v4223_v18  ;;  %s4228_s1 = smov 48   ;;  %s4229_s22 = smov 72  }
  0x1a   :  { %s4230_s2 = smov 56   ;;  %s4231_s14 = smov 80  }
  0x1b   :  { %s5054_s25 = sld [smem:[#allocation7_spill]]  ;;  %s4232_s3 = smov 88  }
  0x1c   :  { %3718 = vmatpush3.bf16.msra.mxu0 %v4090_v19  ;;  %s4233_s26 = smov 112   ;;  %s5044_s28 = smov 40  }
  0x1d   :  { %3729 = vmatprep.subr.bf16.mxu0 %v4223_v18  ;;  %v3471_v28 = vld [vmem:[%s5053_s27] ss:$0 sm:$0xff]  ;;  %s4234_s27 = smov 64   ;;  %s5055_s24 = sld [smem:[#allocation9_spill]] }
  0x9e   :  { %v74_v7 = vpop.xlane.xlu0 %73 }
  0x9f   :  { %v79_v8 = vmul.f32 0.03125, %v74_v7 }
  0xa1   :  { %v81_v9 = vsub.f32 %v67_v3, %v79_v8  ;;  %v245_v8 = vshrl.u32 %v244_v6, 7 }
  0xa2   :  { %v77_v10 = vpop.xlane.xlu0 %76 }
  0xa3   :  { %v80_v11 = vmul.f32 0.03125, %v77_v10  ;;  %v83_v12 = vmul.f32 %v81_v9, %v81_v9  ;;  %v246_v10 = vsub.s32 0, %v245_v8 }
  0xa5   :  { %v82_v13 = vsub.f32 %v68_v4, %v80_v11  ;;  %v85_v14 = vsel %vm71_vm0, %v83_v12, 0.0  ;;  %v115_v4 = vld [vmem:[%s5054_s25] sm:$0x3] }
  0xa6   :  { %86 = vadd.xlane.f32.xlu1 %v85_v14  ;;  %v116_v5 = vcvt.s32.f32 %v115_v4 }
  0xa7   :  { %v84_v15 = vmul.f32 %v82_v13, %v82_v13 }
  0xa8   :  { %v117_v7 = vsub.f32 1.0, %v116_v5 }
  0xa9   :  { %v88_v16 = vsel %vm71_vm0, %v84_v15, 0.0 }
  0xaa   :  { %89 = vadd.xlane.f32.xlu1 %v88_v16 }
 0x133   :  { %v87_v20 = vpop.xlane.xlu1 %86 }
 0x134   :  { %v91_v21 = vmul.f32 0.03125, %v87_v20 }
 0x136   :  { %v93_v22 = vadd.f32 1e-12, %v91_v21 }
 0x137   :  { %v90_v23 = vpop.xlane.xlu1 %89 }
 0x138   :  { %4107 = vrsqrt.f32 %v93_v22  ;;  %v92_v24 = vmul.f32 0.03125, %v90_v23 }
 0x13a   :  { %v94_v25 = vadd.f32 1e-12, %v92_v24 }
 0x13c   :  { %4109 = vrsqrt.f32 %v94_v25 }
 0x142   :  { %v4108_v26 = vpop.eup %4107 }
 0x143   :  { %v97_v27 = vmul.f32 %v4108_v26, %v81_v9  ;;  %v118_v9 = vmul.f32 -1e+09, %v117_v7 }
 0x145   :  { %v105_v31 = vmul.f32 %v3471_v28, %v97_v27  ;;  %v4460_v11 = vrot.slane %v118_v9, %v246_v10 }
 0x146   :  { %v4110_v29 = vpop.eup %4109 }
 0x147   :  { %v98_v30 = vmul.f32 %v4110_v29, %v82_v13  ;;  %v4370_v34 = vadd.f32 %v3472_v32, %v105_v31 }
 0x149   :  { %v106_v33 = vmul.f32 %v3471_v28, %v98_v30 }
 0x14b   :  { %v4372_v35 = vadd.f32 %v3472_v32, %v106_v33 }
 0x14d   :  { %v129_v36 = vpack.c.bf16 %v4372_v35, %v4370_v34 }
 0x14f   :  { %3720 = vmatmul.mubr.msk.bf16.vlgmr.msra.gmra.mrb[0].mxu0 %vm71_vm0, %v129_v36 }
 0x150   :  { %3731 = vmatprep.mubr.msk.bf16.mxu0 %vm4224_vm1, %v4223_v18 }
 0x222   :  { %v185_v38 = vpop.f32.mrb[0].mxu0 }
 0x223   :  { %v3721_v39 = vpop.f32.mrb[1].mxu0  ;;  %v186_v41 = vadd.f32 %v3473_v37, %v185_v38 }
 0x224   :  { %v188_v40 = vpop.f32.mrb[2].mxu0 }
 0x225   :  { %v189_v42 = vadd.f32 %v3473_v37, %v188_v40  ;;  %v3722_v43 = vpop.f32.mrb[3].mxu0 }
 0x227   :  { %v4382_v44 = vpack.c.bf16 %v189_v42, %v186_v41 }
 0x229   :  { %251 = vrot.lane.b32.xlu1 %v4382_v44, %s4225_s4  ;;  %194 = vrot.lane.b32.xlu0 %v4382_v44, %s4226_s20  ;;  %v4397_v45 = vrot.slane %v4382_v44, 4 }
 0x22d   :  { %249 = vrot.lane.b32.xlu1 %v4382_v44, %s4227_s21  ;;  %355 = vrot.lane.b32.xlu0 %v4382_v44, %s4228_s1 }
 0x231   :  { %303 = vrot.lane.b32.xlu1 %v4382_v44, %s4229_s22  ;;  %353 = vrot.lane.b32.xlu0 %v4382_v44, %s4230_s2 }
 0x235   :  { %301 = vrot.lane.b32.xlu1 %v4382_v44, %s4231_s14  ;;  %462 = vrot.lane.b32.xlu0 %v4397_v45, %s4225_s4 }
 0x239   :  { %514 = vrot.lane.b32.xlu0 %v4397_v45, %s4229_s22  ;;  %406 = vrot.lane.b32.xlu1 %v4397_v45, %s4226_s20 }
 0x23d   :  { %512 = vrot.lane.b32.xlu0 %v4397_v45, %s4231_s14  ;;  %460 = vrot.lane.b32.xlu1 %v4397_v45, %s4227_s21 }
 0x241   :  { %566 = vrot.lane.b32.xlu1 %v4397_v45, %s4228_s1 }
 0x245   :  { %564 = vrot.lane.b32.xlu1 %v4397_v45, %s4230_s2 }
 0x29b   :  { %v252_v46 = vpop.permute.xlu1 %251  ;;  %v195_v47 = vpop.permute.xlu0 %194 }
 0x29c   :  { %v257_v48 = vsel %vm196_vm2, %v252_v46, 0  ;;  %v201_v49 = vsel %vm196_vm2, %v195_v47, 0 }
 0x29d   :  { %3724 = vmatpush3.bf16.xpose.msra.mxu1 %v201_v49  ;;  %3730 = vmatpush3.bf16.xpose.msra.mxu0 %v257_v48 }
 0x29e   :  { %3735 = vmatprep.subr.bf16.mxu1 %v4223_v18  ;;  %3741 = vmatprep.subr.bf16.mxu0 %v4223_v18 }
 0x29f   :  { %v250_v50 = vpop.permute.xlu1 %249  ;;  %v356_v51 = vpop.permute.xlu0 %355 }
 0x2a0   :  { %v361_v54 = vsel %vm196_vm2, %v356_v51, 0 }
 0x2a3   :  { %v304_v52 = vpop.permute.xlu1 %303  ;;  %v354_v53 = vpop.permute.xlu0 %353 }
 0x2a4   :  { %v309_v55 = vsel %vm196_vm2, %v304_v52, 0  ;;  %3726 = vmatmul.mubr.msk.bf16.vlgmr.msra.gmra.mrb[0].mxu1 %vm196_vm2, %v4382_v44  ;;  %3732 = vmatmul.mubr.msk.bf16.vlgmr.msra.gmra.mrb[4].mxu0 %vm196_vm2, %v250_v50 }
 0x2a5   :  { %3736 = vmatpush3.bf16.xpose.msra.mxu1 %v309_v55  ;;  %3742 = vmatpush3.bf16.xpose.msra.mxu0 %v361_v54  ;;  %v457_v55 = vsub.s32 1, %v245_v8 }
 0x2a6   :  { %3737 = vmatprep.mubr.msk.bf16.mxu1 %vm4224_vm1, %v4223_v18  ;;  %3743 = vmatprep.mubr.msk.bf16.mxu0 %vm4224_vm1, %v4223_v18 }
 0x2a7   :  { %v302_v56 = vpop.permute.xlu1 %301  ;;  %3747 = vmatprep.subr.bf16.mxu1 %v4223_v18  ;;  %3753 = vmatprep.subr.bf16.mxu0 %v4223_v18  ;;  %v463_v57 = vpop.permute.xlu0 %462 }
 0x2a8   :  { %v468_v59 = vsel %vm196_vm2, %v463_v57, 0 }
 0x2ab   :  { %v407_v58 = vpop.permute.xlu1 %406  ;;  %v515_v62 = vpop.permute.xlu0 %514 }
 0x2ac   :  { %v412_v60 = vsel %vm196_vm2, %v407_v58, 0  ;;  %3738 = vmatmul.mubr.msk.bf16.vlgmr.msra.gmra.mrb[4].mxu1 %vm196_vm2, %v302_v56  ;;  %3744 = vmatmul.mubr.msk.bf16.vlgmr.msra.gmra.mrb[8].mxu0 %vm196_vm2, %v354_v53  ;;  %v520_v0 = vsel %vm196_vm2, %v515_v62, 0  ;;  %v4476_v58 = vrot.slane %v118_v9, %v457_v55 }
 0x2ad   :  { %3748 = vmatpush3.bf16.xpose.msra.mxu1 %v412_v60  ;;  %3754 = vmatpush3.bf16.xpose.msra.mxu0 %v468_v59 }
 0x2ae   :  { %3749 = vmatprep.mubr.msk.bf16.mxu1 %vm4224_vm1, %v4223_v18  ;;  %3755 = vmatprep.mubr.msk.bf16.mxu0 %vm4224_vm1, %v4223_v18 }
 0x2af   :  { %v461_v61 = vpop.permute.xlu1 %460  ;;  %3759 = vmatprep.subr.bf16.mxu1 %v4223_v18  ;;  %3765 = vmatprep.subr.bf16.mxu0 %v4223_v18  ;;  %v513_v2 = vpop.permute.xlu0 %512 }
 0x2b3   :  { %v567_v63 = vpop.permute.xlu1 %566 }
 0x2b4   :  { %v572_v1 = vsel %vm196_vm2, %v567_v63, 0  ;;  %3750 = vmatmul.mubr.msk.bf16.vlgmr.msra.gmra.mrb[8].mxu1 %vm196_vm2, %v4397_v45  ;;  %3756 = vmatmul.mubr.msk.bf16.vlgmr.msra.gmra.mrb[12].mxu0 %vm196_vm2, %v461_v61 }
 0x2b5   :  { %3760 = vmatpush3.bf16.xpose.msra.mxu1 %v520_v0  ;;  %3766 = vmatpush3.bf16.xpose.msra.mxu0 %v572_v1 }
 0x2b6   :  { %3761 = vmatprep.mubr.msk.bf16.mxu1 %vm4224_vm1, %v4223_v18  ;;  %3767 = vmatprep.mubr.msk.bf16.mxu0 %vm4224_vm1, %v4223_v18 }
 0x2b7   :  { %3771 = vmatprep.subr.bf16.mxu1 %v4223_v18  ;;  %3777 = vmatprep.subr.bf16.mxu0 %v4223_v18  ;;  %v565_v3 = vpop.permute.xlu1 %564 }
 0x2bc   :  { %3762 = vmatmul.mubr.msk.bf16.vlgmr.msra.gmra.mrb[12].mxu1 %vm196_vm2, %v513_v2  ;;  %3768 = vmatmul.mubr.msk.bf16.vlgmr.msra.gmra.mrb[16].mxu0 %vm196_vm2, %v565_v3 }
 0x2bd   :  { %3773 = vmatprep.mubr.msk.bf16.mxu1 %vm4224_vm1, %v4223_v18  ;;  %3779 = vmatprep.mubr.msk.bf16.mxu0 %vm4224_vm1, %v4223_v18 }
 0x377   :  { %v237_v12 = vpop.f32.mrb[0].mxu1  ;;  %v293_v13 = vpop.f32.mrb[4].mxu0 }
 0x378   :  { %v243_v14 = vmul.f32 0.35355338, %v237_v12  ;;  %v299_v15 = vmul.f32 0.35355338, %v293_v13  ;;  %v3727_v16 = vpop.f32.mrb[1].mxu1  ;;  %v3733_v17 = vpop.f32.mrb[5].mxu0 }
 0x379   :  { %v240_v19 = vpop.f32.mrb[2].mxu1  ;;  %v296_v20 = vpop.f32.mrb[6].mxu0 }
 0x37a   :  { %v3728_v21 = vpop.f32.mrb[3].mxu1  ;;  %v3734_v22 = vpop.f32.mrb[7].mxu0  ;;  %v4463_v23 = vadd.f32 %v4460_v11, %v243_v14  ;;  %v4466_v24 = vadd.f32 %v299_v15, %v4460_v11 }
 0x37c   :  { %v616_v25 = vsel %vm196_vm2, %v4463_v23, -inf  ;;  %v619_v26 = vsel %vm196_vm2, %v4466_v24, -inf }
 0x37d   :  { %617 = vmax.xlane.f32.xlu0 %v616_v25  ;;  %620 = vmax.xlane.f32.xlu1 %v619_v26 }
 0x37f   :  { %v345_v27 = vpop.f32.mrb[4].mxu1  ;;  %v397_v28 = vpop.f32.mrb[8].mxu0 }
 0x380   :  { %v3739_v29 = vpop.f32.mrb[5].mxu1  ;;  %v3745_v30 = vpop.f32.mrb[9].mxu0  ;;  %v351_v56 = vmul.f32 0.35355338, %v345_v27  ;;  %v403_v59 = vmul.f32 0.35355338, %v397_v28 }
 0x381   :  { %v348_v31 = vpop.f32.mrb[6].mxu1  ;;  %v400_v32 = vpop.f32.mrb[10].mxu0 }
 0x382   :  { %v3740_v33 = vpop.f32.mrb[7].mxu1  ;;  %v3746_v36 = vpop.f32.mrb[11].mxu0  ;;  %v352_v61 = vadd.f32 %v351_v56, %v4460_v11  ;;  %v404_v63 = vadd.f32 %v403_v59, %v4460_v11 }
 0x384   :  { %v622_v1 = vsel %vm196_vm2, %v352_v61, -inf  ;;  %v625_v5 = vsel %vm196_vm2, %v404_v63, -inf }
 0x387   :  { %v448_v37 = vpop.f32.mrb[8].mxu1  ;;  %v504_v38 = vpop.f32.mrb[12].mxu0 }
 0x388   :  { %v3751_v39 = vpop.f32.mrb[9].mxu1  ;;  %v3757_v40 = vpop.f32.mrb[13].mxu0  ;;  %v510_v57 = vmul.f32 0.35355338, %v504_v38  ;;  %v454_v0 = vmul.f32 0.35355338, %v448_v37 }
 0x389   :  { %v451_v41 = vpop.f32.mrb[10].mxu1  ;;  %v507_v42 = vpop.f32.mrb[14].mxu0 }
 0x38a   :  { %v3752_v43 = vpop.f32.mrb[11].mxu1  ;;  %v3758_v46 = vpop.f32.mrb[15].mxu0  ;;  %v511_v62 = vadd.f32 %v510_v57, %v4476_v58  ;;  %v459_v7 = vadd.f32 %v4476_v58, %v454_v0 }
 0x38c   :  { %v631_v2 = vsel %vm196_vm2, %v511_v62, -inf  ;;  %v628_v8 = vsel %vm196_vm2, %v459_v7, -inf }
 0x38e   :  { %813 = vrot.lane.b32.xlu1 %v4382_v44, %s4232_s3 }
 0x38f   :  { %v556_v47 = vpop.f32.mrb[12].mxu1  ;;  %v608_v48 = vpop.f32.mrb[16].mxu0 }
 0x390   :  { %v3763_v49 = vpop.f32.mrb[13].mxu1  ;;  %v3769_v50 = vpop.f32.mrb[17].mxu0  ;;  %v614_v60 = vmul.f32 0.35355338, %v608_v48  ;;  %v562_v4 = vmul.f32 0.35355338, %v556_v47 }
 0x391   :  { %v559_v51 = vpop.f32.mrb[14].mxu1  ;;  %v611_v52 = vpop.f32.mrb[18].mxu0 }
 0x392   :  { %v3764_v53 = vpop.f32.mrb[15].mxu1  ;;  %v3770_v54 = vpop.f32.mrb[19].mxu0  ;;  %v4484_v3 = vadd.f32 %v614_v60, %v4476_v58  ;;  %v4492_v9 = vadd.f32 %v562_v4, %v4476_v58 }
 0x393   :  { %708 = vrot.lane.b32.xlu0 %v4382_v44, %s4233_s26 }
 0x394   :  { %v637_v6 = vsel %vm196_vm2, %v4484_v3, -inf  ;;  %v634_v10 = vsel %vm196_vm2, %v4492_v9, -inf }
 0x3b2   :  { %623 = vmax.xlane.f32.xlu0 %v622_v1  ;;  %632 = vmax.xlane.f32.xlu1 %v631_v2 }
 0x3b6   :  { %626 = vmax.xlane.f32.xlu0 %v625_v5  ;;  %638 = vmax.xlane.f32.xlu1 %v637_v6 }
 0x3ba   :  { %629 = vmax.xlane.f32.xlu0 %v628_v8 }
 0x3be   :  { %635 = vmax.xlane.f32.xlu0 %v634_v10 }
 0x3d4   :  { %909 = vrot.lane.b32.xlu0 %v4382_v44, %s4234_s27 }
 0x40a   :  { %v618_v12 = vpop.xlane.xlu0 %617  ;;  %v621_v13 = vpop.xlane.xlu1 %620 }
 0x40b   :  { %v640_v14 = vsub.f32 %v4463_v23, %v618_v12  ;;  %v641_v15 = vsub.f32 %v4466_v24, %v621_v13 }
 0x40d   :  { %v648_v16 = vmul.f32 1.442695, %v640_v14  ;;  %v650_v17 = vmul.f32 1.442695, %v641_v15 }
 0x40e   :  { %v709_v19 = vpop.permute.xlu0 %708  ;;  %v814_v24 = vpop.permute.xlu1 %813 }
 0x40f   :  { %4111 = vpow2.f32 %v648_v16  ;;  %v715_v20 = vsel %vm713_vm3, %v709_v19, 0  ;;  %v819_v4 = vsel %vm713_vm3, %v814_v24, 0 }
 0x410   :  { %4113 = vpow2.f32 %v650_v17  ;;  %3772 = vmatpush3.bf16.msra.mxu1 %v715_v20 }
 0x411   :  { %3783 = vmatprep.subr.bf16.mxu1 %v4223_v18 }
 0x419   :  { %v4112_v21 = vpop.eup %4111 }
 0x41a   :  { %v4114_v22 = vpop.eup %4113  ;;  %v664_v25 = vsel %vm196_vm2, %v4112_v21, 0.0 }
 0x41b   :  { %665 = vadd.xlane.f32.xlu0 %v664_v25  ;;  %v667_v23 = vsel %vm196_vm2, %v4114_v22, 0.0 }
 0x41c   :  { %668 = vadd.xlane.f32.xlu1 %v667_v23 }
 0x42d   :  { %1103 = vrot.lane.b32.xlu1 %v4397_v45, %s4233_s26 }
 0x43f   :  { %v624_v26 = vpop.xlane.xlu0 %623  ;;  %v633_v29 = vpop.xlane.xlu1 %632 }
 0x440   :  { %v642_v27 = vsub.f32 %v352_v61, %v624_v26  ;;  %v645_v32 = vsub.f32 %v511_v62, %v633_v29 }
 0x442   :  { %v652_v28 = vmul.f32 1.442695, %v642_v27  ;;  %v658_v38 = vmul.f32 1.442695, %v645_v32 }
 0x443   :  { %v627_v30 = vpop.xlane.xlu0 %626  ;;  %v639_v50 = vpop.xlane.xlu1 %638 }
 0x444   :  { %4115 = vpow2.f32 %v652_v28  ;;  %v643_v31 = vsub.f32 %v404_v63, %v627_v30  ;;  %v647_v51 = vsub.f32 %v4484_v3, %v639_v50  ;;  %v124_v30 = vld [vmem:[%s5029_s7] sm:$0xf] }
 0x446   :  { %v654_v33 = vmul.f32 1.442695, %v643_v31  ;;  %v662_v52 = vmul.f32 1.442695, %v647_v51  ;;  %v4568_v31 = vsel %vm713_vm3, %v124_v30, 0 }
 0x447   :  { %v630_v36 = vpop.xlane.xlu0 %629  ;;  %3778 = vmatpush3.bf16.msra.mxu0 %v4568_v31 }
 0x448   :  { %4117 = vpow2.f32 %v654_v33  ;;  %v644_v37 = vsub.f32 %v459_v7, %v630_v36  ;;  %3789 = vmatprep.subr.bf16.mxu0 %v4223_v18 }
 0x44a   :  { %v656_v39 = vmul.f32 1.442695, %v644_v37 }
 0x44b   :  { %v636_v53 = vpop.xlane.xlu0 %635 }
 0x44c   :  { %4119 = vpow2.f32 %v656_v39  ;;  %v646_v54 = vsub.f32 %v4492_v9, %v636_v53 }
 0x44d   :  { %4121 = vpow2.f32 %v658_v38 }
 0x44e   :  { %v4116_v40 = vpop.eup %4115  ;;  %4123 = vpow2.f32 %v662_v52  ;;  %v660_v55 = vmul.f32 1.442695, %v646_v54 }
 0x44f   :  { %v670_v41 = vsel %vm196_vm2, %v4116_v40, 0.0  ;;  %v910_v60 = vpop.permute.xlu0 %909 }
 0x450   :  { %671 = vadd.xlane.f32.xlu0 %v670_v41  ;;  %4125 = vpow2.f32 %v660_v55  ;;  %v915_v5 = vsel %vm713_vm3, %v910_v60, 0  ;;  %v126_v55 = vld [vmem:[%s5029_s7 + $0x8] sm:$0xf] }
 0x452   :  { %v4118_v42 = vpop.eup %4117 }
 0x453   :  { %v673_v43 = vsel %vm196_vm2, %v4118_v42, 0.0 }
 0x454   :  { %674 = vadd.xlane.f32.xlu1 %v673_v43 }
 0x456   :  { %v4508_v46 = vpop.eup %4119 }
 0x457   :  { %v676_v47 = vsel %vm196_vm2, %v4508_v46, 0.0  ;;  %v4512_v48 = vpop.eup %4121 }
 0x458   :  { %677 = vadd.xlane.f32.xlu1 %v676_v47  ;;  %v679_v49 = vsel %vm196_vm2, %v4512_v48, 0.0  ;;  %v4522_v56 = vpop.eup %4123 }
 0x459   :  { %v685_v57 = vsel %vm196_vm2, %v4522_v56, 0.0 }
 0x45c   :  { %680 = vadd.xlane.f32.xlu1 %v679_v49 }
 0x466   :  { %1007 = vrot.lane.b32.xlu0 %v4382_v44, %s5044_s28  ;;  %v4526_v44 = vpop.eup %4125 }
 0x467   :  { %v682_v59 = vsel %vm196_vm2, %v4526_v44, 0.0 }
 0x46d   :  { %1198 = vrot.lane.b32.xlu1 %v4397_v45, %s4232_s3 }
 0x485   :  { %686 = vadd.xlane.f32.xlu0 %v685_v57 }
 0x491   :  { %683 = vadd.xlane.f32.xlu1 %v682_v59  ;;  %v962_v59 = vsel %vm713_vm3, %v126_v55, 0 }
 0x49b   :  { %1291 = vrot.lane.b32.xlu0 %v4397_v45, %s4234_s27 }
 0x4a2   :  { %1386 = vrot.lane.b32.xlu1 %v4397_v45, %s5044_s28 }
 0x4a8   :  { %v666_v61 = vpop.xlane.xlu0 %665 }
 0x4a9   :  { %4127 = vrcp.f32 %v666_v61  ;;  %v669_v62 = vpop.xlane.xlu1 %668 }
 0x4aa   :  { %4129 = vrcp.f32 %v669_v62  ;;  %v127_v62 = vld [vmem:[%s5029_s7 + $0xc] sm:$0xf] }
 0x4ad   :  { %v1104_v6 = vpop.permute.xlu1 %1103 }
 0x4b3   :  { %v4128_v63 = vpop.eup %4127 }
 0x4b4   :  { %v4130_v0 = vpop.eup %4129  ;;  %v696_v1 = vmul.f32 %v4128_v63, %v4112_v21 }
 0x4b5   :  { %v697_v2 = vmul.f32 %v4130_v0, %v4114_v22  ;;  %v1109_v22 = vsel %vm713_vm3, %v1104_v6, 0 }
 0x4b7   :  { %v704_v3 = vpack.c.bf16 %v697_v2, %v696_v1  ;;  %v1060_v2 = vsel %vm713_vm3, %v127_v62, 0 }
 0x4b9   :  { %3774 = vmatmul.mubr.msk.bf16.vlgmr.msra.gmra.mrb[16].mxu1 %vm196_vm2, %v704_v3  ;;  %v812_v45 = vrot.slane %v704_v3, 4 }
 0x4ba   :  { %3784 = vmatpush3.bf16.msra.mxu1 %v819_v4  ;;  %3785 = vmatprep.mubr.msk.bf16.mxu1 %vm4224_vm1, %v4223_v18 }
 0x4bb   :  { %3795 = vmatprep.subr.bf16.mxu1 %v4223_v18 }
 0x4c1   :  { %3786 = vmatmul.mubr.msk.bf16.vlgmr.msra.gmra.mrb[20].mxu1 %vm196_vm2, %v812_v45 }
 0x4c2   :  { %3796 = vmatpush3.bf16.msra.mxu1 %v915_v5  ;;  %3797 = vmatprep.mubr.msk.bf16.mxu1 %vm4224_vm1, %v4223_v18 }
 0x4c3   :  { %3807 = vmatprep.subr.bf16.mxu1 %v4223_v18 }
 0x4dd   :  { %v672_v7 = vpop.xlane.xlu0 %671 }
 0x4de   :  { %4131 = vrcp.f32 %v672_v7 }
 0x4e1   :  { %v675_v8 = vpop.xlane.xlu1 %674  ;;  %v1008_v16 = vpop.permute.xlu0 %1007 }
 0x4e2   :  { %4133 = vrcp.f32 %v675_v8  ;;  %v1013_v19 = vsel %vm713_vm3, %v1008_v16, 0 }
 0x4e5   :  { %v678_v9 = vpop.xlane.xlu1 %677 }
 0x4e8   :  { %v4132_v10 = vpop.eup %4131 }
 0x4e9   :  { %v681_v12 = vpop.xlane.xlu1 %680  ;;  %v698_v14 = vmul.f32 %v4132_v10, %v4116_v40 }
 0x4ea   :  { %4135 = vrcp.f32 %v681_v12 }
 0x4eb   :  { %4137 = vrcp.f32 %v678_v9 }
 0x4ec   :  { %v4134_v13 = vpop.eup %4133 }
 0x4ed   :  { %v699_v15 = vmul.f32 %v4134_v13, %v4118_v42  ;;  %v1199_v26 = vpop.permute.xlu1 %1198 }
 0x4ee   :  { %v1204_v28 = vsel %vm713_vm3, %v1199_v26, 0 }
 0x4ef   :  { %v705_v17 = vpack.c.bf16 %v699_v15, %v698_v14 }
 0x4f1   :  { %3798 = vmatmul.mubr.msk.bf16.vlgmr.msra.gmra.mrb[24].mxu1 %vm196_vm2, %v705_v17  ;;  %v1006_v20 = vrot.slane %v705_v17, 4 }
 0x4f2   :  { %3808 = vmatpush3.bf16.msra.mxu1 %v1013_v19  ;;  %3809 = vmatprep.mubr.msk.bf16.mxu1 %vm4224_vm1, %v4223_v18 }
 0x4f3   :  { %3819 = vmatprep.subr.bf16.mxu1 %v4223_v18 }
 0x4f4   :  { %v4136_v21 = vpop.eup %4135 }
 0x4f5   :  { %v4138_v25 = vpop.eup %4137  ;;  %v701_v23 = vmul.f32 %v4136_v21, %v4512_v48  ;;  %v125_v48 = vld [vmem:[%s5029_s7 + $0x4] sm:$0xf] }
 0x4f6   :  { %v700_v24 = vmul.f32 %v4138_v25, %v4508_v46  ;;  %v866_v52 = vsel %vm713_vm3, %v125_v48, 0 }
 0x4f8   :  { %v706_v27 = vpack.c.bf16 %v701_v23, %v700_v24 }
 0x4f9   :  { %3810 = vmatmul.mubr.msk.bf16.vlgmr.msra.gmra.mrb[28].mxu1 %vm196_vm2, %v1006_v20 }
 0x4fa   :  { %3820 = vmatpush3.bf16.msra.mxu1 %v1109_v22  ;;  %3821 = vmatprep.mubr.msk.bf16.mxu1 %vm4224_vm1, %v4223_v18  ;;  %v1197_v29 = vrot.slane %v706_v27, 4 }
 0x4fb   :  { %3831 = vmatprep.subr.bf16.mxu1 %v4223_v18 }
 0x501   :  { %3822 = vmatmul.mubr.msk.bf16.vlgmr.msra.gmra.mrb[32].mxu1 %vm196_vm2, %v706_v27 }
 0x502   :  { %3832 = vmatpush3.bf16.msra.mxu1 %v1204_v28  ;;  %3833 = vmatprep.mubr.msk.bf16.mxu1 %vm4224_vm1, %v4223_v18 }
 0x503   :  { %3843 = vmatprep.subr.bf16.mxu1 %v4223_v18 }
 0x509   :  { %3834 = vmatmul.mubr.msk.bf16.vlgmr.msra.gmra.mrb[36].mxu1 %vm196_vm2, %v1197_v29 }
 0x50a   :  { %3845 = vmatprep.mubr.msk.bf16.mxu1 %vm4224_vm1, %v4223_v18 }
 0x512   :  { %v687_v32 = vpop.xlane.xlu0 %686 }
 0x513   :  { %4139 = vrcp.f32 %v687_v32 }
 0x516   :  { %v1292_v33 = vpop.permute.xlu0 %1291 }
 0x517   :  { %v1297_v36 = vsel %vm713_vm3, %v1292_v33, 0 }
 0x518   :  { %3844 = vmatpush3.bf16.msra.mxu1 %v1297_v36 }
 0x519   :  { %3855 = vmatprep.subr.bf16.mxu1 %v4223_v18 }
 0x51d   :  { %v4140_v38 = vpop.eup %4139 }
 0x51e   :  { %v684_v37 = vpop.xlane.xlu1 %683  ;;  %v703_v40 = vmul.f32 %v4140_v38, %v4522_v56 }
 0x51f   :  { %4141 = vrcp.f32 %v684_v37  ;;  %v3487_v37 = vld [vmem:[%s5030_s8] ss:$0 sm:$0xff] }
 0x522   :  { %v1387_v42 = vpop.permute.xlu1 %1386 }
 0x523   :  { %v1392_v46 = vsel %vm713_vm3, %v1387_v42, 0 }
 0x529   :  { %v4142_v39 = vpop.eup %4141 }
 0x52a   :  { %v702_v41 = vmul.f32 %v4142_v39, %v4526_v44 }
 0x52c   :  { %v707_v43 = vpack.c.bf16 %v703_v40, %v702_v41 }
 0x52e   :  { %3846 = vmatmul.mubr.msk.bf16.vlgmr.msra.gmra.mrb[40].mxu1 %vm196_vm2, %v707_v43  ;;  %v1385_v47 = vrot.slane %v707_v43, 4 }
 0x52f   :  { %3856 = vmatpush3.bf16.msra.mxu1 %v1392_v46  ;;  %3857 = vmatprep.mubr.msk.bf16.mxu1 %vm4224_vm1, %v4223_v18 }
 0x530   :  { %3867 = vmatprep.subr.bf16.mxu1 %v4223_v18 }
 0x536   :  { %3858 = vmatmul.mubr.msk.bf16.vlgmr.msra.gmra.mrb[44].mxu1 %vm196_vm2, %v1385_v47 }
 0x537   :  { %3871 = vmatprep.mubr.msk.bf16.mxu1 %vm4224_vm1, %v4223_v18 }
 0x58c   :  { %v751_v49 = vpop.f32.mrb[16].mxu1 }
 0x58d   :  { %v757_v50 = vpack.c.bf16 %v751_v49, %v751_v49  ;;  %v3775_v51 = vpop.f32.mrb[17].mxu1 }
 0x58e   :  { %v754_v53 = vpop.f32.mrb[18].mxu1 }
 0x58f   :  { %v3776_v54 = vpop.f32.mrb[19].mxu1  ;;  %3780 = vmatmul.mubr.msk.bf16.vlgmr.msra.gmra.mrb[20].mxu0 %vm196_vm2, %v757_v50 }
 0x590   :  { %3790 = vmatpush3.bf16.msra.mxu0 %v866_v52  ;;  %3791 = vmatprep.mubr.msk.bf16.mxu0 %vm4224_vm1, %v4223_v18 }
 0x591   :  { %3801 = vmatprep.subr.bf16.mxu0 %v4223_v18 }
 0x594   :  { %v855_v56 = vpop.f32.mrb[20].mxu1 }
 0x595   :  { %v861_v57 = vpack.c.bf16 %v855_v56, %v855_v56  ;;  %v3787_v44 = vpop.f32.mrb[21].mxu1 }
 0x596   :  { %v858_v60 = vpop.f32.mrb[22].mxu1 }
 0x597   :  { %v3788_v61 = vpop.f32.mrb[23].mxu1  ;;  %3792 = vmatmul.mubr.msk.bf16.vlgmr.msra.gmra.mrb[24].mxu0 %vm196_vm2, %v861_v57 }
 0x598   :  { %3802 = vmatpush3.bf16.msra.mxu0 %v962_v59  ;;  %3803 = vmatprep.mubr.msk.bf16.mxu0 %vm4224_vm1, %v4223_v18 }
 0x599   :  { %3813 = vmatprep.subr.bf16.mxu0 %v4223_v18 }
 0x5c4   :  { %v951_v63 = vpop.f32.mrb[24].mxu1 }
 0x5c5   :  { %v957_v0 = vpack.c.bf16 %v951_v63, %v951_v63  ;;  %v3799_v1 = vpop.f32.mrb[25].mxu1 }
 0x5c6   :  { %v954_v3 = vpop.f32.mrb[26].mxu1 }
 0x5c7   :  { %v3800_v4 = vpop.f32.mrb[27].mxu1  ;;  %3804 = vmatmul.mubr.msk.bf16.vlgmr.msra.gmra.mrb[28].mxu0 %vm196_vm2, %v957_v0 }
 0x5c8   :  { %3814 = vmatpush3.bf16.msra.mxu0 %v1060_v2  ;;  %3815 = vmatprep.mubr.msk.bf16.mxu0 %vm4224_vm1, %v4223_v18 }
 0x5c9   :  { %3825 = vmatprep.subr.bf16.mxu0 %v4223_v18 }
 0x5cc   :  { %v1049_v45 = vpop.f32.mrb[28].mxu1 }
 0x5cd   :  { %v1055_v5 = vpack.c.bf16 %v1049_v45, %v1049_v45  ;;  %v3811_v6 = vpop.f32.mrb[29].mxu1 }
 0x5ce   :  { %v1052_v7 = vpop.f32.mrb[30].mxu1 }
 0x5cf   :  { %v3812_v8 = vpop.f32.mrb[31].mxu1  ;;  %3816 = vmatmul.mubr.msk.bf16.vlgmr.msra.gmra.mrb[32].mxu0 %vm196_vm2, %v1055_v5 }
 0x5d0   :  { %3826 = vmatpush3.bf16.msra.mxu0 %v4568_v31  ;;  %3827 = vmatprep.mubr.msk.bf16.mxu0 %vm4224_vm1, %v4223_v18 }
 0x5d1   :  { %3837 = vmatprep.subr.bf16.mxu0 %v4223_v18 }
 0x5d4   :  { %v1145_v9 = vpop.f32.mrb[32].mxu1 }
 0x5d5   :  { %v1151_v10 = vpack.c.bf16 %v1145_v9, %v1145_v9  ;;  %v3823_v12 = vpop.f32.mrb[33].mxu1 }
 0x5d6   :  { %v1148_v13 = vpop.f32.mrb[34].mxu1 }
 0x5d7   :  { %v3824_v14 = vpop.f32.mrb[35].mxu1  ;;  %3828 = vmatmul.mubr.msk.bf16.vlgmr.msra.gmra.mrb[36].mxu0 %vm196_vm2, %v1151_v10 }
 0x5d8   :  { %3838 = vmatpush3.bf16.msra.mxu0 %v866_v52  ;;  %3839 = vmatprep.mubr.msk.bf16.mxu0 %vm4224_vm1, %v4223_v18 }
 0x5d9   :  { %3849 = vmatprep.subr.bf16.mxu0 %v4223_v18 }
 0x5dc   :  { %v1240_v15 = vpop.f32.mrb[36].mxu1 }
 0x5dd   :  { %v1246_v16 = vpack.c.bf16 %v1240_v15, %v1240_v15  ;;  %v3835_v17 = vpop.f32.mrb[37].mxu1 }
 0x5de   :  { %v1243_v19 = vpop.f32.mrb[38].mxu1 }
 0x5df   :  { %v3836_v20 = vpop.f32.mrb[39].mxu1  ;;  %3840 = vmatmul.mubr.msk.bf16.vlgmr.msra.gmra.mrb[40].mxu0 %vm196_vm2, %v1246_v16 }
 0x5e0   :  { %3850 = vmatpush3.bf16.msra.mxu0 %v962_v59  ;;  %3851 = vmatprep.mubr.msk.bf16.mxu0 %vm4224_vm1, %v4223_v18 }
 0x5e1   :  { %3861 = vmatprep.subr.bf16.mxu0 %v4223_v18 }
 0x601   :  { %v1333_v21 = vpop.f32.mrb[40].mxu1 }
 0x602   :  { %v1339_v22 = vpack.c.bf16 %v1333_v21, %v1333_v21  ;;  %v3847_v25 = vpop.f32.mrb[41].mxu1 }
 0x603   :  { %v1336_v23 = vpop.f32.mrb[42].mxu1 }
 0x604   :  { %v3848_v24 = vpop.f32.mrb[43].mxu1  ;;  %3852 = vmatmul.mubr.msk.bf16.vlgmr.msra.gmra.mrb[44].mxu0 %vm196_vm2, %v1339_v22 }
 0x605   :  { %3862 = vmatpush3.bf16.msra.mxu0 %v1060_v2  ;;  %3863 = vmatprep.mubr.msk.bf16.mxu0 %vm4224_vm1, %v4223_v18 }
 0x606   :  { %3875 = vmatprep.subr.bf16.mxu0 %v4223_v18 }
 0x609   :  { %v1428_v26 = vpop.f32.mrb[44].mxu1 }
 0x60a   :  { %v1434_v27 = vpack.c.bf16 %v1428_v26, %v1428_v26  ;;  %v3859_v28 = vpop.f32.mrb[45].mxu1  ;;  %v4092_v26 = vld [vmem:[%s5033_s11 + $0x8] sm:$0xff]  }
 0x60b   :  { %v1431_v29 = vpop.f32.mrb[46].mxu1 }
 0x60c   :  { %v3860_v30 = vpop.f32.mrb[47].mxu1  ;;  %3864 = vmatmul.mubr.msk.bf16.vlgmr.msra.gmra.mrb[48].mxu0 %vm196_vm2, %v1434_v27 }
 0x60d   :  { %3883 = vmatprep.mubr.msk.bf16.mxu0 %vm4224_vm1, %v4223_v18 }
 0x662   :  { %v798_v31 = vpop.f32.mrb[20].mxu0 }
 0x663   :  { %v3781_v32 = vpop.f32.mrb[21].mxu0  ;;  %v810_v38 = vadd.f32 %v3487_v37, %v798_v31 }
 0x664   :  { %v801_v33 = vpop.f32.mrb[22].mxu0 }
 0x665   :  { %v3782_v36 = vpop.f32.mrb[23].mxu0 }
 0x66a   :  { %v902_v39 = vpop.f32.mrb[24].mxu0 }
 0x66b   :  { %v908_v40 = vadd.f32 %v902_v39, %v810_v38  ;;  %v3793_v41 = vpop.f32.mrb[25].mxu0 }
 0x66c   :  { %v905_v42 = vpop.f32.mrb[26].mxu0  ;;  %v3503_v41 = vld [vmem:[%s5032_s10] ss:$0 sm:$0xff] }
 0x66d   :  { %v3794_v43 = vpop.f32.mrb[27].mxu0 }
 0x69a   :  { %v998_v46 = vpop.f32.mrb[28].mxu0 }
 0x69b   :  { %v1004_v47 = vadd.f32 %v998_v46, %v908_v40  ;;  %v3805_v48 = vpop.f32.mrb[29].mxu0 }
 0x69c   :  { %v1001_v49 = vpop.f32.mrb[30].mxu0  ;;  %v4093_v48 = vld [vmem:[%s5035_s13] sm:$0xff]  }
 0x69d   :  { %v3806_v50 = vpop.f32.mrb[31].mxu0  ;;  %3876 = vmatpush3.bf16.msra.mxu0 %v4093_v48  ;;  %v4094_v49 = vld [vmem:[%s5035_s13 + $0x8] sm:$0xff]  }
 0x69e   :  { %3877 = vmatprep.subr.bf16.mxu0 %v4223_v18  ;;  %v4095_v50 = vld [vmem:[%s5035_s13 + $0x10] sm:$0xff]  }
 0x6a1   :  { %3878 = vmatpush3.bf16.msra.mxu0 %v4094_v49  ;;  %v3526_v49 = vld [vmem:[%s5028_s6 + $0x1] ss:$0 sm:$0xff]  ;;  %s5056_s6 = smov 40  }
 0x6a2   :  { %v1096_v51 = vpop.f32.mrb[32].mxu0  ;;  %3879 = vmatprep.subr.bf16.mxu0 %v4223_v18 }
 0x6a3   :  { %v1102_v52 = vadd.f32 %v1096_v51, %v1004_v47  ;;  %v3817_v53 = vpop.f32.mrb[33].mxu0  ;;  %v4096_v51 = vld [vmem:[%s5035_s13 + $0x18] sm:$0xff]  }
 0x6a4   :  { %v1099_v54 = vpop.f32.mrb[34].mxu0 }
 0x6a5   :  { %v3818_v55 = vpop.f32.mrb[35].mxu0  ;;  %v1479_v56 = vadd.f32 %v1102_v52, %v4370_v34  ;;  %3880 = vmatpush3.bf16.msra.mxu0 %v4095_v50  ;;  %v3504_v52 = vld [vmem:[%s5034_s12] ss:$0 sm:$0xff] }
 0x6a6   :  { %3881 = vmatprep.subr.bf16.mxu0 %v4223_v18 }
 0x6a7   :  { %v1483_v57 = vsel %vm71_vm0, %v1479_v56, 0.0 }
 0x6a8   :  { %1484 = vadd.xlane.f32.xlu0 %v1483_v57 }
 0x6a9   :  { %3882 = vmatpush3.bf16.msra.mxu0 %v4096_v51 }
 0x6aa   :  { %v1189_v44 = vpop.f32.mrb[36].mxu0  ;;  %3901 = vmatprep.subr.bf16.mxu0 %v4223_v18 }
 0x6ab   :  { %v3829_v59 = vpop.f32.mrb[37].mxu0  ;;  %v1195_v62 = vadd.f32 %v3487_v37, %v1189_v44  ;;  %v3502_v37 = vld [vmem:[%s5031_s9] ss:$0 sm:$0xff] }
 0x6ac   :  { %v1192_v60 = vpop.f32.mrb[38].mxu0 }
 0x6ad   :  { %v3830_v61 = vpop.f32.mrb[39].mxu0 }
 0x6b2   :  { %v1284_v63 = vpop.f32.mrb[40].mxu0 }
 0x6b3   :  { %v1290_v0 = vadd.f32 %v1284_v63, %v1195_v62  ;;  %v3841_v1 = vpop.f32.mrb[41].mxu0 }
 0x6b4   :  { %v1287_v2 = vpop.f32.mrb[42].mxu0 }
 0x6b5   :  { %v3842_v3 = vpop.f32.mrb[43].mxu0 }
 0x6d7   :  { %v1377_v4 = vpop.f32.mrb[44].mxu0 }
 0x6d8   :  { %v1383_v45 = vadd.f32 %v1377_v4, %v1290_v0  ;;  %v3853_v5 = vpop.f32.mrb[45].mxu0 }
 0x6d9   :  { %v1380_v6 = vpop.f32.mrb[46].mxu0  ;;  %v3508_v5 = vld [vmem:[%s5055_s24] ss:$0 sm:$0xff] }
 0x6da   :  { %v3854_v7 = vpop.f32.mrb[47].mxu0 }
 0x6df   :  { %v1472_v8 = vpop.f32.mrb[48].mxu0 }
 0x6e0   :  { %v1478_v34 = vadd.f32 %v1472_v8, %v1383_v45  ;;  %v3865_v9 = vpop.f32.mrb[49].mxu0 }
 0x6e1   :  { %v1475_v10 = vpop.f32.mrb[50].mxu0 }
 0x6e2   :  { %v3866_v12 = vpop.f32.mrb[51].mxu0  ;;  %v1480_v13 = vadd.f32 %v1478_v34, %v4372_v35  ;;  %v4091_v35 = vld [vmem:[%s5033_s11] sm:$0xff]  }
 0x6e3   :  { %3868 = vmatpush3.bf16.msra.mxu1 %v4091_v35 }
 0x6e4   :  { %v1486_v14 = vsel %vm71_vm0, %v1480_v13, 0.0  ;;  %3869 = vmatprep.subr.bf16.mxu1 %v4223_v18 }
 0x6e5   :  { %1487 = vadd.xlane.f32.xlu1 %v1486_v14 }
 0x6e7   :  { %3870 = vmatpush3.bf16.msra.mxu1 %v4092_v26  ;;  %v4097_v26 = vld [vmem:[%s5027_s5 + $0x10] sm:$0xff]  }
 0x6e8   :  { %3887 = vmatprep.subr.bf16.mxu1 %v4223_v18 }
 0x735   :  { %v1485_v15 = vpop.xlane.xlu0 %1484 }
 0x736   :  { %v1489_v16 = vmul.f32 0.03125, %v1485_v15 }
 0x738   :  { %v1491_v17 = vsub.f32 %v1479_v56, %v1489_v16 }
 0x73a   :  { %v1493_v19 = vmul.f32 %v1491_v17, %v1491_v17 }
 0x73c   :  { %v1495_v20 = vsel %vm71_vm0, %v1493_v19, 0.0 }
 0x73d   :  { %1496 = vadd.xlane.f32.xlu0 %v1495_v20 }
 0x772   :  { %v1488_v21 = vpop.xlane.xlu1 %1487 }
 0x773   :  { %v1490_v22 = vmul.f32 0.03125, %v1488_v21 }
 0x775   :  { %v1492_v25 = vsub.f32 %v1480_v13, %v1490_v22 }
 0x777   :  { %v1494_v23 = vmul.f32 %v1492_v25, %v1492_v25 }
 0x779   :  { %v1498_v24 = vsel %vm71_vm0, %v1494_v23, 0.0 }
 0x77a   :  { %1499 = vadd.xlane.f32.xlu0 %v1498_v24 }
 0x7ca   :  { %v1497_v27 = vpop.xlane.xlu0 %1496 }
 0x7cb   :  { %v1501_v28 = vmul.f32 0.03125, %v1497_v27  ;;  %v4098_v27 = vld [vmem:[%s5027_s5 + $0x18] sm:$0xff]  }
 0x7cd   :  { %v1503_v29 = vadd.f32 1e-12, %v1501_v28 }
 0x7cf   :  { %4143 = vrsqrt.f32 %v1503_v29 }
 0x7d9   :  { %v4144_v33 = vpop.eup %4143 }
 0x7da   :  { %v1507_v36 = vmul.f32 %v4144_v33, %v1491_v17 }
 0x7dc   :  { %v1515_v39 = vmul.f32 %v3502_v37, %v1507_v36 }
 0x7de   :  { %v1523_v43 = vadd.f32 %v3503_v41, %v1515_v39 }
 0x807   :  { %v1500_v30 = vpop.xlane.xlu0 %1499 }
 0x808   :  { %v1502_v31 = vmul.f32 0.03125, %v1500_v30 }
 0x80a   :  { %v1504_v32 = vadd.f32 1e-12, %v1502_v31 }
 0x80c   :  { %4145 = vrsqrt.f32 %v1504_v32 }
 0x816   :  { %v4146_v38 = vpop.eup %4145 }
 0x817   :  { %v1508_v40 = vmul.f32 %v4146_v38, %v1492_v25 }
 0x819   :  { %v1516_v42 = vmul.f32 %v3502_v37, %v1508_v40  ;;  %v3514_v37 = vld [vmem:[%s5037_s15] ss:$0 sm:$0xff] }
 0x81b   :  { %v1524_v46 = vadd.f32 %v3503_v41, %v1516_v42  ;;  %v3515_v42 = vld [vmem:[%s5038_s16] ss:$0 sm:$0xff] }
 0x81d   :  { %v1529_v47 = vpack.c.bf16 %v1524_v46, %v1523_v43 }
 0x81f   :  { %3872 = vmatmul.mubr.msk.bf16.vlgmr.msra.gmra.mrb[48].mxu1 %vm71_vm0, %v1529_v47 }
 0x820   :  { %3891 = vmatprep.mubr.msk.bf16.mxu1 %vm4224_vm1, %v4223_v18  ;;  %3888 = vmatpush3.bf16.msra.mxu1 %v4097_v26 }
 0x821   :  { %3889 = vmatprep.subr.bf16.mxu1 %v4223_v18 }
 0x824   :  { %3890 = vmatpush3.bf16.msra.mxu1 %v4098_v27 }
 0x825   :  { %3895 = vmatprep.subr.bf16.mxu1 %v4223_v18 }
 0x8f2   :  { %v1586_v53 = vpop.f32.mrb[48].mxu1 }
 0x8f3   :  { %v1587_v54 = vadd.f32 %v3504_v52, %v1586_v53  ;;  %v3873_v55 = vpop.f32.mrb[49].mxu1 }
 0x8f4   :  { %v1589_v56 = vpop.f32.mrb[50].mxu1 }
 0x8f5   :  { %v1595_v57 = vmul.f32 0.70710677, %v1587_v54  ;;  %v1590_v44 = vadd.f32 %v3504_v52, %v1589_v56  ;;  %v3874_v59 = vpop.f32.mrb[51].mxu1  ;;  %v1593_v0 = vmul.f32 0.5, %v1587_v54 }
 0x8f7   :  { %4147 = verf.f32 %v1595_v57  ;;  %v1596_v60 = vmul.f32 0.70710677, %v1590_v44  ;;  %v1594_v1 = vmul.f32 0.5, %v1590_v44 }
 0x8f9   :  { %4149 = verf.f32 %v1596_v60 }
 0x901   :  { %v4148_v61 = vpop.eup %4147 }
 0x902   :  { %v1599_v62 = vadd.f32 1.0, %v4148_v61 }
 0x903   :  { %v4150_v63 = vpop.eup %4149 }
 0x904   :  { %v1600_v2 = vadd.f32 1.0, %v4150_v63  ;;  %v1601_v3 = vmul.f32 %v1599_v62, %v1593_v0 }
 0x906   :  { %v1602_v4 = vmul.f32 %v1600_v2, %v1594_v1 }
 0x908   :  { %v1611_v45 = vpack.c.bf16 %v1602_v4, %v1601_v3 }
 0x90a   :  { %3884 = vmatmul.mubr.msk.bf16.vlgmr.msra.gmra.mrb[52].mxu0 %vm1643_vm4, %v1611_v45 }
 0x90b   :  { %3903 = vmatprep.mubr.msk.bf16.mxu0 %vm4224_vm1, %v4223_v18 }
 0x9dd   :  { %v1681_v6 = vpop.f32.mrb[52].mxu0 }
 0x9de   :  { %v1682_v7 = vadd.f32 %v3508_v5, %v1681_v6  ;;  %v3885_v8 = vpop.f32.mrb[53].mxu0 }
 0x9df   :  { %v1684_v34 = vpop.f32.mrb[54].mxu0 }
 0x9e0   :  { %v1685_v9 = vadd.f32 %v3508_v5, %v1684_v34  ;;  %v3886_v10 = vpop.f32.mrb[55].mxu0  ;;  %v1688_v12 = vadd.f32 %v1682_v7, %v1523_v43 }
 0x9e2   :  { %v1692_v13 = vsel %vm71_vm0, %v1688_v12, 0.0  ;;  %v1689_v14 = vadd.f32 %v1685_v9, %v1524_v46 }
 0x9e3   :  { %1693 = vadd.xlane.f32.xlu0 %v1692_v13 }
 0x9e4   :  { %v1695_v15 = vsel %vm71_vm0, %v1689_v14, 0.0 }
 0x9e5   :  { %1696 = vadd.xlane.f32.xlu1 %v1695_v15 }
 0xa70   :  { %v1694_v16 = vpop.xlane.xlu0 %1693 }
 0xa71   :  { %v1698_v17 = vmul.f32 0.03125, %v1694_v16 }
 0xa72   :  { %v1697_v19 = vpop.xlane.xlu1 %1696 }
 0xa73   :  { %v1700_v20 = vsub.f32 %v1688_v12, %v1698_v17  ;;  %v1699_v21 = vmul.f32 0.03125, %v1697_v19 }
 0xa75   :  { %v1701_v22 = vsub.f32 %v1689_v14, %v1699_v21  ;;  %v1702_v25 = vmul.f32 %v1700_v20, %v1700_v20 }
 0xa77   :  { %v1704_v23 = vsel %vm71_vm0, %v1702_v25, 0.0  ;;  %v1703_v24 = vmul.f32 %v1701_v22, %v1701_v22 }
 0xa78   :  { %1705 = vadd.xlane.f32.xlu0 %v1704_v23 }
 0xa79   :  { %v1707_v35 = vsel %vm71_vm0, %v1703_v24, 0.0 }
 0xa7a   :  { %1708 = vadd.xlane.f32.xlu1 %v1707_v35 }
 0xb05   :  { %v1706_v28 = vpop.xlane.xlu0 %1705 }
 0xb06   :  { %v1710_v29 = vmul.f32 0.03125, %v1706_v28 }
 0xb07   :  { %v1709_v30 = vpop.xlane.xlu1 %1708 }
 0xb08   :  { %v1712_v31 = vadd.f32 1e-12, %v1710_v29  ;;  %v1711_v32 = vmul.f32 0.03125, %v1709_v30 }
 0xb0a   :  { %4151 = vrsqrt.f32 %v1712_v31  ;;  %v1713_v33 = vadd.f32 1e-12, %v1711_v32 }
 0xb0c   :  { %4153 = vrsqrt.f32 %v1713_v33 }
 0xb14   :  { %v4152_v36 = vpop.eup %4151 }
 0xb15   :  { %v1716_v38 = vmul.f32 %v4152_v36, %v1700_v20 }
 0xb16   :  { %v4154_v39 = vpop.eup %4153 }
 0xb17   :  { %v1724_v40 = vmul.f32 %v3514_v37, %v1716_v38  ;;  %v1717_v41 = vmul.f32 %v4154_v39, %v1701_v22 }
 0xb19   :  { %v1725_v43 = vmul.f32 %v3514_v37, %v1717_v41  ;;  %v4697_v46 = vadd.f32 %v3515_v42, %v1724_v40 }
 0xb1b   :  { %v4699_v47 = vadd.f32 %v3515_v42, %v1725_v43 }
 0xb1d   :  { %v1748_v48 = vpack.c.bf16 %v4699_v47, %v4697_v46 }
 0xb1f   :  { %3892 = vmatmul.mubr.msk.bf16.vlgmr.msra.gmra.mrb[52].mxu1 %vm71_vm0, %v1748_v48 }
 0xb20   :  { %3897 = vmatprep.mubr.msk.bf16.mxu1 %vm4224_vm1, %v4223_v18 }
 0xbf2   :  { %v1804_v50 = vpop.f32.mrb[52].mxu1 }
 0xbf3   :  { %v3893_v51 = vpop.f32.mrb[53].mxu1  ;;  %v1805_v53 = vadd.f32 %v3526_v49, %v1804_v50 }
 0xbf4   :  { %v1807_v52 = vpop.f32.mrb[54].mxu1 }
 0xbf5   :  { %v1808_v54 = vadd.f32 %v3526_v49, %v1807_v52  ;;  %v3894_v55 = vpop.f32.mrb[55].mxu1 }
 0xbf7   :  { %v4709_v56 = vpack.c.bf16 %v1808_v54, %v1805_v53 }
 0xbf9   :  { %1865 = vrot.lane.b32.xlu1 %v4709_v56, %s4225_s4  ;;  %1813 = vrot.lane.b32.xlu0 %v4709_v56, %s4226_s20  ;;  %v4724_v57 = vrot.slane %v4709_v56, 4 }
 0xbfd   :  { %1863 = vrot.lane.b32.xlu1 %v4709_v56, %s4227_s21  ;;  %1969 = vrot.lane.b32.xlu0 %v4709_v56, %s4228_s1 }
 0xc01   :  { %1917 = vrot.lane.b32.xlu1 %v4709_v56, %s4229_s22  ;;  %1967 = vrot.lane.b32.xlu0 %v4709_v56, %s4230_s2 }
 0xc05   :  { %1915 = vrot.lane.b32.xlu1 %v4709_v56, %s4231_s14  ;;  %2072 = vrot.lane.b32.xlu0 %v4724_v57, %s4225_s4 }
 0xc09   :  { %2124 = vrot.lane.b32.xlu0 %v4724_v57, %s4229_s22  ;;  %2020 = vrot.lane.b32.xlu1 %v4724_v57, %s4226_s20 }
 0xc0d   :  { %2122 = vrot.lane.b32.xlu0 %v4724_v57, %s4231_s14  ;;  %2070 = vrot.lane.b32.xlu1 %v4724_v57, %s4227_s21 }
 0xc11   :  { %2176 = vrot.lane.b32.xlu1 %v4724_v57, %s4228_s1 }
 0xc15   :  { %2174 = vrot.lane.b32.xlu1 %v4724_v57, %s4230_s2 }
 0xc6b   :  { %v1866_v44 = vpop.permute.xlu1 %1865  ;;  %v1814_v59 = vpop.permute.xlu0 %1813 }
 0xc6c   :  { %v1871_v60 = vsel %vm196_vm2, %v1866_v44, 0  ;;  %v1819_v61 = vsel %vm196_vm2, %v1814_v59, 0 }
 0xc6d   :  { %3896 = vmatpush3.bf16.xpose.msra.mxu1 %v1819_v61  ;;  %3902 = vmatpush3.bf16.xpose.msra.mxu0 %v1871_v60 }
 0xc6e   :  { %3907 = vmatprep.subr.bf16.mxu1 %v4223_v18  ;;  %3913 = vmatprep.subr.bf16.mxu0 %v4223_v18 }
 0xc6f   :  { %v1864_v62 = vpop.permute.xlu1 %1863  ;;  %v1970_v63 = vpop.permute.xlu0 %1969 }
 0xc70   :  { %v1975_v2 = vsel %vm196_vm2, %v1970_v63, 0 }
 0xc73   :  { %v1918_v0 = vpop.permute.xlu1 %1917  ;;  %v1968_v1 = vpop.permute.xlu0 %1967 }
 0xc74   :  { %v1923_v3 = vsel %vm196_vm2, %v1918_v0, 0  ;;  %3898 = vmatmul.mubr.msk.bf16.vlgmr.msra.gmra.mrb[56].mxu1 %vm196_vm2, %v4709_v56  ;;  %3904 = vmatmul.mubr.msk.bf16.vlgmr.msra.gmra.mrb[56].mxu0 %vm196_vm2, %v1864_v62 }
 0xc75   :  { %3908 = vmatpush3.bf16.xpose.msra.mxu1 %v1923_v3  ;;  %3914 = vmatpush3.bf16.xpose.msra.mxu0 %v1975_v2 }
 0xc76   :  { %3909 = vmatprep.mubr.msk.bf16.mxu1 %vm4224_vm1, %v4223_v18  ;;  %3915 = vmatprep.mubr.msk.bf16.mxu0 %vm4224_vm1, %v4223_v18 }
 0xc77   :  { %v1916_v4 = vpop.permute.xlu1 %1915  ;;  %3919 = vmatprep.subr.bf16.mxu1 %v4223_v18  ;;  %3925 = vmatprep.subr.bf16.mxu0 %v4223_v18  ;;  %v2073_v45 = vpop.permute.xlu0 %2072 }
 0xc78   :  { %v2078_v6 = vsel %vm196_vm2, %v2073_v45, 0 }
 0xc7b   :  { %v2021_v5 = vpop.permute.xlu1 %2020  ;;  %v2125_v34 = vpop.permute.xlu0 %2124 }
 0xc7c   :  { %v2026_v7 = vsel %vm196_vm2, %v2021_v5, 0  ;;  %3910 = vmatmul.mubr.msk.bf16.vlgmr.msra.gmra.mrb[60].mxu1 %vm196_vm2, %v1916_v4  ;;  %3916 = vmatmul.mubr.msk.bf16.vlgmr.msra.gmra.mrb[60].mxu0 %vm196_vm2, %v1968_v1  ;;  %v2130_v10 = vsel %vm196_vm2, %v2125_v34, 0 }
 0xc7d   :  { %3920 = vmatpush3.bf16.xpose.msra.mxu1 %v2026_v7  ;;  %3926 = vmatpush3.bf16.xpose.msra.mxu0 %v2078_v6 }
 0xc7e   :  { %3921 = vmatprep.mubr.msk.bf16.mxu1 %vm4224_vm1, %v4223_v18  ;;  %3927 = vmatprep.mubr.msk.bf16.mxu0 %vm4224_vm1, %v4223_v18 }
 0xc7f   :  { %v2071_v8 = vpop.permute.xlu1 %2070  ;;  %3931 = vmatprep.subr.bf16.mxu1 %v4223_v18  ;;  %3937 = vmatprep.subr.bf16.mxu0 %v4223_v18  ;;  %v2123_v13 = vpop.permute.xlu0 %2122 }
 0xc83   :  { %v2177_v9 = vpop.permute.xlu1 %2176 }
 0xc84   :  { %v2182_v12 = vsel %vm196_vm2, %v2177_v9, 0  ;;  %3922 = vmatmul.mubr.msk.bf16.vlgmr.msra.gmra.mrb[64].mxu1 %vm196_vm2, %v4724_v57  ;;  %3928 = vmatmul.mubr.msk.bf16.vlgmr.msra.gmra.mrb[64].mxu0 %vm196_vm2, %v2071_v8 }
 0xc85   :  { %3932 = vmatpush3.bf16.xpose.msra.mxu1 %v2130_v10  ;;  %3938 = vmatpush3.bf16.xpose.msra.mxu0 %v2182_v12 }
 0xc86   :  { %3933 = vmatprep.mubr.msk.bf16.mxu1 %vm4224_vm1, %v4223_v18  ;;  %3939 = vmatprep.mubr.msk.bf16.mxu0 %vm4224_vm1, %v4223_v18 }
 0xc87   :  { %3943 = vmatprep.subr.bf16.mxu1 %v4223_v18  ;;  %3949 = vmatprep.subr.bf16.mxu0 %v4223_v18  ;;  %v2175_v14 = vpop.permute.xlu1 %2174 }
 0xc8c   :  { %3934 = vmatmul.mubr.msk.bf16.vlgmr.msra.gmra.mrb[68].mxu1 %vm196_vm2, %v2123_v13  ;;  %3940 = vmatmul.mubr.msk.bf16.vlgmr.msra.gmra.mrb[68].mxu0 %vm196_vm2, %v2175_v14 }
 0xc8d   :  { %3945 = vmatprep.mubr.msk.bf16.mxu1 %vm4224_vm1, %v4223_v18  ;;  %3951 = vmatprep.mubr.msk.bf16.mxu0 %vm4224_vm1, %v4223_v18 }
 0xd47   :  { %v1855_v15 = vpop.f32.mrb[56].mxu1  ;;  %v1907_v16 = vpop.f32.mrb[56].mxu0 }
 0xd48   :  { %v1861_v17 = vmul.f32 0.35355338, %v1855_v15  ;;  %v1913_v19 = vmul.f32 0.35355338, %v1907_v16  ;;  %v3899_v20 = vpop.f32.mrb[57].mxu1  ;;  %v3905_v21 = vpop.f32.mrb[57].mxu0 }
 0xd49   :  { %v1858_v22 = vpop.f32.mrb[58].mxu1  ;;  %v1910_v25 = vpop.f32.mrb[58].mxu0 }
 0xd4a   :  { %v3900_v23 = vpop.f32.mrb[59].mxu1  ;;  %v3906_v24 = vpop.f32.mrb[59].mxu0  ;;  %v1862_v35 = vadd.f32 %v1861_v17, %v4460_v11  ;;  %v1914_v26 = vadd.f32 %v1913_v19, %v4460_v11 }
 0xd4c   :  { %v2226_v27 = vsel %vm196_vm2, %v1862_v35, -inf  ;;  %v2229_v28 = vsel %vm196_vm2, %v1914_v26, -inf }
 0xd4d   :  { %2227 = vmax.xlane.f32.xlu0 %v2226_v27  ;;  %2230 = vmax.xlane.f32.xlu1 %v2229_v28 }
 0xd4f   :  { %v1959_v29 = vpop.f32.mrb[60].mxu1  ;;  %v2011_v30 = vpop.f32.mrb[60].mxu0 }
 0xd50   :  { %v3911_v31 = vpop.f32.mrb[61].mxu1  ;;  %v3917_v32 = vpop.f32.mrb[61].mxu0  ;;  %v1965_v61 = vmul.f32 0.35355338, %v1959_v29  ;;  %v2017_v63 = vmul.f32 0.35355338, %v2011_v30 }
 0xd51   :  { %v1962_v33 = vpop.f32.mrb[62].mxu1  ;;  %v2014_v36 = vpop.f32.mrb[62].mxu0 }
 0xd52   :  { %v3912_v37 = vpop.f32.mrb[63].mxu1  ;;  %v3918_v38 = vpop.f32.mrb[63].mxu0  ;;  %v1966_v1 = vadd.f32 %v1965_v61, %v4460_v11  ;;  %v2018_v3 = vadd.f32 %v2017_v63, %v4460_v11 }
 0xd54   :  { %v2232_v45 = vsel %vm196_vm2, %v1966_v1, -inf  ;;  %v2235_v8 = vsel %vm196_vm2, %v2018_v3, -inf }
 0xd57   :  { %v2062_v39 = vpop.f32.mrb[64].mxu1  ;;  %v2114_v40 = vpop.f32.mrb[64].mxu0 }
 0xd58   :  { %v3923_v41 = vpop.f32.mrb[65].mxu1  ;;  %v3929_v42 = vpop.f32.mrb[65].mxu0  ;;  %v2120_v62 = vmul.f32 0.35355338, %v2114_v40  ;;  %v2068_v4 = vmul.f32 0.35355338, %v2062_v39 }
 0xd59   :  { %v2065_v43 = vpop.f32.mrb[66].mxu1  ;;  %v2117_v48 = vpop.f32.mrb[66].mxu0 }
 0xd5a   :  { %v3924_v49 = vpop.f32.mrb[67].mxu1  ;;  %v3930_v50 = vpop.f32.mrb[67].mxu0  ;;  %v2121_v2 = vadd.f32 %v2120_v62, %v4476_v58  ;;  %v2069_v9 = vadd.f32 %v2068_v4, %v4476_v58 }
 0xd5c   :  { %v2241_v5 = vsel %vm196_vm2, %v2121_v2, -inf  ;;  %v2238_v11 = vsel %vm196_vm2, %v2069_v9, -inf }
 0xd5e   :  { %2422 = vrot.lane.b32.xlu1 %v4709_v56, %s4232_s3 }
 0xd5f   :  { %v2166_v51 = vpop.f32.mrb[68].mxu1  ;;  %v2218_v52 = vpop.f32.mrb[68].mxu0 }
 0xd60   :  { %v3935_v53 = vpop.f32.mrb[69].mxu1  ;;  %v3941_v54 = vpop.f32.mrb[69].mxu0  ;;  %v2224_v0 = vmul.f32 0.35355338, %v2218_v52  ;;  %v2172_v7 = vmul.f32 0.35355338, %v2166_v51 }
 0xd61   :  { %v2169_v55 = vpop.f32.mrb[70].mxu1  ;;  %v2221_v44 = vpop.f32.mrb[70].mxu0 }
 0xd62   :  { %v3936_v59 = vpop.f32.mrb[71].mxu1  ;;  %v3942_v60 = vpop.f32.mrb[71].mxu0  ;;  %v4798_v6 = vadd.f32 %v2224_v0, %v4476_v58  ;;  %v2173_v10 = vadd.f32 %v2172_v7, %v4476_v58 }
 0xd63   :  { %2318 = vrot.lane.b32.xlu0 %v4709_v56, %s4233_s26 }
 0xd64   :  { %v2247_v34 = vsel %vm196_vm2, %v4798_v6, -inf  ;;  %v2244_v12 = vsel %vm196_vm2, %v2173_v10, -inf }
 0xd82   :  { %2233 = vmax.xlane.f32.xlu0 %v2232_v45  ;;  %2242 = vmax.xlane.f32.xlu1 %v2241_v5 }
 0xd86   :  { %2236 = vmax.xlane.f32.xlu0 %v2235_v8  ;;  %2248 = vmax.xlane.f32.xlu1 %v2247_v34 }
 0xd8a   :  { %2239 = vmax.xlane.f32.xlu0 %v2238_v11 }
 0xd8e   :  { %2245 = vmax.xlane.f32.xlu0 %v2244_v12 }
 0xda4   :  { %2518 = vrot.lane.b32.xlu0 %v4709_v56, %s4234_s27 }
 0xdda   :  { %v2228_v13 = vpop.xlane.xlu0 %2227  ;;  %v2231_v14 = vpop.xlane.xlu1 %2230 }
 0xddb   :  { %v2250_v15 = vsub.f32 %v1862_v35, %v2228_v13  ;;  %v2251_v16 = vsub.f32 %v1914_v26, %v2231_v14 }
 0xddd   :  { %v2258_v17 = vmul.f32 1.442695, %v2250_v15  ;;  %v2260_v19 = vmul.f32 1.442695, %v2251_v16 }
 0xdde   :  { %v2319_v20 = vpop.permute.xlu0 %2318  ;;  %v2423_v24 = vpop.permute.xlu1 %2422 }
 0xddf   :  { %4155 = vpow2.f32 %v2258_v17  ;;  %v2324_v21 = vsel %vm713_vm3, %v2319_v20, 0  ;;  %v2428_v5 = vsel %vm713_vm3, %v2423_v24, 0 }
 0xde0   :  { %4157 = vpow2.f32 %v2260_v19  ;;  %3944 = vmatpush3.bf16.msra.mxu1 %v2324_v21 }
 0xde1   :  { %3955 = vmatprep.subr.bf16.mxu1 %v4223_v18 }
 0xde9   :  { %v4156_v58 = vpop.eup %4155 }
 0xdea   :  { %v4158_v22 = vpop.eup %4157  ;;  %v2274_v25 = vsel %vm196_vm2, %v4156_v58, 0.0 }
 0xdeb   :  { %2275 = vadd.xlane.f32.xlu0 %v2274_v25  ;;  %v2277_v23 = vsel %vm196_vm2, %v4158_v22, 0.0 }
 0xdec   :  { %2278 = vadd.xlane.f32.xlu1 %v2277_v23 }
 0xdfd   :  { %2712 = vrot.lane.b32.xlu1 %v4724_v57, %s4233_s26 }
 0xe0f   :  { %v2234_v35 = vpop.xlane.xlu0 %2233  ;;  %v2243_v28 = vpop.xlane.xlu1 %2242 }
 0xe10   :  { %v2252_v26 = vsub.f32 %v1966_v1, %v2234_v35  ;;  %v2255_v31 = vsub.f32 %v2121_v2, %v2243_v28 }
 0xe12   :  { %v2262_v27 = vmul.f32 1.442695, %v2252_v26  ;;  %v2268_v37 = vmul.f32 1.442695, %v2255_v31 }
 0xe13   :  { %v2237_v29 = vpop.xlane.xlu0 %2236  ;;  %v2249_v51 = vpop.xlane.xlu1 %2248 }
 0xe14   :  { %4159 = vpow2.f32 %v2262_v27  ;;  %v2253_v30 = vsub.f32 %v2018_v3, %v2237_v29  ;;  %v2257_v52 = vsub.f32 %v4798_v6, %v2249_v51  ;;  %v3521_v27 = vld [vmem:[%s5029_s7 + $0x10] sm:$0xf] }
 0xe15   :  { %v4876_v28 = vsel %vm713_vm3, %v3521_v27, 0 }
 0xe16   :  { %v2264_v32 = vmul.f32 1.442695, %v2253_v30  ;;  %v2272_v53 = vmul.f32 1.442695, %v2257_v52  ;;  %3950 = vmatpush3.bf16.msra.mxu0 %v4876_v28 }
 0xe17   :  { %v2240_v33 = vpop.xlane.xlu0 %2239  ;;  %3961 = vmatprep.subr.bf16.mxu0 %v4223_v18 }
 0xe18   :  { %4161 = vpow2.f32 %v2264_v32  ;;  %v2254_v36 = vsub.f32 %v2069_v9, %v2240_v33 }
 0xe1a   :  { %v2266_v38 = vmul.f32 1.442695, %v2254_v36 }
 0xe1b   :  { %v2246_v54 = vpop.xlane.xlu0 %2245 }
 0xe1c   :  { %4163 = vpow2.f32 %v2266_v38  ;;  %v2256_v55 = vsub.f32 %v2173_v10, %v2246_v54  ;;  %v3523_v54 = vld [vmem:[%s5029_s7 + $0x18] sm:$0xf] }
 0xe1d   :  { %4165 = vpow2.f32 %v2268_v37 }
 0xe1e   :  { %v4160_v39 = vpop.eup %4159  ;;  %4167 = vpow2.f32 %v2272_v53  ;;  %v2270_v44 = vmul.f32 1.442695, %v2256_v55 }
 0xe1f   :  { %v2280_v40 = vsel %vm196_vm2, %v4160_v39, 0.0  ;;  %v2519_v62 = vpop.permute.xlu0 %2518 }
 0xe20   :  { %2281 = vadd.xlane.f32.xlu0 %v2280_v40  ;;  %4169 = vpow2.f32 %v2270_v44  ;;  %v2524_v6 = vsel %vm713_vm3, %v2519_v62, 0  ;;  %v3524_v62 = vld [vmem:[%s5029_s7 + $0x1c] sm:$0xf] }
 0xe22   :  { %v4162_v41 = vpop.eup %4161 }
 0xe23   :  { %v2283_v42 = vsel %vm196_vm2, %v4162_v41, 0.0 }
 0xe24   :  { %2284 = vadd.xlane.f32.xlu1 %v2283_v42 }
 0xe26   :  { %v4817_v43 = vpop.eup %4163 }
 0xe27   :  { %v2286_v48 = vsel %vm196_vm2, %v4817_v43, 0.0  ;;  %v4821_v49 = vpop.eup %4165 }
 0xe28   :  { %2287 = vadd.xlane.f32.xlu1 %v2286_v48  ;;  %v2289_v50 = vsel %vm196_vm2, %v4821_v49, 0.0  ;;  %v4830_v59 = vpop.eup %4167 }
 0xe29   :  { %v2295_v60 = vsel %vm196_vm2, %v4830_v59, 0.0 }
 0xe2a   :  { %v4834_v61 = vpop.eup %4169 }
 0xe2c   :  { %2290 = vadd.xlane.f32.xlu1 %v2289_v50 }
 0xe36   :  { %2616 = vrot.lane.b32.xlu0 %v4709_v56, %s5056_s6  ;;  %v2292_v56 = vsel %vm196_vm2, %v4834_v61, 0.0 }
 0xe3d   :  { %2807 = vrot.lane.b32.xlu1 %v4724_v57, %s4232_s3 }
 0xe55   :  { %2296 = vadd.xlane.f32.xlu0 %v2295_v60  ;;  %v2571_v60 = vsel %vm713_vm3, %v3523_v54, 0 }
 0xe61   :  { %2293 = vadd.xlane.f32.xlu1 %v2292_v56 }
 0xe6b   :  { %2900 = vrot.lane.b32.xlu0 %v4724_v57, %s4234_s27  ;;  %s4236_s27 = smov [#allocation2]  }
 0xe6c   :  { %s3463_s30 = sshll.u32 %s4236_s27, 4  ;;  %s3464_s30 = int_to_ptr.vmem [resolvable:$true] %s3463_s30 }
 0xe6d   :  { %s4199_s28 = scalar_lea.vmem %s3464_s30, 32  ;;  %p4204_p1 = scmp.lt.s32.totalorder %s3464_s30, %s3464_s30 }
 0xe6e   :  { %p4200_p0 = scmp.ne.s32.totalorder %s3464_s30, %s4199_s28  ;;  %p4205_p2 = scmp.lt.s32.totalorder %s4199_s28, %s4199_s28 }
 0xe70   :  { %p4206_p3 = por %p4205_p2, %p4204_p1 }
 0xe72   :  { %2995 = vrot.lane.b32.xlu1 %v4724_v57, %s5056_s6  ;;  %p4207_p4 = pnand %p4206_p3, %p4200_p0 }
 0xe78   :  { %v2276_v63 = vpop.xlane.xlu0 %2275 }
 0xe79   :  { %4171 = vrcp.f32 %v2276_v63  ;;  %v2279_v0 = vpop.xlane.xlu1 %2278 }
 0xe7a   :  { %4173 = vrcp.f32 %v2279_v0 }
 0xe7d   :  { %v2713_v7 = vpop.permute.xlu1 %2712 }
 0xe7e   :  { %v2718_v21 = vsel %vm713_vm3, %v2713_v7, 0 }
 0xe83   :  { %v4172_v1 = vpop.eup %4171 }
 0xe84   :  { %v4174_v2 = vpop.eup %4173  ;;  %v2306_v3 = vmul.f32 %v4172_v1, %v4156_v58 }
 0xe85   :  { %v2307_v4 = vmul.f32 %v4174_v2, %v4158_v22  ;;  %v2669_v2 = vsel %vm713_vm3, %v3524_v62, 0 }
 0xe87   :  { %v2314_v45 = vpack.c.bf16 %v2307_v4, %v2306_v3 }
 0xe89   :  { %3946 = vmatmul.mubr.msk.bf16.vlgmr.msra.gmra.mrb[72].mxu1 %vm196_vm2, %v2314_v45  ;;  %v2421_v57 = vrot.slane %v2314_v45, 4 }
 0xe8a   :  { %3956 = vmatpush3.bf16.msra.mxu1 %v2428_v5  ;;  %3957 = vmatprep.mubr.msk.bf16.mxu1 %vm4224_vm1, %v4223_v18 }
 0xe8b   :  { %3967 = vmatprep.subr.bf16.mxu1 %v4223_v18 }
 0xe91   :  { %3958 = vmatmul.mubr.msk.bf16.vlgmr.msra.gmra.mrb[76].mxu1 %vm196_vm2, %v2421_v57 }
 0xe92   :  { %3968 = vmatpush3.bf16.msra.mxu1 %v2524_v6  ;;  %3969 = vmatprep.mubr.msk.bf16.mxu1 %vm4224_vm1, %v4223_v18 }
 0xe93   :  { %3979 = vmatprep.subr.bf16.mxu1 %v4223_v18 }
 0xead   :  { %v2282_v8 = vpop.xlane.xlu0 %2281 }
 0xeae   :  { %4175 = vrcp.f32 %v2282_v8 }
 0xeb1   :  { %v2285_v34 = vpop.xlane.xlu1 %2284  ;;  %v2617_v15 = vpop.permute.xlu0 %2616 }
 0xeb2   :  { %4177 = vrcp.f32 %v2285_v34  ;;  %v2622_v17 = vsel %vm713_vm3, %v2617_v15, 0 }
 0xeb5   :  { %v2288_v9 = vpop.xlane.xlu1 %2287 }
 0xeb8   :  { %v4176_v11 = vpop.eup %4175 }
 0xeb9   :  { %v2291_v10 = vpop.xlane.xlu1 %2290  ;;  %v2308_v13 = vmul.f32 %v4176_v11, %v4160_v39 }
 0xeba   :  { %4179 = vrcp.f32 %v2291_v10 }
 0xebb   :  { %4181 = vrcp.f32 %v2288_v9 }
 0xebc   :  { %v4178_v12 = vpop.eup %4177 }
 0xebd   :  { %v2309_v14 = vmul.f32 %v4178_v12, %v4162_v41  ;;  %v2808_v23 = vpop.permute.xlu1 %2807 }
 0xebe   :  { %v2813_v35 = vsel %vm713_vm3, %v2808_v23, 0 }
 0xebf   :  { %v2315_v16 = vpack.c.bf16 %v2309_v14, %v2308_v13 }
 0xec1   :  { %3970 = vmatmul.mubr.msk.bf16.vlgmr.msra.gmra.mrb[80].mxu1 %vm196_vm2, %v2315_v16  ;;  %v2615_v19 = vrot.slane %v2315_v16, 4 }
 0xec2   :  { %3980 = vmatpush3.bf16.msra.mxu1 %v2622_v17  ;;  %3981 = vmatprep.mubr.msk.bf16.mxu1 %vm4224_vm1, %v4223_v18 }
 0xec3   :  { %3991 = vmatprep.subr.bf16.mxu1 %v4223_v18 }
 0xec4   :  { %v4180_v20 = vpop.eup %4179 }
 0xec5   :  { %v4182_v58 = vpop.eup %4181  ;;  %v2311_v22 = vmul.f32 %v4180_v20, %v4821_v49 }
 0xec6   :  { %v2310_v25 = vmul.f32 %v4182_v58, %v4817_v43  ;;  %v3522_v43 = vld [vmem:[%s5029_s7 + $0x14] sm:$0xf] }
 0xec7   :  { %v2475_v51 = vsel %vm713_vm3, %v3522_v43, 0 }
 0xec8   :  { %v2316_v24 = vpack.c.bf16 %v2311_v22, %v2310_v25 }
 0xec9   :  { %3982 = vmatmul.mubr.msk.bf16.vlgmr.msra.gmra.mrb[84].mxu1 %vm196_vm2, %v2615_v19 }
 0xeca   :  { %3992 = vmatpush3.bf16.msra.mxu1 %v2718_v21  ;;  %3993 = vmatprep.mubr.msk.bf16.mxu1 %vm4224_vm1, %v4223_v18  ;;  %v2806_v26 = vrot.slane %v2316_v24, 4 }
 0xecb   :  { %4003 = vmatprep.subr.bf16.mxu1 %v4223_v18 }
 0xed1   :  { %3994 = vmatmul.mubr.msk.bf16.vlgmr.msra.gmra.mrb[88].mxu1 %vm196_vm2, %v2316_v24 }
 0xed2   :  { %4004 = vmatpush3.bf16.msra.mxu1 %v2813_v35  ;;  %4005 = vmatprep.mubr.msk.bf16.mxu1 %vm4224_vm1, %v4223_v18 }
 0xed3   :  { %4015 = vmatprep.subr.bf16.mxu1 %v4223_v18 }
 0xed9   :  { %4006 = vmatmul.mubr.msk.bf16.vlgmr.msra.gmra.mrb[92].mxu1 %vm196_vm2, %v2806_v26 }
 0xeda   :  { %4017 = vmatprep.mubr.msk.bf16.mxu1 %vm4224_vm1, %v4223_v18 }
 0xee2   :  { %v2297_v29 = vpop.xlane.xlu0 %2296 }
 0xee3   :  { %4183 = vrcp.f32 %v2297_v29 }
 0xee6   :  { %v2901_v30 = vpop.permute.xlu0 %2900 }
 0xee7   :  { %v2906_v31 = vsel %vm713_vm3, %v2901_v30, 0  ;;  %v3540_v30 = vld [vmem:[%s5030_s8 + $0x1] ss:$0 sm:$0xff] }
 0xee8   :  { %4016 = vmatpush3.bf16.msra.mxu1 %v2906_v31 }
 0xee9   :  { %4027 = vmatprep.subr.bf16.mxu1 %v4223_v18 }
 0xeed   :  { %v4184_v33 = vpop.eup %4183 }
 0xeee   :  { %v2294_v32 = vpop.xlane.xlu1 %2293  ;;  %v2313_v37 = vmul.f32 %v4184_v33, %v4830_v59 }
 0xeef   :  { %4185 = vrcp.f32 %v2294_v32 }
 0xef2   :  { %v2996_v39 = vpop.permute.xlu1 %2995 }
 0xef3   :  { %v3001_v41 = vsel %vm713_vm3, %v2996_v39, 0 }
 0xef9   :  { %v4186_v36 = vpop.eup %4185 }
 0xefa   :  { %v2312_v38 = vmul.f32 %v4186_v36, %v4834_v61 }
 0xefc   :  { %v2317_v40 = vpack.c.bf16 %v2313_v37, %v2312_v38 }
 0xefe   :  { %4018 = vmatmul.mubr.msk.bf16.vlgmr.msra.gmra.mrb[96].mxu1 %vm196_vm2, %v2317_v40  ;;  %v2994_v42 = vrot.slane %v2317_v40, 4 }
 0xeff   :  { %4028 = vmatpush3.bf16.msra.mxu1 %v3001_v41  ;;  %4029 = vmatprep.mubr.msk.bf16.mxu1 %vm4224_vm1, %v4223_v18 }
 0xf00   :  { %4039 = vmatprep.subr.bf16.mxu1 %v4223_v18 }
 0xf06   :  { %4030 = vmatmul.mubr.msk.bf16.vlgmr.msra.gmra.mrb[100].mxu1 %vm196_vm2, %v2994_v42 }
 0xf07   :  { %4043 = vmatprep.mubr.msk.bf16.mxu1 %vm4224_vm1, %v4223_v18 }
 0xf5c   :  { %v2360_v48 = vpop.f32.mrb[72].mxu1 }
 0xf5d   :  { %v2366_v49 = vpack.c.bf16 %v2360_v48, %v2360_v48  ;;  %v3947_v50 = vpop.f32.mrb[73].mxu1 }
 0xf5e   :  { %v2363_v52 = vpop.f32.mrb[74].mxu1 }
 0xf5f   :  { %v3948_v53 = vpop.f32.mrb[75].mxu1  ;;  %3952 = vmatmul.mubr.msk.bf16.vlgmr.msra.gmra.mrb[72].mxu0 %vm196_vm2, %v2366_v49 }
 0xf60   :  { %3962 = vmatpush3.bf16.msra.mxu0 %v2475_v51  ;;  %3963 = vmatprep.mubr.msk.bf16.mxu0 %vm4224_vm1, %v4223_v18 }
 0xf61   :  { %3973 = vmatprep.subr.bf16.mxu0 %v4223_v18 }
 0xf64   :  { %v2464_v55 = vpop.f32.mrb[76].mxu1 }
 0xf65   :  { %v2470_v44 = vpack.c.bf16 %v2464_v55, %v2464_v55  ;;  %v3959_v59 = vpop.f32.mrb[77].mxu1 }
 0xf66   :  { %v2467_v61 = vpop.f32.mrb[78].mxu1 }
 0xf67   :  { %v3960_v56 = vpop.f32.mrb[79].mxu1  ;;  %3964 = vmatmul.mubr.msk.bf16.vlgmr.msra.gmra.mrb[76].mxu0 %vm196_vm2, %v2470_v44 }
 0xf68   :  { %3974 = vmatpush3.bf16.msra.mxu0 %v2571_v60  ;;  %3975 = vmatprep.mubr.msk.bf16.mxu0 %vm4224_vm1, %v4223_v18 }
 0xf69   :  { %3985 = vmatprep.subr.bf16.mxu0 %v4223_v18 }
 0xf94   :  { %v2560_v63 = vpop.f32.mrb[80].mxu1 }
 0xf95   :  { %v2566_v0 = vpack.c.bf16 %v2560_v63, %v2560_v63  ;;  %v3971_v1 = vpop.f32.mrb[81].mxu1 }
 0xf96   :  { %v2563_v3 = vpop.f32.mrb[82].mxu1 }
 0xf97   :  { %v3972_v4 = vpop.f32.mrb[83].mxu1  ;;  %3976 = vmatmul.mubr.msk.bf16.vlgmr.msra.gmra.mrb[80].mxu0 %vm196_vm2, %v2566_v0 }
 0xf98   :  { %3986 = vmatpush3.bf16.msra.mxu0 %v2669_v2  ;;  %3987 = vmatprep.mubr.msk.bf16.mxu0 %vm4224_vm1, %v4223_v18 }
 0xf99   :  { %3997 = vmatprep.subr.bf16.mxu0 %v4223_v18 }
 0xf9c   :  { %v2658_v45 = vpop.f32.mrb[84].mxu1 }
 0xf9d   :  { %v2664_v5 = vpack.c.bf16 %v2658_v45, %v2658_v45  ;;  %v3983_v57 = vpop.f32.mrb[85].mxu1 }
 0xf9e   :  { %v2661_v6 = vpop.f32.mrb[86].mxu1 }
 0xf9f   :  { %v3984_v7 = vpop.f32.mrb[87].mxu1  ;;  %3988 = vmatmul.mubr.msk.bf16.vlgmr.msra.gmra.mrb[84].mxu0 %vm196_vm2, %v2664_v5 }
 0xfa0   :  { %3998 = vmatpush3.bf16.msra.mxu0 %v4876_v28  ;;  %3999 = vmatprep.mubr.msk.bf16.mxu0 %vm4224_vm1, %v4223_v18 }
 0xfa1   :  { %4009 = vmatprep.subr.bf16.mxu0 %v4223_v18 }
 0xfa4   :  { %v2754_v8 = vpop.f32.mrb[88].mxu1 }
 0xfa5   :  { %v2760_v34 = vpack.c.bf16 %v2754_v8, %v2754_v8  ;;  %v3995_v9 = vpop.f32.mrb[89].mxu1 }
 0xfa6   :  { %v2757_v11 = vpop.f32.mrb[90].mxu1 }
 0xfa7   :  { %v3996_v10 = vpop.f32.mrb[91].mxu1  ;;  %4000 = vmatmul.mubr.msk.bf16.vlgmr.msra.gmra.mrb[88].mxu0 %vm196_vm2, %v2760_v34 }
 0xfa8   :  { %4010 = vmatpush3.bf16.msra.mxu0 %v2475_v51  ;;  %4011 = vmatprep.mubr.msk.bf16.mxu0 %vm4224_vm1, %v4223_v18 }
 0xfa9   :  { %4021 = vmatprep.subr.bf16.mxu0 %v4223_v18 }
 0xfac   :  { %v2849_v12 = vpop.f32.mrb[92].mxu1 }
 0xfad   :  { %v2855_v13 = vpack.c.bf16 %v2849_v12, %v2849_v12  ;;  %v4007_v14 = vpop.f32.mrb[93].mxu1 }
 0xfae   :  { %v2852_v15 = vpop.f32.mrb[94].mxu1 }
 0xfaf   :  { %v4008_v16 = vpop.f32.mrb[95].mxu1  ;;  %4012 = vmatmul.mubr.msk.bf16.vlgmr.msra.gmra.mrb[92].mxu0 %vm196_vm2, %v2855_v13 }
 0xfb0   :  { %4022 = vmatpush3.bf16.msra.mxu0 %v2571_v60  ;;  %4023 = vmatprep.mubr.msk.bf16.mxu0 %vm4224_vm1, %v4223_v18 }
 0xfb1   :  { %4033 = vmatprep.subr.bf16.mxu0 %v4223_v18 }
 0xfd1   :  { %v2942_v17 = vpop.f32.mrb[96].mxu1 }
 0xfd2   :  { %v2948_v19 = vpack.c.bf16 %v2942_v17, %v2942_v17  ;;  %v4019_v20 = vpop.f32.mrb[97].mxu1 }
 0xfd3   :  { %v2945_v21 = vpop.f32.mrb[98].mxu1 }
 0xfd4   :  { %v4020_v58 = vpop.f32.mrb[99].mxu1  ;;  %4024 = vmatmul.mubr.msk.bf16.vlgmr.msra.gmra.mrb[96].mxu0 %vm196_vm2, %v2948_v19  ;;  %v4100_v21 = vld [vmem:[%s5033_s11 + $0x18] sm:$0xff]  }
 0xfd5   :  { %4034 = vmatpush3.bf16.msra.mxu0 %v2669_v2  ;;  %4035 = vmatprep.mubr.msk.bf16.mxu0 %vm4224_vm1, %v4223_v18 }
 0xfd6   :  { %4047 = vmatprep.subr.bf16.mxu0 %v4223_v18 }
 0xfd9   :  { %v3037_v22 = vpop.f32.mrb[100].mxu1 }
 0xfda   :  { %v3043_v25 = vpack.c.bf16 %v3037_v22, %v3037_v22  ;;  %v4031_v23 = vpop.f32.mrb[101].mxu1 }
 0xfdb   :  { %v3040_v24 = vpop.f32.mrb[102].mxu1 }
 0xfdc   :  { %v4032_v35 = vpop.f32.mrb[103].mxu1  ;;  %4036 = vmatmul.mubr.msk.bf16.vlgmr.msra.gmra.mrb[100].mxu0 %vm196_vm2, %v3043_v25 }
 0xfdd   :  { %4055 = vmatprep.mubr.msk.bf16.mxu0 %vm4224_vm1, %v4223_v18 }
0x1032   :  { %v2407_v26 = vpop.f32.mrb[72].mxu0 }
0x1033   :  { %v3953_v27 = vpop.f32.mrb[73].mxu0  ;;  %v2419_v31 = vadd.f32 %v3540_v30, %v2407_v26 }
0x1034   :  { %v2410_v28 = vpop.f32.mrb[74].mxu0 }
0x1035   :  { %v3954_v29 = vpop.f32.mrb[75].mxu0  ;;  %v3557_v28 = vld [vmem:[%s5031_s9 + $0x1] ss:$0 sm:$0xff] }
0x103a   :  { %v2511_v32 = vpop.f32.mrb[76].mxu0 }
0x103b   :  { %v2517_v33 = vadd.f32 %v2511_v32, %v2419_v31  ;;  %v3965_v36 = vpop.f32.mrb[77].mxu0  ;;  %v3558_v32 = vld [vmem:[%s5032_s10 + $0x1] ss:$0 sm:$0xff] }
0x103c   :  { %v2514_v37 = vpop.f32.mrb[78].mxu0 }
0x103d   :  { %v3966_v38 = vpop.f32.mrb[79].mxu0 }
0x106a   :  { %v2607_v39 = vpop.f32.mrb[80].mxu0 }
0x106b   :  { %v2613_v40 = vadd.f32 %v2607_v39, %v2517_v33  ;;  %v3977_v41 = vpop.f32.mrb[81].mxu0  ;;  %v4101_v39 = vld [vmem:[%s5035_s13 + $0x20] sm:$0xff]  }
0x106c   :  { %v2610_v42 = vpop.f32.mrb[82].mxu0  ;;  %4048 = vmatpush3.bf16.msra.mxu0 %v4101_v39  ;;  %v4103_v41 = vld [vmem:[%s5035_s13 + $0x30] sm:$0xff]   ;;  %v3354_v39 = vld [vmem:[%s5040_s18] sm:$0x1] }
0x106d   :  { %v3978_v43 = vpop.f32.mrb[83].mxu0  ;;  %4049 = vmatprep.subr.bf16.mxu0 %v4223_v18  ;;  %v4104_v42 = vld [vmem:[%s5035_s13 + $0x38] sm:$0xff]  }
0x106e   :  { %v3564_v43 = vld [vmem:[%s5034_s12 + $0x1] ss:$0 sm:$0xff] }
0x1072   :  { %v2705_v48 = vpop.f32.mrb[84].mxu0 }
0x1073   :  { %v2711_v49 = vadd.f32 %v2705_v48, %v2613_v40  ;;  %v3989_v50 = vpop.f32.mrb[85].mxu0  ;;  %v4102_v40 = vld [vmem:[%s5035_s13 + $0x28] sm:$0xff]  }
0x1074   :  { %v2708_v51 = vpop.f32.mrb[86].mxu0  ;;  %4050 = vmatpush3.bf16.msra.mxu0 %v4102_v40 }
0x1075   :  { %v3990_v52 = vpop.f32.mrb[87].mxu0  ;;  %v3088_v53 = vadd.f32 %v2711_v49, %v4697_v46  ;;  %4051 = vmatprep.subr.bf16.mxu0 %v4223_v18 }
0x1077   :  { %v3094_v54 = vsel %vm71_vm0, %v3088_v53, 0.0 }
0x1078   :  { %3095 = vadd.xlane.f32.xlu0 %v3094_v54  ;;  %4052 = vmatpush3.bf16.msra.mxu0 %v4103_v41 }
0x1079   :  { %4053 = vmatprep.subr.bf16.mxu0 %v4223_v18 }
0x107a   :  { %v2798_v55 = vpop.f32.mrb[88].mxu0 }
0x107b   :  { %v4001_v44 = vpop.f32.mrb[89].mxu0  ;;  %v2804_v61 = vadd.f32 %v3540_v30, %v2798_v55 }
0x107c   :  { %v2801_v59 = vpop.f32.mrb[90].mxu0  ;;  %4054 = vmatpush3.bf16.msra.mxu0 %v4104_v42 }
0x107d   :  { %v4002_v60 = vpop.f32.mrb[91].mxu0 }
0x1082   :  { %v2893_v56 = vpop.f32.mrb[92].mxu0 }
0x1083   :  { %v2899_v62 = vadd.f32 %v2893_v56, %v2804_v61  ;;  %v4013_v63 = vpop.f32.mrb[93].mxu0 }
0x1084   :  { %v2896_v0 = vpop.f32.mrb[94].mxu0 }
0x1085   :  { %v4014_v1 = vpop.f32.mrb[95].mxu0 }
0x10a7   :  { %v2986_v2 = vpop.f32.mrb[96].mxu0 }
0x10a8   :  { %v2992_v3 = vadd.f32 %v2986_v2, %v2899_v62  ;;  %v4025_v4 = vpop.f32.mrb[97].mxu0  ;;  %v3577_v2 = vld [vmem:[%s5055_s24 + $0x1] ss:$0 sm:$0xff] }
0x10a9   :  { %v2989_v45 = vpop.f32.mrb[98].mxu0 }
0x10aa   :  { %v4026_v5 = vpop.f32.mrb[99].mxu0 }
0x10af   :  { %v3081_v57 = vpop.f32.mrb[100].mxu0 }
0x10b0   :  { %v3087_v46 = vadd.f32 %v3081_v57, %v2992_v3  ;;  %v4037_v6 = vpop.f32.mrb[101].mxu0 }
0x10b1   :  { %v3084_v7 = vpop.f32.mrb[102].mxu0 }
0x10b2   :  { %v4038_v8 = vpop.f32.mrb[103].mxu0  ;;  %v3089_v34 = vadd.f32 %v3087_v46, %v4699_v47  ;;  %v4099_v47 = vld [vmem:[%s5033_s11 + $0x10] sm:$0xff]  }
0x10b3   :  { %4040 = vmatpush3.bf16.msra.mxu1 %v4099_v47  ;;  %v4106_v47 = vld [vmem:[%s5039_s17 + $0x8] sm:$0xff]  }
0x10b4   :  { %v3097_v9 = vsel %vm71_vm0, %v3089_v34, 0.0  ;;  %4041 = vmatprep.subr.bf16.mxu1 %v4223_v18 }
0x10b5   :  { %3098 = vadd.xlane.f32.xlu1 %v3097_v9 }
0x10b7   :  { %4042 = vmatpush3.bf16.msra.mxu1 %v4100_v21 }
0x10b8   :  { %4059 = vmatprep.subr.bf16.mxu1 %v4223_v18 }
0x1105   :  { %v3096_v11 = vpop.xlane.xlu0 %3095 }
0x1106   :  { %v3100_v10 = vmul.f32 0.03125, %v3096_v11 }
0x1108   :  { %v3102_v12 = vsub.f32 %v3088_v53, %v3100_v10 }
0x110a   :  { %v3104_v13 = vmul.f32 %v3102_v12, %v3102_v12 }
0x110c   :  { %v3106_v14 = vsel %vm71_vm0, %v3104_v13, 0.0 }
0x110d   :  { %3107 = vadd.xlane.f32.xlu0 %v3106_v14 }
0x1142   :  { %v3099_v15 = vpop.xlane.xlu1 %3098 }
0x1143   :  { %v3101_v16 = vmul.f32 0.03125, %v3099_v15 }
0x1145   :  { %v3103_v17 = vsub.f32 %v3089_v34, %v3101_v16 }
0x1147   :  { %v3105_v19 = vmul.f32 %v3103_v17, %v3103_v17 }
0x1149   :  { %v3109_v20 = vsel %vm71_vm0, %v3105_v19, 0.0 }
0x114a   :  { %3110 = vadd.xlane.f32.xlu0 %v3109_v20  ;;  %v4105_v20 = vld [vmem:[%s5039_s17] sm:$0xff]  }
0x119a   :  { %v3108_v58 = vpop.xlane.xlu0 %3107 }
0x119b   :  { %v3112_v22 = vmul.f32 0.03125, %v3108_v58 }
0x119d   :  { %v3114_v25 = vadd.f32 1e-12, %v3112_v22 }
0x119f   :  { %4187 = vrsqrt.f32 %v3114_v25 }
0x11a9   :  { %v4188_v26 = vpop.eup %4187 }
0x11aa   :  { %v3118_v27 = vmul.f32 %v4188_v26, %v3102_v12  ;;  %v3585_v26 = vld [vmem:[%s5037_s15 + $0x1] ss:$0 sm:$0xff] }
0x11ac   :  { %v3126_v30 = vmul.f32 %v3557_v28, %v3118_v27 }
0x11ae   :  { %v3134_v36 = vadd.f32 %v3558_v32, %v3126_v30 }
0x11d7   :  { %v3111_v23 = vpop.xlane.xlu0 %3110 }
0x11d8   :  { %v3113_v24 = vmul.f32 0.03125, %v3111_v23 }
0x11da   :  { %v3115_v35 = vadd.f32 1e-12, %v3113_v24 }
0x11dc   :  { %4189 = vrsqrt.f32 %v3115_v35 }
0x11e6   :  { %v4190_v29 = vpop.eup %4189 }
0x11e7   :  { %v3119_v31 = vmul.f32 %v4190_v29, %v3103_v17  ;;  %v3586_v29 = vld [vmem:[%s5038_s16 + $0x1] ss:$0 sm:$0xff] }
0x11e9   :  { %v3127_v33 = vmul.f32 %v3557_v28, %v3119_v31 }
0x11eb   :  { %v3135_v37 = vadd.f32 %v3558_v32, %v3127_v33 }
0x11ed   :  { %v3141_v38 = vpack.c.bf16 %v3135_v37, %v3134_v36 }
0x11ef   :  { %4044 = vmatmul.mubr.msk.bf16.vlgmr.msra.gmra.mrb[104].mxu1 %vm71_vm0, %v3141_v38 }
0x11f0   :  { %4063 = vmatprep.mubr.msk.bf16.mxu1 %vm4224_vm1, %v4223_v18  ;;  %4060 = vmatpush3.bf16.msra.mxu1 %v4105_v20 }
0x11f1   :  { %4061 = vmatprep.subr.bf16.mxu1 %v4223_v18 }
0x11f4   :  { %4062 = vmatpush3.bf16.msra.mxu1 %v4106_v47 }
0x11f5   :  { %4067 = vmatprep.subr.bf16.mxu1 %v4223_v18 }
0x12c2   :  { %v3199_v48 = vpop.f32.mrb[104].mxu1 }
0x12c3   :  { %v3200_v49 = vadd.f32 %v3564_v43, %v3199_v48  ;;  %v4045_v50 = vpop.f32.mrb[105].mxu1 }
0x12c4   :  { %v3202_v51 = vpop.f32.mrb[106].mxu1 }
0x12c5   :  { %v3208_v52 = vmul.f32 0.70710677, %v3200_v49  ;;  %v3203_v53 = vadd.f32 %v3564_v43, %v3202_v51  ;;  %v4046_v54 = vpop.f32.mrb[107].mxu1  ;;  %v3206_v61 = vmul.f32 0.5, %v3200_v49 }
0x12c7   :  { %4191 = verf.f32 %v3208_v52  ;;  %v3209_v55 = vmul.f32 0.70710677, %v3203_v53  ;;  %v3207_v56 = vmul.f32 0.5, %v3203_v53 }
0x12c9   :  { %4193 = verf.f32 %v3209_v55 }
0x12d1   :  { %v4192_v44 = vpop.eup %4191 }
0x12d2   :  { %v3212_v59 = vadd.f32 1.0, %v4192_v44 }
0x12d3   :  { %v4194_v60 = vpop.eup %4193 }
0x12d4   :  { %v3213_v62 = vadd.f32 1.0, %v4194_v60  ;;  %v3214_v63 = vmul.f32 %v3212_v59, %v3206_v61 }
0x12d6   :  { %v3215_v0 = vmul.f32 %v3213_v62, %v3207_v56 }
0x12d8   :  { %v3225_v1 = vpack.c.bf16 %v3215_v0, %v3214_v63 }
0x12da   :  { %4056 = vmatmul.mubr.msk.bf16.vlgmr.msra.gmra.mrb[104].mxu0 %vm1643_vm4, %v3225_v1 }
0x13ad   :  { %v3295_v3 = vpop.f32.mrb[104].mxu0 }
0x13ae   :  { %v3296_v4 = vadd.f32 %v3577_v2, %v3295_v3  ;;  %v4057_v45 = vpop.f32.mrb[105].mxu0 }
0x13af   :  { %v3298_v5 = vpop.f32.mrb[106].mxu0 }
0x13b0   :  { %v3299_v57 = vadd.f32 %v3577_v2, %v3298_v5  ;;  %v4058_v46 = vpop.f32.mrb[107].mxu0  ;;  %v3302_v6 = vadd.f32 %v3296_v4, %v3134_v36 }
0x13b2   :  { %v3308_v7 = vsel %vm71_vm0, %v3302_v6, 0.0  ;;  %v3303_v8 = vadd.f32 %v3299_v57, %v3135_v37 }
0x13b3   :  { %3309 = vadd.xlane.f32.xlu0 %v3308_v7 }
0x13b4   :  { %v3311_v34 = vsel %vm71_vm0, %v3303_v8, 0.0 }
0x13b5   :  { %3312 = vadd.xlane.f32.xlu1 %v3311_v34 }
0x1440   :  { %v3310_v9 = vpop.xlane.xlu0 %3309 }
0x1441   :  { %v3314_v11 = vmul.f32 0.03125, %v3310_v9 }
0x1442   :  { %v3313_v10 = vpop.xlane.xlu1 %3312 }
0x1443   :  { %v3316_v12 = vsub.f32 %v3302_v6, %v3314_v11  ;;  %v3315_v13 = vmul.f32 0.03125, %v3313_v10 }
0x1445   :  { %v3317_v14 = vsub.f32 %v3303_v8, %v3315_v13  ;;  %v3318_v15 = vmul.f32 %v3316_v12, %v3316_v12 }
0x1447   :  { %v3320_v16 = vsel %vm71_vm0, %v3318_v15, 0.0  ;;  %v3319_v17 = vmul.f32 %v3317_v14, %v3317_v14 }
0x1448   :  { %3321 = vadd.xlane.f32.xlu0 %v3320_v16 }
0x1449   :  { %v3323_v19 = vsel %vm71_vm0, %v3319_v17, 0.0 }
0x144a   :  { %3324 = vadd.xlane.f32.xlu1 %v3323_v19 }
0x14d5   :  { %v3322_v21 = vpop.xlane.xlu0 %3321 }
0x14d6   :  { %v3326_v58 = vmul.f32 0.03125, %v3322_v21 }
0x14d7   :  { %v3325_v22 = vpop.xlane.xlu1 %3324 }
0x14d8   :  { %v3328_v25 = vadd.f32 1e-12, %v3326_v58  ;;  %v3327_v23 = vmul.f32 0.03125, %v3325_v22 }
0x14da   :  { %4195 = vrsqrt.f32 %v3328_v25  ;;  %v3329_v24 = vadd.f32 1e-12, %v3327_v23 }
0x14dc   :  { %4197 = vrsqrt.f32 %v3329_v24 }
0x14e4   :  { %v4196_v35 = vpop.eup %4195 }
0x14e5   :  { %v3332_v27 = vmul.f32 %v4196_v35, %v3316_v12 }
0x14e6   :  { %v4198_v28 = vpop.eup %4197 }
0x14e7   :  { %v3340_v30 = vmul.f32 %v3585_v26, %v3332_v27  ;;  %v3333_v31 = vmul.f32 %v4198_v28, %v3317_v14 }
0x14e9   :  { %v3348_v32 = vadd.f32 %v3586_v29, %v3340_v30  ;;  %v3341_v33 = vmul.f32 %v3585_v26, %v3333_v31 }
0x14eb   :  { %v3355_v36 = vpack.c.bf16 %v3348_v32, %v3348_v32  ;;  %v3349_v37 = vadd.f32 %v3586_v29, %v3341_v33 }
0x14ed   :  { %4064 = vmatmul.mubr.msk.bf16.vlgmr.msra.gmra.mrb[108].mxu1 %vm71_vm0, %v3355_v36  ;;  %v3412_v38 = vpack.c.bf16 %v3349_v37, %v3349_v37 }
0x14ee   :  { %4068 = vmatpush3.bf16.msra.mxu1 %v4105_v20  ;;  %4071 = vmatprep.mubr.msk.bf16.mxu1 %vm4224_vm1, %v4223_v18 }
0x14ef   :  { %4069 = vmatprep.subr.bf16.mxu1 %v4223_v18 }
0x14f2   :  { %4070 = vmatpush3.bf16.msra.mxu1 %v4106_v47 }
0x14f5   :  { %4072 = vmatmul.mubr.msk.bf16.vlgmr.msra.gmra.mrb[112].mxu1 %vm71_vm0, %v3412_v38 }
0x15c0   :  { %v3405_v40 = vpop.f32.mrb[108].mxu1 }
0x15c1   :  { %v3406_v41 = vadd.f32 %v3405_v40, %v3354_v39  ;;  %v4065_v42 = vpop.f32.mrb[109].mxu1 }
0x15c2   :  { %v3408_v43 = vpop.f32.mrb[110].mxu1 }
0x15c3   :  { %3411 = vst [vmem:[#allocation2] sm:$0x1] %v3406_v41  ;;  %v4066_v48 = vpop.f32.mrb[111].mxu1 }
0x15c8   :  { %v3450_v49 = vpop.f32.mrb[112].mxu1 }
0x15c9   :  { %v3451_v50 = vadd.f32 %v3450_v49, %v3354_v39  ;;  %v4073_v18 = vpop.f32.mrb[113].mxu1 }
0x15ca   :  { %v3453_v51 = vpop.f32.mrb[114].mxu1 }
0x15cb   :  { %3456 = vst [vmem:[#allocation2 + $0x1] sm:$0x1] %v3451_v50  ;;  %v4074_v52 = vpop.f32.mrb[115].mxu1 }
0x15cc   :  { %4210 = shalt.err (!%p4207_p4)
}
0x15cd   :  { %s4211_s5 = scalar_lea.hbm %s5041_s19, 32 }
0x15ce   :  { %p4212_p5 = scmp.ne.s32.totalorder %s5041_s19, %s4211_s5  ;;  %p4215_p6 = scmp.lt.u32.totalorder %s4211_s5, %s5041_s19 }
0x15d0   :  { %p4217_p7 = pnand %p4215_p6, %p4212_p5 }
0x15d2   :  { %4220 = shalt.err (!%p4217_p7)
}
0x15d3   :  { %3466 = dma.vmem_to_hbm [thread:$0]  %s3464_s30, 32, %s5041_s19, [#allocation3]  }
0x15d4   :  { %4221 = dma.done.wait [#allocation3], 32  }
0x15d5   :  { %4222 = vsyncadd [#allocation3], 4294967264 }
0x15d6   :  { %3470 = vsyncpa [#allocation3], 1 }

</bundles_post_ra>
